<compile_context>
chip_gen: v7x
topology: tpu7x:2x2x1
jax: 0.10.0
libtpu: 0.0.40
codegen_flags: <defaults>
</compile_context>

<pallas_src>
import math
import numpy as np
import jax
import jax.numpy as jnp
from jax.experimental import pallas as pl
from jax.experimental.pallas import tpu as pltpu


# --------------------------- schedule (glue, mirrors __init__ buffers) -------
def binary_alpha_schedule(num_timesteps, schedule_type="linear"):
    # TODO(synk): original `binary_alpha_schedule` source not provided; using a
    # linear cumulative-alpha schedule (cumprod alpha: 1-1e-4 -> 1e-3).
    cum = np.linspace(1.0 - 1e-4, 1e-3, num_timesteps)
    alphas = np.empty(num_timesteps, dtype=np.float64)
    alphas[0] = cum[0]
    alphas[1:] = cum[1:] / cum[:-1]
    return alphas


def log_1_min_a_np(a):
    return np.log(1.0 - np.exp(a) + 1e-40)


# ------------------------------- slab row indices ----------------------------
R_X0 = 0                       # x_0 (binary, as float 0/1)
R_LOGITU = 1                   # logistic noise logit(u) (== Gumbel difference)
R_LA, R_LB = 2, 3              # log_alpha[t], log_1_min_alpha[t]
R_LCA, R_L1MCA = 4, 5          # log_cumprod_alpha[t], log_1_min_cumprod_alpha[t]
R_LCA_M1, R_L1MCA_M1 = 6, 7    # same at clamp(t-1, 0)
R_TSIN, R_TCOS = 8, 9          # denoiser time features (precomputed on host)
R_WKL, R_WDEC = 10, 11         # per-edge loss weights (scatter / mask / 1/pt folded)
NUM_ROWS = 12


# ----------------------------------- kernel ----------------------------------
def make_kernel(hidden, log_p1, log_1mp1, inv_out_scale, bf16_tanh):
    def logaddexp(a, b):         # one-exp form: max + log1p(exp(-|a-b|))
        return jnp.maximum(a, b) + jnp.log1p(jnp.exp(-jnp.abs(a - b)))

    def log_1_min_a(a):          # robust f32 log(1 - exp(a)) for a <= 0
        return jnp.log1p(-jnp.minimum(jnp.exp(a), 1.0 - 1e-7))

    def kernel(x_ref, wm_ref, b2d_ref, out_ref):
        lp1 = jnp.float32(log_p1)
        l1mp1 = jnp.float32(log_1mp1)

        x0_is_one = x_ref[R_X0] > 0.5
        logit_u = x_ref[R_LOGITU]
        la_t = x_ref[R_LA]
        lb_t = x_ref[R_LB]
        lca_t = x_ref[R_LCA]
        l1mca_t = x_ref[R_L1MCA]
        lca_m1 = x_ref[R_LCA_M1]
        l1mca_m1 = x_ref[R_L1MCA_M1]
        tsin = x_ref[R_TSIN]
        tcos = x_ref[R_TCOS]
        w_kl = x_ref[R_WKL]
        w_dec = x_ref[R_WDEC]

        # ---- q_sample: q(x_t|x_0) then categorical draw.  The Gumbel-argmax
        # of the original is replaced by the distributionally identical
        # logistic comparison; one-hot x0 -> exact selects.
        m1 = l1mca_t + lp1
        m0 = l1mca_t + l1mp1
        lq1 = jnp.where(x0_is_one, logaddexp(lca_t, m1), m1)
        lq0 = jnp.where(x0_is_one, m0, logaddexp(lca_t, m0))
        is_one = (lq1 - lq0) > logit_u               # sampled x_t == 1
        xt_p1 = is_one.astype(jnp.float32)

        # ---- q_posterior: x_t-dependent factors (shared true/model) ---------
        s_bp = lb_t + lp1
        a_t = jnp.where(is_one, s_bp, log_1_min_a(s_bp))
        b_t = jnp.where(is_one, logaddexp(la_t, s_bp), lb_t + l1mp1)
        e0 = l1mca_m1 + l1mp1
        e1 = l1mca_m1 + lp1

        # true posterior: one-hot x_start -> exact selects
        c_true = jnp.where(x0_is_one, e0, logaddexp(e0, lca_m1))
        d_true = jnp.where(x0_is_one, logaddexp(lca_m1, e1), e1)
        v0 = a_t + c_true
        v1 = b_t + d_true
        lse_t = logaddexp(v0, v1)
        lt0 = v0 - lse_t
        lt1 = v1 - lse_t

        # ---- surrogate denoiser MLP (first layer folded on host) ------------
        # TODO(synk): real denoiser is an external GNN (`self.model`); a small
        # MLP on (x_t, time features) stands in for it here.
        dlogit = jnp.zeros_like(xt_p1) + b2d_ref[0, 0]
        for j in range(hidden):
            pre = (wm_ref[0, j] + wm_ref[1, j] * xt_p1 +
                   wm_ref[2, j] * tsin + wm_ref[3, j] * tcos)
            if bf16_tanh:   # v6e / v7x: bf16 EUP path (~2x tanh throughput)
                th = jnp.tanh(pre.astype(jnp.bfloat16)).astype(jnp.float32)
            else:           # v5e / older: no bf16 VPU/EUP path
                th = jnp.tanh(pre)
            dlogit = dlogit + wm_ref[4, j] * th
        # 2-class log_softmax via one shared softplus term
        sp = jnp.log1p(jnp.exp(-jnp.abs(dlogit)))
        lr1 = jnp.minimum(dlogit, 0.0) - sp
        lr0 = -jnp.maximum(dlogit, 0.0) - sp

        # model posterior (general log x_start = denoiser output)
        cm = logaddexp(e0, lca_m1 + lr0)
        dm = logaddexp(lca_m1 + lr1, e1)
        u0 = a_t + cm
        u1 = b_t + dm
        lse_m = logaddexp(u0, u1)
        lm0 = u0 - lse_m
        lm1 = u1 - lse_m

        # ---- per-edge losses (compute_RB_KL; kl_prior host-hoisted) ---------
        p1 = jnp.exp(lt1)                       # normalized -> p0 = 1 - p1
        kl = (1.0 - p1) * (lt0 - lm0) + p1 * (lt1 - lm1)
        dec_nll = -jnp.where(x0_is_one, lm1, lm0)

        contrib = w_kl * kl + w_dec * dec_nll
        part = jnp.sum(contrib, axis=0, keepdims=True)   # [1, 128]
        part = jnp.sum(part, axis=1, keepdims=True)      # [1, 1]
        val = part * jnp.float32(inv_out_scale)
        out_ref[0] = jnp.broadcast_to(val, (8, 128))     # lane-dense block

    return kernel


# ----------------------------------- wrapper ----------------------------------
def binary_diffusion_forward(x_slab, w_mlp, b2d, *, hidden, log_p1, log_1mp1,
                             kl_prior_total, num_entries, tile_rows, bf16_tanh):
    rows, nr_total, lanes = x_slab.shape
    assert rows == NUM_ROWS and lanes == 128
    assert tile_rows % 8 == 0 and nr_total % tile_rows == 0
    grid_n = nr_total // tile_rows
    # v7x has 2 TensorCores/chip: keep the "parallel" edge grid even and >= 2
    # so both cores get work.
    assert grid_n >= 2 and grid_n % 2 == 0

    inv_out_scale = 1.0 / (math.log(2.0) * num_entries)
    kernel = make_kernel(hidden, log_p1, log_1mp1, inv_out_scale, bf16_tanh)

    # VMEM budget: double-buffered input tile + ~40 full-tile f32 temporaries.
    # tile_rows <= 512 keeps this well inside every generation's physical VMEM
    # (v7x: 64 MiB); set vmem_limit_bytes explicitly so v5e's 16 MiB scoped
    # default is not a blocker for large tiles.
    tile_bytes = tile_rows * 128 * 4
    est = 2 * NUM_ROWS * tile_bytes + 40 * tile_bytes
    vmem_limit = int(min(max(32 << 20, 2 * est), 96 << 20))

    out = pl.pallas_call(
        kernel,
        grid=(grid_n,),
        in_specs=[
            pl.BlockSpec((NUM_ROWS, tile_rows, 128), lambda i: (0, i, 0)),
            pl.BlockSpec(memory_space=pltpu.MemorySpace.SMEM),   # w_mlp [5,H]
            pl.BlockSpec(memory_space=pltpu.MemorySpace.SMEM),   # b2d  [1,1]
        ],
        out_specs=pl.BlockSpec((1, 8, 128), lambda i: (i, 0, 0)),
        out_shape=jax.ShapeDtypeStruct((grid_n, 8, 128), jnp.float32),
        compiler_params=pltpu.CompilerParams(
            dimension_semantics=("parallel",),
            vmem_limit_bytes=vmem_limit),
    )(x_slab, w_mlp, b2d)
    # tiny epilogue: per-tile partials (already scaled) + host-hoisted kl_prior
    return jnp.sum(out[:, 0, 0]) + jnp.float32(kl_prior_total * inv_out_scale)


# ------------------------------------ main ------------------------------------
if __name__ == "__main__":
    T = 1000                      # num_timesteps (module default)
    pi = 1e-12
    B = 2                         # graphs in the batch
    edges_per_graph = np.array([2000, 1800])
    E = int(edges_per_graph.sum())     # num_entries
    H = 32                        # surrogate-denoiser hidden width

    # ---- generation-aware tile choice: up to 512 sublane-rows per grid step;
    # grid_n forced even (>= 2) so v7x's two TensorCores both run.
    MAX_TILE_ROWS = 512
    rows_needed = (E + 127) // 128
    tile_rows = min(MAX_TILE_ROWS, max(8, ((rows_needed + 1) // 2 + 7) // 8 * 8))
    pad_edges = 2 * tile_rows * 128
    E_pad = ((E + pad_edges - 1) // pad_edges) * pad_edges

    # ---- schedule buffers (as in __init__, registered as float32) ----------
    alphas = binary_alpha_schedule(T, "linear")
    log_alpha = np.log(alphas)
    log_cumprod_alpha = np.cumsum(log_alpha)
    log_1_min_alpha = log_1_min_a_np(log_alpha)
    log_1_min_cumprod_alpha = log_1_min_a_np(log_cumprod_alpha)
    assert np.abs(np.log(np.exp(log_alpha) + np.exp(log_1_min_alpha))).sum() < 1e-5
    assert np.abs(np.log(np.exp(log_cumprod_alpha) +
                         np.exp(log_1_min_cumprod_alpha))).sum() < 1e-5

    la32 = log_alpha.astype(np.float32)
    l1ma32 = log_1_min_alpha.astype(np.float32)
    lca32 = log_cumprod_alpha.astype(np.float32)
    l1mca32 = log_1_min_cumprod_alpha.astype(np.float32)

    log_final_prob = np.log(np.array([1.0 - pi, pi], dtype=np.float64))
    log_1mp1 = float(log_final_prob[0])
    log_p1 = float(log_final_prob[1])

    key = jax.random.PRNGKey(0)
    k_attr, k_t, k_u, k_w1, k_w2 = jax.random.split(key, 5)

    # ---- synthetic batched graph: per-edge binary attr + graph membership ---
    full_edge_attr = np.asarray(jax.random.randint(k_attr, (E,), 0, 2))

    # ---- time sampling (uniform: Lt_count starts at 0 so importance sampling
    #      falls back to uniform). TODO(synk): Lt_history / Lt_count scatter
    #      updates are stateful training side effects that do not change the
    #      returned value; skipped.
    t = np.asarray(jax.random.randint(k_t, (B,), 0, T))
    pt = np.full((B,), 1.0 / T, np.float64)
    t_edge = np.repeat(t, edges_per_graph)
    tmin1_edge = np.maximum(t_edge - 1, 0)

    # fold (t==0) mask, 1/pt and the edge->graph scatter into per-edge weights
    mask_t0 = (t == 0).astype(np.float64)
    w_kl_e = np.repeat((1.0 - mask_t0) / pt, edges_per_graph)
    w_dec_e = np.repeat(mask_t0 / pt, edges_per_graph)

    # logistic noise row (== g0 - g1 of the original two-Gumbel argmax draw)
    u = np.clip(np.asarray(jax.random.uniform(k_u, (E,), jnp.float32)),
                1e-7, 1.0 - 1e-7)
    logit_u = (np.log(u) - np.log1p(-u)).astype(np.float32)

    # ---- host-hoisted kl_prior: depends only on binary x0 and t = T-1 -------
    lca_T = float(lca32[T - 1])
    l1mca_T = float(l1mca32[T - 1])
    LOG_EPS = math.log(1e-30)

    def klp(x0_bit):
        lx1 = 0.0 if x0_bit else LOG_EPS
        lx0 = LOG_EPS if x0_bit else 0.0
        lqT1 = np.logaddexp(lx1 + lca_T, l1mca_T + log_p1)
        lqT0 = np.logaddexp(lx0 + lca_T, l1mca_T + log_1mp1)
        return (math.exp(lqT0) * (lqT0 - log_1mp1) +
                math.exp(lqT1) * (lqT1 - log_p1))

    n1 = int(full_edge_attr.sum())
    kl_prior_total = n1 * klp(1) + (E - n1) * klp(0)

    # ---- pack all per-edge data into one lane/sublane-dense slab ------------
    X = np.zeros((NUM_ROWS, E_pad), np.float32)
    # padding defaults: finite values everywhere, zero loss weights
    X[R_LA, :] = la32[0]
    X[R_LB, :] = l1ma32[0]
    X[R_LCA, :] = lca32[0]
    X[R_L1MCA, :] = l1mca32[0]
    X[R_LCA_M1, :] = lca32[0]
    X[R_L1MCA_M1, :] = l1mca32[0]
    X[R_TCOS, :] = 1.0
    # real edges
    X[R_X0, :E] = full_edge_attr.astype(np.float32)
    X[R_LOGITU, :E] = logit_u
    X[R_LA, :E] = la32[t_edge]
    X[R_LB, :E] = l1ma32[t_edge]
    X[R_LCA, :E] = lca32[t_edge]
    X[R_L1MCA, :E] = l1mca32[t_edge]
    X[R_LCA_M1, :E] = lca32[tmin1_edge]
    X[R_L1MCA_M1, :E] = l1mca32[tmin1_edge]
    X[R_TSIN, :E] = np.sin(t_edge * 0.01).astype(np.float32)
    X[R_TCOS, :E] = np.cos(t_edge * 0.01).astype(np.float32)
    X[R_WKL, :E] = w_kl_e.astype(np.float32)
    X[R_WDEC, :E] = w_dec_e.astype(np.float32)
    x_slab = jnp.asarray(X.reshape(NUM_ROWS, E_pad // 128, 128))

    # ---- surrogate-denoiser parameters, first layer folded on the host ------
    # pre_j = (w1[0,j]+b1[j]) + (w1[1,j]-w1[0,j])*xt_p1 + w1[2,j]*tsin + w1[3,j]*tcos
    w1 = np.asarray(jax.random.normal(k_w1, (4, H), jnp.float32)) * 0.5
    b1 = np.zeros((H,), np.float32)
    w2 = np.asarray(jax.random.normal(k_w2, (H, 2), jnp.float32)) * 0.5
    b2 = np.zeros((2,), np.float32)
    w_mlp = np.stack([w1[0] + b1,           # constant term (xt_p0 = 1 - xt_p1 folded)
                      w1[1] - w1[0],        # xt_p1 coefficient
                      w1[2], w1[3],         # time-feature coefficients
                      w2[:, 1] - w2[:, 0]   # 2-class logit difference
                      ]).astype(np.float32)
    b2d = np.array([[b2[1] - b2[0]]], np.float32)

    # bf16 tanh only where the EUP has a bf16 path (v6e / v7x, not v5e/older)
    kind = jax.devices()[0].device_kind.lower()
    bf16_tanh = not any(s in kind for s in ("v2", "v3", "v4", "v5"))

    out = binary_diffusion_forward(
        x_slab, jnp.asarray(w_mlp), jnp.asarray(b2d), hidden=H,
        log_p1=log_p1, log_1mp1=log_1mp1,
        kl_prior_total=float(kl_prior_total), num_entries=E,
        tile_rows=tile_rows, bf16_tanh=bf16_tanh)
    out = jax.block_until_ready(out)
    assert np.isfinite(float(out))
    print("KERNEL_OK")
</pallas_src>

<mosaic_0001>
module attributes {stable_mosaic.version = 11 : i64} {
  func.func @kernel(%arg0: i32, %arg1: memref<12x16x128xf32, #tpu.memory_space<vmem>>, %arg2: memref<5x32xf32, #tpu.memory_space<smem>>, %arg3: memref<1x1xf32, #tpu.memory_space<smem>>, %arg4: memref<1x8x128xf32, #tpu.memory_space<vmem>>) attributes {dimension_semantics = [#tpu.dimension_semantics<parallel>], iteration_bounds = array<i64: 2>, scalar_prefetch = 0 : i64, scratch_operands = 0 : i64, tpu.core_type = #tpu.core_type<tc>, window_params = [{transform_indices = @transform_0, window_bounds = array<i64: 12, 16, 128>}, {transform_indices = @transform_1, window_bounds = array<i64: 5, 32>}, {transform_indices = @transform_2, window_bounds = array<i64: 1, 1>}, {transform_indices = @transform_3, window_bounds = array<i64: 1, 8, 128>}]} {
    %c0 = arith.constant 0 : index
    %c0_0 = arith.constant 0 : index
    %c0_1 = arith.constant 0 : index
    %0 = vector.load %arg1[%c0, %c0_0, %c0_1] : memref<12x16x128xf32, #tpu.memory_space<vmem>>, vector<1x16x128xf32>
    %1 = vector.shape_cast %0 : vector<1x16x128xf32> to vector<16x128xf32>
    %cst = arith.constant 5.000000e-01 : f32
    %2 = vector.broadcast %cst : f32 to vector<16x128xf32>
    %3 = arith.cmpf ogt, %1, %2 : vector<16x128xf32>
    %c1 = arith.constant 1 : index
    %c0_2 = arith.constant 0 : index
    %c0_3 = arith.constant 0 : index
    %4 = vector.load %arg1[%c1, %c0_2, %c0_3] : memref<12x16x128xf32, #tpu.memory_space<vmem>>, vector<1x16x128xf32>
    %5 = vector.shape_cast %4 : vector<1x16x128xf32> to vector<16x128xf32>
    %c2 = arith.constant 2 : index
    %c0_4 = arith.constant 0 : index
    %c0_5 = arith.constant 0 : index
    %6 = vector.load %arg1[%c2, %c0_4, %c0_5] : memref<12x16x128xf32, #tpu.memory_space<vmem>>, vector<1x16x128xf32>
    %7 = vector.shape_cast %6 : vector<1x16x128xf32> to vector<16x128xf32>
    %c3 = arith.constant 3 : index
    %c0_6 = arith.constant 0 : index
    %c0_7 = arith.constant 0 : index
    %8 = vector.load %arg1[%c3, %c0_6, %c0_7] : memref<12x16x128xf32, #tpu.memory_space<vmem>>, vector<1x16x128xf32>
    %9 = vector.shape_cast %8 : vector<1x16x128xf32> to vector<16x128xf32>
    %c4 = arith.constant 4 : index
    %c0_8 = arith.constant 0 : index
    %c0_9 = arith.constant 0 : index
    %10 = vector.load %arg1[%c4, %c0_8, %c0_9] : memref<12x16x128xf32, #tpu.memory_space<vmem>>, vector<1x16x128xf32>
    %11 = vector.shape_cast %10 : vector<1x16x128xf32> to vector<16x128xf32>
    %c5 = arith.constant 5 : index
    %c0_10 = arith.constant 0 : index
    %c0_11 = arith.constant 0 : index
    %12 = vector.load %arg1[%c5, %c0_10, %c0_11] : memref<12x16x128xf32, #tpu.memory_space<vmem>>, vector<1x16x128xf32>
    %13 = vector.shape_cast %12 : vector<1x16x128xf32> to vector<16x128xf32>
    %c6 = arith.constant 6 : index
    %c0_12 = arith.constant 0 : index
    %c0_13 = arith.constant 0 : index
    %14 = vector.load %arg1[%c6, %c0_12, %c0_13] : memref<12x16x128xf32, #tpu.memory_space<vmem>>, vector<1x16x128xf32>
    %15 = vector.shape_cast %14 : vector<1x16x128xf32> to vector<16x128xf32>
    %c7 = arith.constant 7 : index
    %c0_14 = arith.constant 0 : index
    %c0_15 = arith.constant 0 : index
    %16 = vector.load %arg1[%c7, %c0_14, %c0_15] : memref<12x16x128xf32, #tpu.memory_space<vmem>>, vector<1x16x128xf32>
    %17 = vector.shape_cast %16 : vector<1x16x128xf32> to vector<16x128xf32>
    %c8 = arith.constant 8 : index
    %c0_16 = arith.constant 0 : index
    %c0_17 = arith.constant 0 : index
    %18 = vector.load %arg1[%c8, %c0_16, %c0_17] : memref<12x16x128xf32, #tpu.memory_space<vmem>>, vector<1x16x128xf32>
    %19 = vector.shape_cast %18 : vector<1x16x128xf32> to vector<16x128xf32>
    %c9 = arith.constant 9 : index
    %c0_18 = arith.constant 0 : index
    %c0_19 = arith.constant 0 : index
    %20 = vector.load %arg1[%c9, %c0_18, %c0_19] : memref<12x16x128xf32, #tpu.memory_space<vmem>>, vector<1x16x128xf32>
    %21 = vector.shape_cast %20 : vector<1x16x128xf32> to vector<16x128xf32>
    %c10 = arith.constant 10 : index
    %c0_20 = arith.constant 0 : index
    %c0_21 = arith.constant 0 : index
    %22 = vector.load %arg1[%c10, %c0_20, %c0_21] : memref<12x16x128xf32, #tpu.memory_space<vmem>>, vector<1x16x128xf32>
    %23 = vector.shape_cast %22 : vector<1x16x128xf32> to vector<16x128xf32>
    %c11 = arith.constant 11 : index
    %c0_22 = arith.constant 0 : index
    %c0_23 = arith.constant 0 : index
    %24 = vector.load %arg1[%c11, %c0_22, %c0_23] : memref<12x16x128xf32, #tpu.memory_space<vmem>>, vector<1x16x128xf32>
    %25 = vector.shape_cast %24 : vector<1x16x128xf32> to vector<16x128xf32>
    %cst_24 = arith.constant -27.6310215 : f32
    %26 = vector.broadcast %cst_24 : f32 to vector<16x128xf32>
    %27 = arith.addf %13, %26 : vector<16x128xf32>
    %cst_25 = arith.constant -9.99977878E-13 : f32
    %28 = vector.broadcast %cst_25 : f32 to vector<16x128xf32>
    %29 = arith.addf %13, %28 : vector<16x128xf32>
    %30 = arith.maximumf %11, %27 : vector<16x128xf32>
    %31 = arith.subf %11, %27 : vector<16x128xf32>
    %32 = math.absf %31 : vector<16x128xf32>
    %cst_26 = arith.constant 0.000000e+00 : f32
    %33 = vector.broadcast %cst_26 : f32 to vector<16x128xf32>
    %34 = arith.subf %33, %32 : vector<16x128xf32>
    %35 = math.exp %34 : vector<16x128xf32>
    %36 = math.log1p %35 : vector<16x128xf32>
    %37 = arith.addf %30, %36 : vector<16x128xf32>
    %38 = arith.select %3, %37, %27 : vector<16x128xi1>, vector<16x128xf32>
    %39 = arith.maximumf %11, %29 : vector<16x128xf32>
    %40 = arith.subf %11, %29 : vector<16x128xf32>
    %41 = math.absf %40 : vector<16x128xf32>
    %cst_27 = arith.constant 0.000000e+00 : f32
    %42 = vector.broadcast %cst_27 : f32 to vector<16x128xf32>
    %43 = arith.subf %42, %41 : vector<16x128xf32>
    %44 = math.exp %43 : vector<16x128xf32>
    %45 = math.log1p %44 : vector<16x128xf32>
    %46 = arith.addf %39, %45 : vector<16x128xf32>
    %47 = arith.select %3, %29, %46 : vector<16x128xi1>, vector<16x128xf32>
    %48 = arith.subf %38, %47 : vector<16x128xf32>
    %49 = arith.cmpf ogt, %48, %5 : vector<16x128xf32>
    %50 = arith.extui %49 : vector<16x128xi1> to vector<16x128xi32>
    %51 = arith.sitofp %50 : vector<16x128xi32> to vector<16x128xf32>
    %cst_28 = arith.constant -27.6310215 : f32
    %52 = vector.broadcast %cst_28 : f32 to vector<16x128xf32>
    %53 = arith.addf %9, %52 : vector<16x128xf32>
    %54 = math.exp %53 : vector<16x128xf32>
    %cst_29 = arith.constant 0.99999988 : f32
    %55 = vector.broadcast %cst_29 : f32 to vector<16x128xf32>
    %56 = arith.minimumf %54, %55 : vector<16x128xf32>
    %cst_30 = arith.constant 0.000000e+00 : f32
    %57 = vector.broadcast %cst_30 : f32 to vector<16x128xf32>
    %58 = arith.subf %57, %56 : vector<16x128xf32>
    %59 = math.log1p %58 : vector<16x128xf32>
    %60 = arith.select %49, %53, %59 : vector<16x128xi1>, vector<16x128xf32>
    %61 = arith.maximumf %7, %53 : vector<16x128xf32>
    %62 = arith.subf %7, %53 : vector<16x128xf32>
    %63 = math.absf %62 : vector<16x128xf32>
    %cst_31 = arith.constant 0.000000e+00 : f32
    %64 = vector.broadcast %cst_31 : f32 to vector<16x128xf32>
    %65 = arith.subf %64, %63 : vector<16x128xf32>
    %66 = math.exp %65 : vector<16x128xf32>
    %67 = math.log1p %66 : vector<16x128xf32>
    %68 = arith.addf %61, %67 : vector<16x128xf32>
    %cst_32 = arith.constant -9.99977878E-13 : f32
    %69 = vector.broadcast %cst_32 : f32 to vector<16x128xf32>
    %70 = arith.addf %9, %69 : vector<16x128xf32>
    %71 = arith.select %49, %68, %70 : vector<16x128xi1>, vector<16x128xf32>
    %cst_33 = arith.constant -9.99977878E-13 : f32
    %72 = vector.broadcast %cst_33 : f32 to vector<16x128xf32>
    %73 = arith.addf %17, %72 : vector<16x128xf32>
    %cst_34 = arith.constant -27.6310215 : f32
    %74 = vector.broadcast %cst_34 : f32 to vector<16x128xf32>
    %75 = arith.addf %17, %74 : vector<16x128xf32>
    %76 = arith.maximumf %73, %15 : vector<16x128xf32>
    %77 = arith.subf %73, %15 : vector<16x128xf32>
    %78 = math.absf %77 : vector<16x128xf32>
    %cst_35 = arith.constant 0.000000e+00 : f32
    %79 = vector.broadcast %cst_35 : f32 to vector<16x128xf32>
    %80 = arith.subf %79, %78 : vector<16x128xf32>
    %81 = math.exp %80 : vector<16x128xf32>
    %82 = math.log1p %81 : vector<16x128xf32>
    %83 = arith.addf %76, %82 : vector<16x128xf32>
    %84 = arith.select %3, %73, %83 : vector<16x128xi1>, vector<16x128xf32>
    %85 = arith.maximumf %15, %75 : vector<16x128xf32>
    %86 = arith.subf %15, %75 : vector<16x128xf32>
    %87 = math.absf %86 : vector<16x128xf32>
    %cst_36 = arith.constant 0.000000e+00 : f32
    %88 = vector.broadcast %cst_36 : f32 to vector<16x128xf32>
    %89 = arith.subf %88, %87 : vector<16x128xf32>
    %90 = math.exp %89 : vector<16x128xf32>
    %91 = math.log1p %90 : vector<16x128xf32>
    %92 = arith.addf %85, %91 : vector<16x128xf32>
    %93 = arith.select %3, %92, %75 : vector<16x128xi1>, vector<16x128xf32>
    %94 = arith.addf %60, %84 : vector<16x128xf32>
    %95 = arith.addf %71, %93 : vector<16x128xf32>
    %96 = arith.maximumf %94, %95 : vector<16x128xf32>
    %97 = arith.subf %94, %95 : vector<16x128xf32>
    %98 = math.absf %97 : vector<16x128xf32>
    %cst_37 = arith.constant 0.000000e+00 : f32
    %99 = vector.broadcast %cst_37 : f32 to vector<16x128xf32>
    %100 = arith.subf %99, %98 : vector<16x128xf32>
    %101 = math.exp %100 : vector<16x128xf32>
    %102 = math.log1p %101 : vector<16x128xf32>
    %103 = arith.addf %96, %102 : vector<16x128xf32>
    %104 = arith.subf %94, %103 : vector<16x128xf32>
    %105 = arith.subf %95, %103 : vector<16x128xf32>
    %cst_38 = arith.constant 0.000000e+00 : f32
    %106 = vector.broadcast %cst_38 : f32 to vector<16x128xf32>
    %c0_39 = arith.constant 0 : index
    %c0_40 = arith.constant 0 : index
    %107 = memref.load %arg3[%c0_39, %c0_40] : memref<1x1xf32, #tpu.memory_space<smem>>
    %108 = vector.broadcast %107 : f32 to vector<16x128xf32>
    %109 = arith.addf %106, %108 : vector<16x128xf32>
    %c0_41 = arith.constant 0 : index
    %c0_42 = arith.constant 0 : index
    %110 = memref.load %arg2[%c0_41, %c0_42] : memref<5x32xf32, #tpu.memory_space<smem>>
    %c1_43 = arith.constant 1 : index
    %c0_44 = arith.constant 0 : index
    %111 = memref.load %arg2[%c1_43, %c0_44] : memref<5x32xf32, #tpu.memory_space<smem>>
    %112 = vector.broadcast %111 : f32 to vector<16x128xf32>
    %113 = arith.mulf %112, %51 : vector<16x128xf32>
    %114 = vector.broadcast %110 : f32 to vector<16x128xf32>
    %115 = arith.addf %114, %113 : vector<16x128xf32>
    %c2_45 = arith.constant 2 : index
    %c0_46 = arith.constant 0 : index
    %116 = memref.load %arg2[%c2_45, %c0_46] : memref<5x32xf32, #tpu.memory_space<smem>>
    %117 = vector.broadcast %116 : f32 to vector<16x128xf32>
    %118 = arith.mulf %117, %19 : vector<16x128xf32>
    %119 = arith.addf %115, %118 : vector<16x128xf32>
    %c3_47 = arith.constant 3 : index
    %c0_48 = arith.constant 0 : index
    %120 = memref.load %arg2[%c3_47, %c0_48] : memref<5x32xf32, #tpu.memory_space<smem>>
    %121 = vector.broadcast %120 : f32 to vector<16x128xf32>
    %122 = arith.mulf %121, %21 : vector<16x128xf32>
    %123 = arith.addf %119, %122 : vector<16x128xf32>
    %124 = arith.truncf %123 : vector<16x128xf32> to vector<16x128xbf16>
    %125 = math.tanh %124 : vector<16x128xbf16>
    %126 = arith.extf %125 : vector<16x128xbf16> to vector<16x128xf32>
    %c4_49 = arith.constant 4 : index
    %c0_50 = arith.constant 0 : index
    %127 = memref.load %arg2[%c4_49, %c0_50] : memref<5x32xf32, #tpu.memory_space<smem>>
    %128 = vector.broadcast %127 : f32 to vector<16x128xf32>
    %129 = arith.mulf %128, %126 : vector<16x128xf32>
    %130 = arith.addf %109, %129 : vector<16x128xf32>
    %c0_51 = arith.constant 0 : index
    %c1_52 = arith.constant 1 : index
    %131 = memref.load %arg2[%c0_51, %c1_52] : memref<5x32xf32, #tpu.memory_space<smem>>
    %c1_53 = arith.constant 1 : index
    %c1_54 = arith.constant 1 : index
    %132 = memref.load %arg2[%c1_53, %c1_54] : memref<5x32xf32, #tpu.memory_space<smem>>
    %133 = vector.broadcast %132 : f32 to vector<16x128xf32>
    %134 = arith.mulf %133, %51 : vector<16x128xf32>
    %135 = vector.broadcast %131 : f32 to vector<16x128xf32>
    %136 = arith.addf %135, %134 : vector<16x128xf32>
    %c2_55 = arith.constant 2 : index
    %c1_56 = arith.constant 1 : index
    %137 = memref.load %arg2[%c2_55, %c1_56] : memref<5x32xf32, #tpu.memory_space<smem>>
    %138 = vector.broadcast %137 : f32 to vector<16x128xf32>
    %139 = arith.mulf %138, %19 : vector<16x128xf32>
    %140 = arith.addf %136, %139 : vector<16x128xf32>
    %c3_57 = arith.constant 3 : index
    %c1_58 = arith.constant 1 : index
    %141 = memref.load %arg2[%c3_57, %c1_58] : memref<5x32xf32, #tpu.memory_space<smem>>
    %142 = vector.broadcast %141 : f32 to vector<16x128xf32>
    %143 = arith.mulf %142, %21 : vector<16x128xf32>
    %144 = arith.addf %140, %143 : vector<16x128xf32>
    %145 = arith.truncf %144 : vector<16x128xf32> to vector<16x128xbf16>
    %146 = math.tanh %145 : vector<16x128xbf16>
    %147 = arith.extf %146 : vector<16x128xbf16> to vector<16x128xf32>
    %c4_59 = arith.constant 4 : index
    %c1_60 = arith.constant 1 : index
    %148 = memref.load %arg2[%c4_59, %c1_60] : memref<5x32xf32, #tpu.memory_space<smem>>
    %149 = vector.broadcast %148 : f32 to vector<16x128xf32>
    %150 = arith.mulf %149, %147 : vector<16x128xf32>
    %151 = arith.addf %130, %150 : vector<16x128xf32>
    %c0_61 = arith.constant 0 : index
    %c2_62 = arith.constant 2 : index
    %152 = memref.load %arg2[%c0_61, %c2_62] : memref<5x32xf32, #tpu.memory_space<smem>>
    %c1_63 = arith.constant 1 : index
    %c2_64 = arith.constant 2 : index
    %153 = memref.load %arg2[%c1_63, %c2_64] : memref<5x32xf32, #tpu.memory_space<smem>>
    %154 = vector.broadcast %153 : f32 to vector<16x128xf32>
    %155 = arith.mulf %154, %51 : vector<16x128xf32>
    %156 = vector.broadcast %152 : f32 to vector<16x128xf32>
    %157 = arith.addf %156, %155 : vector<16x128xf32>
    %c2_65 = arith.constant 2 : index
    %c2_66 = arith.constant 2 : index
    %158 = memref.load %arg2[%c2_65, %c2_66] : memref<5x32xf32, #tpu.memory_space<smem>>
    %159 = vector.broadcast %158 : f32 to vector<16x128xf32>
    %160 = arith.mulf %159, %19 : vector<16x128xf32>
    %161 = arith.addf %157, %160 : vector<16x128xf32>
    %c3_67 = arith.constant 3 : index
    %c2_68 = arith.constant 2 : index
    %162 = memref.load %arg2[%c3_67, %c2_68] : memref<5x32xf32, #tpu.memory_space<smem>>
    %163 = vector.broadcast %162 : f32 to vector<16x128xf32>
    %164 = arith.mulf %163, %21 : vector<16x128xf32>
    %165 = arith.addf %161, %164 : vector<16x128xf32>
    %166 = arith.truncf %165 : vector<16x128xf32> to vector<16x128xbf16>
    %167 = math.tanh %166 : vector<16x128xbf16>
    %168 = arith.extf %167 : vector<16x128xbf16> to vector<16x128xf32>
    %c4_69 = arith.constant 4 : index
    %c2_70 = arith.constant 2 : index
    %169 = memref.load %arg2[%c4_69, %c2_70] : memref<5x32xf32, #tpu.memory_space<smem>>
    %170 = vector.broadcast %169 : f32 to vector<16x128xf32>
    %171 = arith.mulf %170, %168 : vector<16x128xf32>
    %172 = arith.addf %151, %171 : vector<16x128xf32>
    %c0_71 = arith.constant 0 : index
    %c3_72 = arith.constant 3 : index
    %173 = memref.load %arg2[%c0_71, %c3_72] : memref<5x32xf32, #tpu.memory_space<smem>>
    %c1_73 = arith.constant 1 : index
    %c3_74 = arith.constant 3 : index
    %174 = memref.load %arg2[%c1_73, %c3_74] : memref<5x32xf32, #tpu.memory_space<smem>>
    %175 = vector.broadcast %174 : f32 to vector<16x128xf32>
    %176 = arith.mulf %175, %51 : vector<16x128xf32>
    %177 = vector.broadcast %173 : f32 to vector<16x128xf32>
    %178 = arith.addf %177, %176 : vector<16x128xf32>
    %c2_75 = arith.constant 2 : index
    %c3_76 = arith.constant 3 : index
    %179 = memref.load %arg2[%c2_75, %c3_76] : memref<5x32xf32, #tpu.memory_space<smem>>
    %180 = vector.broadcast %179 : f32 to vector<16x128xf32>
    %181 = arith.mulf %180, %19 : vector<16x128xf32>
    %182 = arith.addf %178, %181 : vector<16x128xf32>
    %c3_77 = arith.constant 3 : index
    %c3_78 = arith.constant 3 : index
    %183 = memref.load %arg2[%c3_77, %c3_78] : memref<5x32xf32, #tpu.memory_space<smem>>
    %184 = vector.broadcast %183 : f32 to vector<16x128xf32>
    %185 = arith.mulf %184, %21 : vector<16x128xf32>
    %186 = arith.addf %182, %185 : vector<16x128xf32>
    %187 = arith.truncf %186 : vector<16x128xf32> to vector<16x128xbf16>
    %188 = math.tanh %187 : vector<16x128xbf16>
    %189 = arith.extf %188 : vector<16x128xbf16> to vector<16x128xf32>
    %c4_79 = arith.constant 4 : index
    %c3_80 = arith.constant 3 : index
    %190 = memref.load %arg2[%c4_79, %c3_80] : memref<5x32xf32, #tpu.memory_space<smem>>
    %191 = vector.broadcast %190 : f32 to vector<16x128xf32>
    %192 = arith.mulf %191, %189 : vector<16x128xf32>
    %193 = arith.addf %172, %192 : vector<16x128xf32>
    %c0_81 = arith.constant 0 : index
    %c4_82 = arith.constant 4 : index
    %194 = memref.load %arg2[%c0_81, %c4_82] : memref<5x32xf32, #tpu.memory_space<smem>>
    %c1_83 = arith.constant 1 : index
    %c4_84 = arith.constant 4 : index
    %195 = memref.load %arg2[%c1_83, %c4_84] : memref<5x32xf32, #tpu.memory_space<smem>>
    %196 = vector.broadcast %195 : f32 to vector<16x128xf32>
    %197 = arith.mulf %196, %51 : vector<16x128xf32>
    %198 = vector.broadcast %194 : f32 to vector<16x128xf32>
    %199 = arith.addf %198, %197 : vector<16x128xf32>
    %c2_85 = arith.constant 2 : index
    %c4_86 = arith.constant 4 : index
    %200 = memref.load %arg2[%c2_85, %c4_86] : memref<5x32xf32, #tpu.memory_space<smem>>
    %201 = vector.broadcast %200 : f32 to vector<16x128xf32>
    %202 = arith.mulf %201, %19 : vector<16x128xf32>
    %203 = arith.addf %199, %202 : vector<16x128xf32>
    %c3_87 = arith.constant 3 : index
    %c4_88 = arith.constant 4 : index
    %204 = memref.load %arg2[%c3_87, %c4_88] : memref<5x32xf32, #tpu.memory_space<smem>>
    %205 = vector.broadcast %204 : f32 to vector<16x128xf32>
    %206 = arith.mulf %205, %21 : vector<16x128xf32>
    %207 = arith.addf %203, %206 : vector<16x128xf32>
    %208 = arith.truncf %207 : vector<16x128xf32> to vector<16x128xbf16>
    %209 = math.tanh %208 : vector<16x128xbf16>
    %210 = arith.extf %209 : vector<16x128xbf16> to vector<16x128xf32>
    %c4_89 = arith.constant 4 : index
    %c4_90 = arith.constant 4 : index
    %211 = memref.load %arg2[%c4_89, %c4_90] : memref<5x32xf32, #tpu.memory_space<smem>>
    %212 = vector.broadcast %211 : f32 to vector<16x128xf32>
    %213 = arith.mulf %212, %210 : vector<16x128xf32>
    %214 = arith.addf %193, %213 : vector<16x128xf32>
    %c0_91 = arith.constant 0 : index
    %c5_92 = arith.constant 5 : index
    %215 = memref.load %arg2[%c0_91, %c5_92] : memref<5x32xf32, #tpu.memory_space<smem>>
    %c1_93 = arith.constant 1 : index
    %c5_94 = arith.constant 5 : index
    %216 = memref.load %arg2[%c1_93, %c5_94] : memref<5x32xf32, #tpu.memory_space<smem>>
    %217 = vector.broadcast %216 : f32 to vector<16x128xf32>
    %218 = arith.mulf %217, %51 : vector<16x128xf32>
    %219 = vector.broadcast %215 : f32 to vector<16x128xf32>
    %220 = arith.addf %219, %218 : vector<16x128xf32>
    %c2_95 = arith.constant 2 : index
    %c5_96 = arith.constant 5 : index
    %221 = memref.load %arg2[%c2_95, %c5_96] : memref<5x32xf32, #tpu.memory_space<smem>>
    %222 = vector.broadcast %221 : f32 to vector<16x128xf32>
    %223 = arith.mulf %222, %19 : vector<16x128xf32>
    %224 = arith.addf %220, %223 : vector<16x128xf32>
    %c3_97 = arith.constant 3 : index
    %c5_98 = arith.constant 5 : index
    %225 = memref.load %arg2[%c3_97, %c5_98] : memref<5x32xf32, #tpu.memory_space<smem>>
    %226 = vector.broadcast %225 : f32 to vector<16x128xf32>
    %227 = arith.mulf %226, %21 : vector<16x128xf32>
    %228 = arith.addf %224, %227 : vector<16x128xf32>
    %229 = arith.truncf %228 : vector<16x128xf32> to vector<16x128xbf16>
    %230 = math.tanh %229 : vector<16x128xbf16>
    %231 = arith.extf %230 : vector<16x128xbf16> to vector<16x128xf32>
    %c4_99 = arith.constant 4 : index
    %c5_100 = arith.constant 5 : index
    %232 = memref.load %arg2[%c4_99, %c5_100] : memref<5x32xf32, #tpu.memory_space<smem>>
    %233 = vector.broadcast %232 : f32 to vector<16x128xf32>
    %234 = arith.mulf %233, %231 : vector<16x128xf32>
    %235 = arith.addf %214, %234 : vector<16x128xf32>
    %c0_101 = arith.constant 0 : index
    %c6_102 = arith.constant 6 : index
    %236 = memref.load %arg2[%c0_101, %c6_102] : memref<5x32xf32, #tpu.memory_space<smem>>
    %c1_103 = arith.constant 1 : index
    %c6_104 = arith.constant 6 : index
    %237 = memref.load %arg2[%c1_103, %c6_104] : memref<5x32xf32, #tpu.memory_space<smem>>
    %238 = vector.broadcast %237 : f32 to vector<16x128xf32>
    %239 = arith.mulf %238, %51 : vector<16x128xf32>
    %240 = vector.broadcast %236 : f32 to vector<16x128xf32>
    %241 = arith.addf %240, %239 : vector<16x128xf32>
    %c2_105 = arith.constant 2 : index
    %c6_106 = arith.constant 6 : index
    %242 = memref.load %arg2[%c2_105, %c6_106] : memref<5x32xf32, #tpu.memory_space<smem>>
    %243 = vector.broadcast %242 : f32 to vector<16x128xf32>
    %244 = arith.mulf %243, %19 : vector<16x128xf32>
    %245 = arith.addf %241, %244 : vector<16x128xf32>
    %c3_107 = arith.constant 3 : index
    %c6_108 = arith.constant 6 : index
    %246 = memref.load %arg2[%c3_107, %c6_108] : memref<5x32xf32, #tpu.memory_space<smem>>
    %247 = vector.broadcast %246 : f32 to vector<16x128xf32>
    %248 = arith.mulf %247, %21 : vector<16x128xf32>
    %249 = arith.addf %245, %248 : vector<16x128xf32>
    %250 = arith.truncf %249 : vector<16x128xf32> to vector<16x128xbf16>
    %251 = math.tanh %250 : vector<16x128xbf16>
    %252 = arith.extf %251 : vector<16x128xbf16> to vector<16x128xf32>
    %c4_109 = arith.constant 4 : index
    %c6_110 = arith.constant 6 : index
    %253 = memref.load %arg2[%c4_109, %c6_110] : memref<5x32xf32, #tpu.memory_space<smem>>
    %254 = vector.broadcast %253 : f32 to vector<16x128xf32>
    %255 = arith.mulf %254, %252 : vector<16x128xf32>
    %256 = arith.addf %235, %255 : vector<16x128xf32>
    %c0_111 = arith.constant 0 : index
    %c7_112 = arith.constant 7 : index
    %257 = memref.load %arg2[%c0_111, %c7_112] : memref<5x32xf32, #tpu.memory_space<smem>>
    %c1_113 = arith.constant 1 : index
    %c7_114 = arith.constant 7 : index
    %258 = memref.load %arg2[%c1_113, %c7_114] : memref<5x32xf32, #tpu.memory_space<smem>>
    %259 = vector.broadcast %258 : f32 to vector<16x128xf32>
    %260 = arith.mulf %259, %51 : vector<16x128xf32>
    %261 = vector.broadcast %257 : f32 to vector<16x128xf32>
    %262 = arith.addf %261, %260 : vector<16x128xf32>
    %c2_115 = arith.constant 2 : index
    %c7_116 = arith.constant 7 : index
    %263 = memref.load %arg2[%c2_115, %c7_116] : memref<5x32xf32, #tpu.memory_space<smem>>
    %264 = vector.broadcast %263 : f32 to vector<16x128xf32>
    %265 = arith.mulf %264, %19 : vector<16x128xf32>
    %266 = arith.addf %262, %265 : vector<16x128xf32>
    %c3_117 = arith.constant 3 : index
    %c7_118 = arith.constant 7 : index
    %267 = memref.load %arg2[%c3_117, %c7_118] : memref<5x32xf32, #tpu.memory_space<smem>>
    %268 = vector.broadcast %267 : f32 to vector<16x128xf32>
    %269 = arith.mulf %268, %21 : vector<16x128xf32>
    %270 = arith.addf %266, %269 : vector<16x128xf32>
    %271 = arith.truncf %270 : vector<16x128xf32> to vector<16x128xbf16>
    %272 = math.tanh %271 : vector<16x128xbf16>
    %273 = arith.extf %272 : vector<16x128xbf16> to vector<16x128xf32>
    %c4_119 = arith.constant 4 : index
    %c7_120 = arith.constant 7 : index
    %274 = memref.load %arg2[%c4_119, %c7_120] : memref<5x32xf32, #tpu.memory_space<smem>>
    %275 = vector.broadcast %274 : f32 to vector<16x128xf32>
    %276 = arith.mulf %275, %273 : vector<16x128xf32>
    %277 = arith.addf %256, %276 : vector<16x128xf32>
    %c0_121 = arith.constant 0 : index
    %c8_122 = arith.constant 8 : index
    %278 = memref.load %arg2[%c0_121, %c8_122] : memref<5x32xf32, #tpu.memory_space<smem>>
    %c1_123 = arith.constant 1 : index
    %c8_124 = arith.constant 8 : index
    %279 = memref.load %arg2[%c1_123, %c8_124] : memref<5x32xf32, #tpu.memory_space<smem>>
    %280 = vector.broadcast %279 : f32 to vector<16x128xf32>
    %281 = arith.mulf %280, %51 : vector<16x128xf32>
    %282 = vector.broadcast %278 : f32 to vector<16x128xf32>
    %283 = arith.addf %282, %281 : vector<16x128xf32>
    %c2_125 = arith.constant 2 : index
    %c8_126 = arith.constant 8 : index
    %284 = memref.load %arg2[%c2_125, %c8_126] : memref<5x32xf32, #tpu.memory_space<smem>>
    %285 = vector.broadcast %284 : f32 to vector<16x128xf32>
    %286 = arith.mulf %285, %19 : vector<16x128xf32>
    %287 = arith.addf %283, %286 : vector<16x128xf32>
    %c3_127 = arith.constant 3 : index
    %c8_128 = arith.constant 8 : index
    %288 = memref.load %arg2[%c3_127, %c8_128] : memref<5x32xf32, #tpu.memory_space<smem>>
    %289 = vector.broadcast %288 : f32 to vector<16x128xf32>
    %290 = arith.mulf %289, %21 : vector<16x128xf32>
    %291 = arith.addf %287, %290 : vector<16x128xf32>
    %292 = arith.truncf %291 : vector<16x128xf32> to vector<16x128xbf16>
    %293 = math.tanh %292 : vector<16x128xbf16>
    %294 = arith.extf %293 : vector<16x128xbf16> to vector<16x128xf32>
    %c4_129 = arith.constant 4 : index
    %c8_130 = arith.constant 8 : index
    %295 = memref.load %arg2[%c4_129, %c8_130] : memref<5x32xf32, #tpu.memory_space<smem>>
    %296 = vector.broadcast %295 : f32 to vector<16x128xf32>
    %297 = arith.mulf %296, %294 : vector<16x128xf32>
    %298 = arith.addf %277, %297 : vector<16x128xf32>
    %c0_131 = arith.constant 0 : index
    %c9_132 = arith.constant 9 : index
    %299 = memref.load %arg2[%c0_131, %c9_132] : memref<5x32xf32, #tpu.memory_space<smem>>
    %c1_133 = arith.constant 1 : index
    %c9_134 = arith.constant 9 : index
    %300 = memref.load %arg2[%c1_133, %c9_134] : memref<5x32xf32, #tpu.memory_space<smem>>
    %301 = vector.broadcast %300 : f32 to vector<16x128xf32>
    %302 = arith.mulf %301, %51 : vector<16x128xf32>
    %303 = vector.broadcast %299 : f32 to vector<16x128xf32>
    %304 = arith.addf %303, %302 : vector<16x128xf32>
    %c2_135 = arith.constant 2 : index
    %c9_136 = arith.constant 9 : index
    %305 = memref.load %arg2[%c2_135, %c9_136] : memref<5x32xf32, #tpu.memory_space<smem>>
    %306 = vector.broadcast %305 : f32 to vector<16x128xf32>
    %307 = arith.mulf %306, %19 : vector<16x128xf32>
    %308 = arith.addf %304, %307 : vector<16x128xf32>
    %c3_137 = arith.constant 3 : index
    %c9_138 = arith.constant 9 : index
    %309 = memref.load %arg2[%c3_137, %c9_138] : memref<5x32xf32, #tpu.memory_space<smem>>
    %310 = vector.broadcast %309 : f32 to vector<16x128xf32>
    %311 = arith.mulf %310, %21 : vector<16x128xf32>
    %312 = arith.addf %308, %311 : vector<16x128xf32>
    %313 = arith.truncf %312 : vector<16x128xf32> to vector<16x128xbf16>
    %314 = math.tanh %313 : vector<16x128xbf16>
    %315 = arith.extf %314 : vector<16x128xbf16> to vector<16x128xf32>
    %c4_139 = arith.constant 4 : index
    %c9_140 = arith.constant 9 : index
    %316 = memref.load %arg2[%c4_139, %c9_140] : memref<5x32xf32, #tpu.memory_space<smem>>
    %317 = vector.broadcast %316 : f32 to vector<16x128xf32>
    %318 = arith.mulf %317, %315 : vector<16x128xf32>
    %319 = arith.addf %298, %318 : vector<16x128xf32>
    %c0_141 = arith.constant 0 : index
    %c10_142 = arith.constant 10 : index
    %320 = memref.load %arg2[%c0_141, %c10_142] : memref<5x32xf32, #tpu.memory_space<smem>>
    %c1_143 = arith.constant 1 : index
    %c10_144 = arith.constant 10 : index
    %321 = memref.load %arg2[%c1_143, %c10_144] : memref<5x32xf32, #tpu.memory_space<smem>>
    %322 = vector.broadcast %321 : f32 to vector<16x128xf32>
    %323 = arith.mulf %322, %51 : vector<16x128xf32>
    %324 = vector.broadcast %320 : f32 to vector<16x128xf32>
    %325 = arith.addf %324, %323 : vector<16x128xf32>
    %c2_145 = arith.constant 2 : index
    %c10_146 = arith.constant 10 : index
    %326 = memref.load %arg2[%c2_145, %c10_146] : memref<5x32xf32, #tpu.memory_space<smem>>
    %327 = vector.broadcast %326 : f32 to vector<16x128xf32>
    %328 = arith.mulf %327, %19 : vector<16x128xf32>
    %329 = arith.addf %325, %328 : vector<16x128xf32>
    %c3_147 = arith.constant 3 : index
    %c10_148 = arith.constant 10 : index
    %330 = memref.load %arg2[%c3_147, %c10_148] : memref<5x32xf32, #tpu.memory_space<smem>>
    %331 = vector.broadcast %330 : f32 to vector<16x128xf32>
    %332 = arith.mulf %331, %21 : vector<16x128xf32>
    %333 = arith.addf %329, %332 : vector<16x128xf32>
    %334 = arith.truncf %333 : vector<16x128xf32> to vector<16x128xbf16>
    %335 = math.tanh %334 : vector<16x128xbf16>
    %336 = arith.extf %335 : vector<16x128xbf16> to vector<16x128xf32>
    %c4_149 = arith.constant 4 : index
    %c10_150 = arith.constant 10 : index
    %337 = memref.load %arg2[%c4_149, %c10_150] : memref<5x32xf32, #tpu.memory_space<smem>>
    %338 = vector.broadcast %337 : f32 to vector<16x128xf32>
    %339 = arith.mulf %338, %336 : vector<16x128xf32>
    %340 = arith.addf %319, %339 : vector<16x128xf32>
    %c0_151 = arith.constant 0 : index
    %c11_152 = arith.constant 11 : index
    %341 = memref.load %arg2[%c0_151, %c11_152] : memref<5x32xf32, #tpu.memory_space<smem>>
    %c1_153 = arith.constant 1 : index
    %c11_154 = arith.constant 11 : index
    %342 = memref.load %arg2[%c1_153, %c11_154] : memref<5x32xf32, #tpu.memory_space<smem>>
    %343 = vector.broadcast %342 : f32 to vector<16x128xf32>
    %344 = arith.mulf %343, %51 : vector<16x128xf32>
    %345 = vector.broadcast %341 : f32 to vector<16x128xf32>
    %346 = arith.addf %345, %344 : vector<16x128xf32>
    %c2_155 = arith.constant 2 : index
    %c11_156 = arith.constant 11 : index
    %347 = memref.load %arg2[%c2_155, %c11_156] : memref<5x32xf32, #tpu.memory_space<smem>>
    %348 = vector.broadcast %347 : f32 to vector<16x128xf32>
    %349 = arith.mulf %348, %19 : vector<16x128xf32>
    %350 = arith.addf %346, %349 : vector<16x128xf32>
    %c3_157 = arith.constant 3 : index
    %c11_158 = arith.constant 11 : index
    %351 = memref.load %arg2[%c3_157, %c11_158] : memref<5x32xf32, #tpu.memory_space<smem>>
    %352 = vector.broadcast %351 : f32 to vector<16x128xf32>
    %353 = arith.mulf %352, %21 : vector<16x128xf32>
    %354 = arith.addf %350, %353 : vector<16x128xf32>
    %355 = arith.truncf %354 : vector<16x128xf32> to vector<16x128xbf16>
    %356 = math.tanh %355 : vector<16x128xbf16>
    %357 = arith.extf %356 : vector<16x128xbf16> to vector<16x128xf32>
    %c4_159 = arith.constant 4 : index
    %c11_160 = arith.constant 11 : index
    %358 = memref.load %arg2[%c4_159, %c11_160] : memref<5x32xf32, #tpu.memory_space<smem>>
    %359 = vector.broadcast %358 : f32 to vector<16x128xf32>
    %360 = arith.mulf %359, %357 : vector<16x128xf32>
    %361 = arith.addf %340, %360 : vector<16x128xf32>
    %c0_161 = arith.constant 0 : index
    %c12 = arith.constant 12 : index
    %362 = memref.load %arg2[%c0_161, %c12] : memref<5x32xf32, #tpu.memory_space<smem>>
    %c1_162 = arith.constant 1 : index
    %c12_163 = arith.constant 12 : index
    %363 = memref.load %arg2[%c1_162, %c12_163] : memref<5x32xf32, #tpu.memory_space<smem>>
    %364 = vector.broadcast %363 : f32 to vector<16x128xf32>
    %365 = arith.mulf %364, %51 : vector<16x128xf32>
    %366 = vector.broadcast %362 : f32 to vector<16x128xf32>
    %367 = arith.addf %366, %365 : vector<16x128xf32>
    %c2_164 = arith.constant 2 : index
    %c12_165 = arith.constant 12 : index
    %368 = memref.load %arg2[%c2_164, %c12_165] : memref<5x32xf32, #tpu.memory_space<smem>>
    %369 = vector.broadcast %368 : f32 to vector<16x128xf32>
    %370 = arith.mulf %369, %19 : vector<16x128xf32>
    %371 = arith.addf %367, %370 : vector<16x128xf32>
    %c3_166 = arith.constant 3 : index
    %c12_167 = arith.constant 12 : index
    %372 = memref.load %arg2[%c3_166, %c12_167] : memref<5x32xf32, #tpu.memory_space<smem>>
    %373 = vector.broadcast %372 : f32 to vector<16x128xf32>
    %374 = arith.mulf %373, %21 : vector<16x128xf32>
    %375 = arith.addf %371, %374 : vector<16x128xf32>
    %376 = arith.truncf %375 : vector<16x128xf32> to vector<16x128xbf16>
    %377 = math.tanh %376 : vector<16x128xbf16>
    %378 = arith.extf %377 : vector<16x128xbf16> to vector<16x128xf32>
    %c4_168 = arith.constant 4 : index
    %c12_169 = arith.constant 12 : index
    %379 = memref.load %arg2[%c4_168, %c12_169] : memref<5x32xf32, #tpu.memory_space<smem>>
    %380 = vector.broadcast %379 : f32 to vector<16x128xf32>
    %381 = arith.mulf %380, %378 : vector<16x128xf32>
    %382 = arith.addf %361, %381 : vector<16x128xf32>
    %c0_170 = arith.constant 0 : index
    %c13 = arith.constant 13 : index
    %383 = memref.load %arg2[%c0_170, %c13] : memref<5x32xf32, #tpu.memory_space<smem>>
    %c1_171 = arith.constant 1 : index
    %c13_172 = arith.constant 13 : index
    %384 = memref.load %arg2[%c1_171, %c13_172] : memref<5x32xf32, #tpu.memory_space<smem>>
    %385 = vector.broadcast %384 : f32 to vector<16x128xf32>
    %386 = arith.mulf %385, %51 : vector<16x128xf32>
    %387 = vector.broadcast %383 : f32 to vector<16x128xf32>
    %388 = arith.addf %387, %386 : vector<16x128xf32>
    %c2_173 = arith.constant 2 : index
    %c13_174 = arith.constant 13 : index
    %389 = memref.load %arg2[%c2_173, %c13_174] : memref<5x32xf32, #tpu.memory_space<smem>>
    %390 = vector.broadcast %389 : f32 to vector<16x128xf32>
    %391 = arith.mulf %390, %19 : vector<16x128xf32>
    %392 = arith.addf %388, %391 : vector<16x128xf32>
    %c3_175 = arith.constant 3 : index
    %c13_176 = arith.constant 13 : index
    %393 = memref.load %arg2[%c3_175, %c13_176] : memref<5x32xf32, #tpu.memory_space<smem>>
    %394 = vector.broadcast %393 : f32 to vector<16x128xf32>
    %395 = arith.mulf %394, %21 : vector<16x128xf32>
    %396 = arith.addf %392, %395 : vector<16x128xf32>
    %397 = arith.truncf %396 : vector<16x128xf32> to vector<16x128xbf16>
    %398 = math.tanh %397 : vector<16x128xbf16>
    %399 = arith.extf %398 : vector<16x128xbf16> to vector<16x128xf32>
    %c4_177 = arith.constant 4 : index
    %c13_178 = arith.constant 13 : index
    %400 = memref.load %arg2[%c4_177, %c13_178] : memref<5x32xf32, #tpu.memory_space<smem>>
    %401 = vector.broadcast %400 : f32 to vector<16x128xf32>
    %402 = arith.mulf %401, %399 : vector<16x128xf32>
    %403 = arith.addf %382, %402 : vector<16x128xf32>
    %c0_179 = arith.constant 0 : index
    %c14 = arith.constant 14 : index
    %404 = memref.load %arg2[%c0_179, %c14] : memref<5x32xf32, #tpu.memory_space<smem>>
    %c1_180 = arith.constant 1 : index
    %c14_181 = arith.constant 14 : index
    %405 = memref.load %arg2[%c1_180, %c14_181] : memref<5x32xf32, #tpu.memory_space<smem>>
    %406 = vector.broadcast %405 : f32 to vector<16x128xf32>
    %407 = arith.mulf %406, %51 : vector<16x128xf32>
    %408 = vector.broadcast %404 : f32 to vector<16x128xf32>
    %409 = arith.addf %408, %407 : vector<16x128xf32>
    %c2_182 = arith.constant 2 : index
    %c14_183 = arith.constant 14 : index
    %410 = memref.load %arg2[%c2_182, %c14_183] : memref<5x32xf32, #tpu.memory_space<smem>>
    %411 = vector.broadcast %410 : f32 to vector<16x128xf32>
    %412 = arith.mulf %411, %19 : vector<16x128xf32>
    %413 = arith.addf %409, %412 : vector<16x128xf32>
    %c3_184 = arith.constant 3 : index
    %c14_185 = arith.constant 14 : index
    %414 = memref.load %arg2[%c3_184, %c14_185] : memref<5x32xf32, #tpu.memory_space<smem>>
    %415 = vector.broadcast %414 : f32 to vector<16x128xf32>
    %416 = arith.mulf %415, %21 : vector<16x128xf32>
    %417 = arith.addf %413, %416 : vector<16x128xf32>
    %418 = arith.truncf %417 : vector<16x128xf32> to vector<16x128xbf16>
    %419 = math.tanh %418 : vector<16x128xbf16>
    %420 = arith.extf %419 : vector<16x128xbf16> to vector<16x128xf32>
    %c4_186 = arith.constant 4 : index
    %c14_187 = arith.constant 14 : index
    %421 = memref.load %arg2[%c4_186, %c14_187] : memref<5x32xf32, #tpu.memory_space<smem>>
    %422 = vector.broadcast %421 : f32 to vector<16x128xf32>
    %423 = arith.mulf %422, %420 : vector<16x128xf32>
    %424 = arith.addf %403, %423 : vector<16x128xf32>
    %c0_188 = arith.constant 0 : index
    %c15 = arith.constant 15 : index
    %425 = memref.load %arg2[%c0_188, %c15] : memref<5x32xf32, #tpu.memory_space<smem>>
    %c1_189 = arith.constant 1 : index
    %c15_190 = arith.constant 15 : index
    %426 = memref.load %arg2[%c1_189, %c15_190] : memref<5x32xf32, #tpu.memory_space<smem>>
    %427 = vector.broadcast %426 : f32 to vector<16x128xf32>
    %428 = arith.mulf %427, %51 : vector<16x128xf32>
    %429 = vector.broadcast %425 : f32 to vector<16x128xf32>
    %430 = arith.addf %429, %428 : vector<16x128xf32>
    %c2_191 = arith.constant 2 : index
    %c15_192 = arith.constant 15 : index
    %431 = memref.load %arg2[%c2_191, %c15_192] : memref<5x32xf32, #tpu.memory_space<smem>>
    %432 = vector.broadcast %431 : f32 to vector<16x128xf32>
    %433 = arith.mulf %432, %19 : vector<16x128xf32>
    %434 = arith.addf %430, %433 : vector<16x128xf32>
    %c3_193 = arith.constant 3 : index
    %c15_194 = arith.constant 15 : index
    %435 = memref.load %arg2[%c3_193, %c15_194] : memref<5x32xf32, #tpu.memory_space<smem>>
    %436 = vector.broadcast %435 : f32 to vector<16x128xf32>
    %437 = arith.mulf %436, %21 : vector<16x128xf32>
    %438 = arith.addf %434, %437 : vector<16x128xf32>
    %439 = arith.truncf %438 : vector<16x128xf32> to vector<16x128xbf16>
    %440 = math.tanh %439 : vector<16x128xbf16>
    %441 = arith.extf %440 : vector<16x128xbf16> to vector<16x128xf32>
    %c4_195 = arith.constant 4 : index
    %c15_196 = arith.constant 15 : index
    %442 = memref.load %arg2[%c4_195, %c15_196] : memref<5x32xf32, #tpu.memory_space<smem>>
    %443 = vector.broadcast %442 : f32 to vector<16x128xf32>
    %444 = arith.mulf %443, %441 : vector<16x128xf32>
    %445 = arith.addf %424, %444 : vector<16x128xf32>
    %c0_197 = arith.constant 0 : index
    %c16 = arith.constant 16 : index
    %446 = memref.load %arg2[%c0_197, %c16] : memref<5x32xf32, #tpu.memory_space<smem>>
    %c1_198 = arith.constant 1 : index
    %c16_199 = arith.constant 16 : index
    %447 = memref.load %arg2[%c1_198, %c16_199] : memref<5x32xf32, #tpu.memory_space<smem>>
    %448 = vector.broadcast %447 : f32 to vector<16x128xf32>
    %449 = arith.mulf %448, %51 : vector<16x128xf32>
    %450 = vector.broadcast %446 : f32 to vector<16x128xf32>
    %451 = arith.addf %450, %449 : vector<16x128xf32>
    %c2_200 = arith.constant 2 : index
    %c16_201 = arith.constant 16 : index
    %452 = memref.load %arg2[%c2_200, %c16_201] : memref<5x32xf32, #tpu.memory_space<smem>>
    %453 = vector.broadcast %452 : f32 to vector<16x128xf32>
    %454 = arith.mulf %453, %19 : vector<16x128xf32>
    %455 = arith.addf %451, %454 : vector<16x128xf32>
    %c3_202 = arith.constant 3 : index
    %c16_203 = arith.constant 16 : index
    %456 = memref.load %arg2[%c3_202, %c16_203] : memref<5x32xf32, #tpu.memory_space<smem>>
    %457 = vector.broadcast %456 : f32 to vector<16x128xf32>
    %458 = arith.mulf %457, %21 : vector<16x128xf32>
    %459 = arith.addf %455, %458 : vector<16x128xf32>
    %460 = arith.truncf %459 : vector<16x128xf32> to vector<16x128xbf16>
    %461 = math.tanh %460 : vector<16x128xbf16>
    %462 = arith.extf %461 : vector<16x128xbf16> to vector<16x128xf32>
    %c4_204 = arith.constant 4 : index
    %c16_205 = arith.constant 16 : index
    %463 = memref.load %arg2[%c4_204, %c16_205] : memref<5x32xf32, #tpu.memory_space<smem>>
    %464 = vector.broadcast %463 : f32 to vector<16x128xf32>
    %465 = arith.mulf %464, %462 : vector<16x128xf32>
    %466 = arith.addf %445, %465 : vector<16x128xf32>
    %c0_206 = arith.constant 0 : index
    %c17 = arith.constant 17 : index
    %467 = memref.load %arg2[%c0_206, %c17] : memref<5x32xf32, #tpu.memory_space<smem>>
    %c1_207 = arith.constant 1 : index
    %c17_208 = arith.constant 17 : index
    %468 = memref.load %arg2[%c1_207, %c17_208] : memref<5x32xf32, #tpu.memory_space<smem>>
    %469 = vector.broadcast %468 : f32 to vector<16x128xf32>
    %470 = arith.mulf %469, %51 : vector<16x128xf32>
    %471 = vector.broadcast %467 : f32 to vector<16x128xf32>
    %472 = arith.addf %471, %470 : vector<16x128xf32>
    %c2_209 = arith.constant 2 : index
    %c17_210 = arith.constant 17 : index
    %473 = memref.load %arg2[%c2_209, %c17_210] : memref<5x32xf32, #tpu.memory_space<smem>>
    %474 = vector.broadcast %473 : f32 to vector<16x128xf32>
    %475 = arith.mulf %474, %19 : vector<16x128xf32>
    %476 = arith.addf %472, %475 : vector<16x128xf32>
    %c3_211 = arith.constant 3 : index
    %c17_212 = arith.constant 17 : index
    %477 = memref.load %arg2[%c3_211, %c17_212] : memref<5x32xf32, #tpu.memory_space<smem>>
    %478 = vector.broadcast %477 : f32 to vector<16x128xf32>
    %479 = arith.mulf %478, %21 : vector<16x128xf32>
    %480 = arith.addf %476, %479 : vector<16x128xf32>
    %481 = arith.truncf %480 : vector<16x128xf32> to vector<16x128xbf16>
    %482 = math.tanh %481 : vector<16x128xbf16>
    %483 = arith.extf %482 : vector<16x128xbf16> to vector<16x128xf32>
    %c4_213 = arith.constant 4 : index
    %c17_214 = arith.constant 17 : index
    %484 = memref.load %arg2[%c4_213, %c17_214] : memref<5x32xf32, #tpu.memory_space<smem>>
    %485 = vector.broadcast %484 : f32 to vector<16x128xf32>
    %486 = arith.mulf %485, %483 : vector<16x128xf32>
    %487 = arith.addf %466, %486 : vector<16x128xf32>
    %c0_215 = arith.constant 0 : index
    %c18 = arith.constant 18 : index
    %488 = memref.load %arg2[%c0_215, %c18] : memref<5x32xf32, #tpu.memory_space<smem>>
    %c1_216 = arith.constant 1 : index
    %c18_217 = arith.constant 18 : index
    %489 = memref.load %arg2[%c1_216, %c18_217] : memref<5x32xf32, #tpu.memory_space<smem>>
    %490 = vector.broadcast %489 : f32 to vector<16x128xf32>
    %491 = arith.mulf %490, %51 : vector<16x128xf32>
    %492 = vector.broadcast %488 : f32 to vector<16x128xf32>
    %493 = arith.addf %492, %491 : vector<16x128xf32>
    %c2_218 = arith.constant 2 : index
    %c18_219 = arith.constant 18 : index
    %494 = memref.load %arg2[%c2_218, %c18_219] : memref<5x32xf32, #tpu.memory_space<smem>>
    %495 = vector.broadcast %494 : f32 to vector<16x128xf32>
    %496 = arith.mulf %495, %19 : vector<16x128xf32>
    %497 = arith.addf %493, %496 : vector<16x128xf32>
    %c3_220 = arith.constant 3 : index
    %c18_221 = arith.constant 18 : index
    %498 = memref.load %arg2[%c3_220, %c18_221] : memref<5x32xf32, #tpu.memory_space<smem>>
    %499 = vector.broadcast %498 : f32 to vector<16x128xf32>
    %500 = arith.mulf %499, %21 : vector<16x128xf32>
    %501 = arith.addf %497, %500 : vector<16x128xf32>
    %502 = arith.truncf %501 : vector<16x128xf32> to vector<16x128xbf16>
    %503 = math.tanh %502 : vector<16x128xbf16>
    %504 = arith.extf %503 : vector<16x128xbf16> to vector<16x128xf32>
    %c4_222 = arith.constant 4 : index
    %c18_223 = arith.constant 18 : index
    %505 = memref.load %arg2[%c4_222, %c18_223] : memref<5x32xf32, #tpu.memory_space<smem>>
    %506 = vector.broadcast %505 : f32 to vector<16x128xf32>
    %507 = arith.mulf %506, %504 : vector<16x128xf32>
    %508 = arith.addf %487, %507 : vector<16x128xf32>
    %c0_224 = arith.constant 0 : index
    %c19 = arith.constant 19 : index
    %509 = memref.load %arg2[%c0_224, %c19] : memref<5x32xf32, #tpu.memory_space<smem>>
    %c1_225 = arith.constant 1 : index
    %c19_226 = arith.constant 19 : index
    %510 = memref.load %arg2[%c1_225, %c19_226] : memref<5x32xf32, #tpu.memory_space<smem>>
    %511 = vector.broadcast %510 : f32 to vector<16x128xf32>
    %512 = arith.mulf %511, %51 : vector<16x128xf32>
    %513 = vector.broadcast %509 : f32 to vector<16x128xf32>
    %514 = arith.addf %513, %512 : vector<16x128xf32>
    %c2_227 = arith.constant 2 : index
    %c19_228 = arith.constant 19 : index
    %515 = memref.load %arg2[%c2_227, %c19_228] : memref<5x32xf32, #tpu.memory_space<smem>>
    %516 = vector.broadcast %515 : f32 to vector<16x128xf32>
    %517 = arith.mulf %516, %19 : vector<16x128xf32>
    %518 = arith.addf %514, %517 : vector<16x128xf32>
    %c3_229 = arith.constant 3 : index
    %c19_230 = arith.constant 19 : index
    %519 = memref.load %arg2[%c3_229, %c19_230] : memref<5x32xf32, #tpu.memory_space<smem>>
    %520 = vector.broadcast %519 : f32 to vector<16x128xf32>
    %521 = arith.mulf %520, %21 : vector<16x128xf32>
    %522 = arith.addf %518, %521 : vector<16x128xf32>
    %523 = arith.truncf %522 : vector<16x128xf32> to vector<16x128xbf16>
    %524 = math.tanh %523 : vector<16x128xbf16>
    %525 = arith.extf %524 : vector<16x128xbf16> to vector<16x128xf32>
    %c4_231 = arith.constant 4 : index
    %c19_232 = arith.constant 19 : index
    %526 = memref.load %arg2[%c4_231, %c19_232] : memref<5x32xf32, #tpu.memory_space<smem>>
    %527 = vector.broadcast %526 : f32 to vector<16x128xf32>
    %528 = arith.mulf %527, %525 : vector<16x128xf32>
    %529 = arith.addf %508, %528 : vector<16x128xf32>
    %c0_233 = arith.constant 0 : index
    %c20 = arith.constant 20 : index
    %530 = memref.load %arg2[%c0_233, %c20] : memref<5x32xf32, #tpu.memory_space<smem>>
    %c1_234 = arith.constant 1 : index
    %c20_235 = arith.constant 20 : index
    %531 = memref.load %arg2[%c1_234, %c20_235] : memref<5x32xf32, #tpu.memory_space<smem>>
    %532 = vector.broadcast %531 : f32 to vector<16x128xf32>
    %533 = arith.mulf %532, %51 : vector<16x128xf32>
    %534 = vector.broadcast %530 : f32 to vector<16x128xf32>
    %535 = arith.addf %534, %533 : vector<16x128xf32>
    %c2_236 = arith.constant 2 : index
    %c20_237 = arith.constant 20 : index
    %536 = memref.load %arg2[%c2_236, %c20_237] : memref<5x32xf32, #tpu.memory_space<smem>>
    %537 = vector.broadcast %536 : f32 to vector<16x128xf32>
    %538 = arith.mulf %537, %19 : vector<16x128xf32>
    %539 = arith.addf %535, %538 : vector<16x128xf32>
    %c3_238 = arith.constant 3 : index
    %c20_239 = arith.constant 20 : index
    %540 = memref.load %arg2[%c3_238, %c20_239] : memref<5x32xf32, #tpu.memory_space<smem>>
    %541 = vector.broadcast %540 : f32 to vector<16x128xf32>
    %542 = arith.mulf %541, %21 : vector<16x128xf32>
    %543 = arith.addf %539, %542 : vector<16x128xf32>
    %544 = arith.truncf %543 : vector<16x128xf32> to vector<16x128xbf16>
    %545 = math.tanh %544 : vector<16x128xbf16>
    %546 = arith.extf %545 : vector<16x128xbf16> to vector<16x128xf32>
    %c4_240 = arith.constant 4 : index
    %c20_241 = arith.constant 20 : index
    %547 = memref.load %arg2[%c4_240, %c20_241] : memref<5x32xf32, #tpu.memory_space<smem>>
    %548 = vector.broadcast %547 : f32 to vector<16x128xf32>
    %549 = arith.mulf %548, %546 : vector<16x128xf32>
    %550 = arith.addf %529, %549 : vector<16x128xf32>
    %c0_242 = arith.constant 0 : index
    %c21 = arith.constant 21 : index
    %551 = memref.load %arg2[%c0_242, %c21] : memref<5x32xf32, #tpu.memory_space<smem>>
    %c1_243 = arith.constant 1 : index
    %c21_244 = arith.constant 21 : index
    %552 = memref.load %arg2[%c1_243, %c21_244] : memref<5x32xf32, #tpu.memory_space<smem>>
    %553 = vector.broadcast %552 : f32 to vector<16x128xf32>
    %554 = arith.mulf %553, %51 : vector<16x128xf32>
    %555 = vector.broadcast %551 : f32 to vector<16x128xf32>
    %556 = arith.addf %555, %554 : vector<16x128xf32>
    %c2_245 = arith.constant 2 : index
    %c21_246 = arith.constant 21 : index
    %557 = memref.load %arg2[%c2_245, %c21_246] : memref<5x32xf32, #tpu.memory_space<smem>>
    %558 = vector.broadcast %557 : f32 to vector<16x128xf32>
    %559 = arith.mulf %558, %19 : vector<16x128xf32>
    %560 = arith.addf %556, %559 : vector<16x128xf32>
    %c3_247 = arith.constant 3 : index
    %c21_248 = arith.constant 21 : index
    %561 = memref.load %arg2[%c3_247, %c21_248] : memref<5x32xf32, #tpu.memory_space<smem>>
    %562 = vector.broadcast %561 : f32 to vector<16x128xf32>
    %563 = arith.mulf %562, %21 : vector<16x128xf32>
    %564 = arith.addf %560, %563 : vector<16x128xf32>
    %565 = arith.truncf %564 : vector<16x128xf32> to vector<16x128xbf16>
    %566 = math.tanh %565 : vector<16x128xbf16>
    %567 = arith.extf %566 : vector<16x128xbf16> to vector<16x128xf32>
    %c4_249 = arith.constant 4 : index
    %c21_250 = arith.constant 21 : index
    %568 = memref.load %arg2[%c4_249, %c21_250] : memref<5x32xf32, #tpu.memory_space<smem>>
    %569 = vector.broadcast %568 : f32 to vector<16x128xf32>
    %570 = arith.mulf %569, %567 : vector<16x128xf32>
    %571 = arith.addf %550, %570 : vector<16x128xf32>
    %c0_251 = arith.constant 0 : index
    %c22 = arith.constant 22 : index
    %572 = memref.load %arg2[%c0_251, %c22] : memref<5x32xf32, #tpu.memory_space<smem>>
    %c1_252 = arith.constant 1 : index
    %c22_253 = arith.constant 22 : index
    %573 = memref.load %arg2[%c1_252, %c22_253] : memref<5x32xf32, #tpu.memory_space<smem>>
    %574 = vector.broadcast %573 : f32 to vector<16x128xf32>
    %575 = arith.mulf %574, %51 : vector<16x128xf32>
    %576 = vector.broadcast %572 : f32 to vector<16x128xf32>
    %577 = arith.addf %576, %575 : vector<16x128xf32>
    %c2_254 = arith.constant 2 : index
    %c22_255 = arith.constant 22 : index
    %578 = memref.load %arg2[%c2_254, %c22_255] : memref<5x32xf32, #tpu.memory_space<smem>>
    %579 = vector.broadcast %578 : f32 to vector<16x128xf32>
    %580 = arith.mulf %579, %19 : vector<16x128xf32>
    %581 = arith.addf %577, %580 : vector<16x128xf32>
    %c3_256 = arith.constant 3 : index
    %c22_257 = arith.constant 22 : index
    %582 = memref.load %arg2[%c3_256, %c22_257] : memref<5x32xf32, #tpu.memory_space<smem>>
    %583 = vector.broadcast %582 : f32 to vector<16x128xf32>
    %584 = arith.mulf %583, %21 : vector<16x128xf32>
    %585 = arith.addf %581, %584 : vector<16x128xf32>
    %586 = arith.truncf %585 : vector<16x128xf32> to vector<16x128xbf16>
    %587 = math.tanh %586 : vector<16x128xbf16>
    %588 = arith.extf %587 : vector<16x128xbf16> to vector<16x128xf32>
    %c4_258 = arith.constant 4 : index
    %c22_259 = arith.constant 22 : index
    %589 = memref.load %arg2[%c4_258, %c22_259] : memref<5x32xf32, #tpu.memory_space<smem>>
    %590 = vector.broadcast %589 : f32 to vector<16x128xf32>
    %591 = arith.mulf %590, %588 : vector<16x128xf32>
    %592 = arith.addf %571, %591 : vector<16x128xf32>
    %c0_260 = arith.constant 0 : index
    %c23 = arith.constant 23 : index
    %593 = memref.load %arg2[%c0_260, %c23] : memref<5x32xf32, #tpu.memory_space<smem>>
    %c1_261 = arith.constant 1 : index
    %c23_262 = arith.constant 23 : index
    %594 = memref.load %arg2[%c1_261, %c23_262] : memref<5x32xf32, #tpu.memory_space<smem>>
    %595 = vector.broadcast %594 : f32 to vector<16x128xf32>
    %596 = arith.mulf %595, %51 : vector<16x128xf32>
    %597 = vector.broadcast %593 : f32 to vector<16x128xf32>
    %598 = arith.addf %597, %596 : vector<16x128xf32>
    %c2_263 = arith.constant 2 : index
    %c23_264 = arith.constant 23 : index
    %599 = memref.load %arg2[%c2_263, %c23_264] : memref<5x32xf32, #tpu.memory_space<smem>>
    %600 = vector.broadcast %599 : f32 to vector<16x128xf32>
    %601 = arith.mulf %600, %19 : vector<16x128xf32>
    %602 = arith.addf %598, %601 : vector<16x128xf32>
    %c3_265 = arith.constant 3 : index
    %c23_266 = arith.constant 23 : index
    %603 = memref.load %arg2[%c3_265, %c23_266] : memref<5x32xf32, #tpu.memory_space<smem>>
    %604 = vector.broadcast %603 : f32 to vector<16x128xf32>
    %605 = arith.mulf %604, %21 : vector<16x128xf32>
    %606 = arith.addf %602, %605 : vector<16x128xf32>
    %607 = arith.truncf %606 : vector<16x128xf32> to vector<16x128xbf16>
    %608 = math.tanh %607 : vector<16x128xbf16>
    %609 = arith.extf %608 : vector<16x128xbf16> to vector<16x128xf32>
    %c4_267 = arith.constant 4 : index
    %c23_268 = arith.constant 23 : index
    %610 = memref.load %arg2[%c4_267, %c23_268] : memref<5x32xf32, #tpu.memory_space<smem>>
    %611 = vector.broadcast %610 : f32 to vector<16x128xf32>
    %612 = arith.mulf %611, %609 : vector<16x128xf32>
    %613 = arith.addf %592, %612 : vector<16x128xf32>
    %c0_269 = arith.constant 0 : index
    %c24 = arith.constant 24 : index
    %614 = memref.load %arg2[%c0_269, %c24] : memref<5x32xf32, #tpu.memory_space<smem>>
    %c1_270 = arith.constant 1 : index
    %c24_271 = arith.constant 24 : index
    %615 = memref.load %arg2[%c1_270, %c24_271] : memref<5x32xf32, #tpu.memory_space<smem>>
    %616 = vector.broadcast %615 : f32 to vector<16x128xf32>
    %617 = arith.mulf %616, %51 : vector<16x128xf32>
    %618 = vector.broadcast %614 : f32 to vector<16x128xf32>
    %619 = arith.addf %618, %617 : vector<16x128xf32>
    %c2_272 = arith.constant 2 : index
    %c24_273 = arith.constant 24 : index
    %620 = memref.load %arg2[%c2_272, %c24_273] : memref<5x32xf32, #tpu.memory_space<smem>>
    %621 = vector.broadcast %620 : f32 to vector<16x128xf32>
    %622 = arith.mulf %621, %19 : vector<16x128xf32>
    %623 = arith.addf %619, %622 : vector<16x128xf32>
    %c3_274 = arith.constant 3 : index
    %c24_275 = arith.constant 24 : index
    %624 = memref.load %arg2[%c3_274, %c24_275] : memref<5x32xf32, #tpu.memory_space<smem>>
    %625 = vector.broadcast %624 : f32 to vector<16x128xf32>
    %626 = arith.mulf %625, %21 : vector<16x128xf32>
    %627 = arith.addf %623, %626 : vector<16x128xf32>
    %628 = arith.truncf %627 : vector<16x128xf32> to vector<16x128xbf16>
    %629 = math.tanh %628 : vector<16x128xbf16>
    %630 = arith.extf %629 : vector<16x128xbf16> to vector<16x128xf32>
    %c4_276 = arith.constant 4 : index
    %c24_277 = arith.constant 24 : index
    %631 = memref.load %arg2[%c4_276, %c24_277] : memref<5x32xf32, #tpu.memory_space<smem>>
    %632 = vector.broadcast %631 : f32 to vector<16x128xf32>
    %633 = arith.mulf %632, %630 : vector<16x128xf32>
    %634 = arith.addf %613, %633 : vector<16x128xf32>
    %c0_278 = arith.constant 0 : index
    %c25 = arith.constant 25 : index
    %635 = memref.load %arg2[%c0_278, %c25] : memref<5x32xf32, #tpu.memory_space<smem>>
    %c1_279 = arith.constant 1 : index
    %c25_280 = arith.constant 25 : index
    %636 = memref.load %arg2[%c1_279, %c25_280] : memref<5x32xf32, #tpu.memory_space<smem>>
    %637 = vector.broadcast %636 : f32 to vector<16x128xf32>
    %638 = arith.mulf %637, %51 : vector<16x128xf32>
    %639 = vector.broadcast %635 : f32 to vector<16x128xf32>
    %640 = arith.addf %639, %638 : vector<16x128xf32>
    %c2_281 = arith.constant 2 : index
    %c25_282 = arith.constant 25 : index
    %641 = memref.load %arg2[%c2_281, %c25_282] : memref<5x32xf32, #tpu.memory_space<smem>>
    %642 = vector.broadcast %641 : f32 to vector<16x128xf32>
    %643 = arith.mulf %642, %19 : vector<16x128xf32>
    %644 = arith.addf %640, %643 : vector<16x128xf32>
    %c3_283 = arith.constant 3 : index
    %c25_284 = arith.constant 25 : index
    %645 = memref.load %arg2[%c3_283, %c25_284] : memref<5x32xf32, #tpu.memory_space<smem>>
    %646 = vector.broadcast %645 : f32 to vector<16x128xf32>
    %647 = arith.mulf %646, %21 : vector<16x128xf32>
    %648 = arith.addf %644, %647 : vector<16x128xf32>
    %649 = arith.truncf %648 : vector<16x128xf32> to vector<16x128xbf16>
    %650 = math.tanh %649 : vector<16x128xbf16>
    %651 = arith.extf %650 : vector<16x128xbf16> to vector<16x128xf32>
    %c4_285 = arith.constant 4 : index
    %c25_286 = arith.constant 25 : index
    %652 = memref.load %arg2[%c4_285, %c25_286] : memref<5x32xf32, #tpu.memory_space<smem>>
    %653 = vector.broadcast %652 : f32 to vector<16x128xf32>
    %654 = arith.mulf %653, %651 : vector<16x128xf32>
    %655 = arith.addf %634, %654 : vector<16x128xf32>
    %c0_287 = arith.constant 0 : index
    %c26 = arith.constant 26 : index
    %656 = memref.load %arg2[%c0_287, %c26] : memref<5x32xf32, #tpu.memory_space<smem>>
    %c1_288 = arith.constant 1 : index
    %c26_289 = arith.constant 26 : index
    %657 = memref.load %arg2[%c1_288, %c26_289] : memref<5x32xf32, #tpu.memory_space<smem>>
    %658 = vector.broadcast %657 : f32 to vector<16x128xf32>
    %659 = arith.mulf %658, %51 : vector<16x128xf32>
    %660 = vector.broadcast %656 : f32 to vector<16x128xf32>
    %661 = arith.addf %660, %659 : vector<16x128xf32>
    %c2_290 = arith.constant 2 : index
    %c26_291 = arith.constant 26 : index
    %662 = memref.load %arg2[%c2_290, %c26_291] : memref<5x32xf32, #tpu.memory_space<smem>>
    %663 = vector.broadcast %662 : f32 to vector<16x128xf32>
    %664 = arith.mulf %663, %19 : vector<16x128xf32>
    %665 = arith.addf %661, %664 : vector<16x128xf32>
    %c3_292 = arith.constant 3 : index
    %c26_293 = arith.constant 26 : index
    %666 = memref.load %arg2[%c3_292, %c26_293] : memref<5x32xf32, #tpu.memory_space<smem>>
    %667 = vector.broadcast %666 : f32 to vector<16x128xf32>
    %668 = arith.mulf %667, %21 : vector<16x128xf32>
    %669 = arith.addf %665, %668 : vector<16x128xf32>
    %670 = arith.truncf %669 : vector<16x128xf32> to vector<16x128xbf16>
    %671 = math.tanh %670 : vector<16x128xbf16>
    %672 = arith.extf %671 : vector<16x128xbf16> to vector<16x128xf32>
    %c4_294 = arith.constant 4 : index
    %c26_295 = arith.constant 26 : index
    %673 = memref.load %arg2[%c4_294, %c26_295] : memref<5x32xf32, #tpu.memory_space<smem>>
    %674 = vector.broadcast %673 : f32 to vector<16x128xf32>
    %675 = arith.mulf %674, %672 : vector<16x128xf32>
    %676 = arith.addf %655, %675 : vector<16x128xf32>
    %c0_296 = arith.constant 0 : index
    %c27 = arith.constant 27 : index
    %677 = memref.load %arg2[%c0_296, %c27] : memref<5x32xf32, #tpu.memory_space<smem>>
    %c1_297 = arith.constant 1 : index
    %c27_298 = arith.constant 27 : index
    %678 = memref.load %arg2[%c1_297, %c27_298] : memref<5x32xf32, #tpu.memory_space<smem>>
    %679 = vector.broadcast %678 : f32 to vector<16x128xf32>
    %680 = arith.mulf %679, %51 : vector<16x128xf32>
    %681 = vector.broadcast %677 : f32 to vector<16x128xf32>
    %682 = arith.addf %681, %680 : vector<16x128xf32>
    %c2_299 = arith.constant 2 : index
    %c27_300 = arith.constant 27 : index
    %683 = memref.load %arg2[%c2_299, %c27_300] : memref<5x32xf32, #tpu.memory_space<smem>>
    %684 = vector.broadcast %683 : f32 to vector<16x128xf32>
    %685 = arith.mulf %684, %19 : vector<16x128xf32>
    %686 = arith.addf %682, %685 : vector<16x128xf32>
    %c3_301 = arith.constant 3 : index
    %c27_302 = arith.constant 27 : index
    %687 = memref.load %arg2[%c3_301, %c27_302] : memref<5x32xf32, #tpu.memory_space<smem>>
    %688 = vector.broadcast %687 : f32 to vector<16x128xf32>
    %689 = arith.mulf %688, %21 : vector<16x128xf32>
    %690 = arith.addf %686, %689 : vector<16x128xf32>
    %691 = arith.truncf %690 : vector<16x128xf32> to vector<16x128xbf16>
    %692 = math.tanh %691 : vector<16x128xbf16>
    %693 = arith.extf %692 : vector<16x128xbf16> to vector<16x128xf32>
    %c4_303 = arith.constant 4 : index
    %c27_304 = arith.constant 27 : index
    %694 = memref.load %arg2[%c4_303, %c27_304] : memref<5x32xf32, #tpu.memory_space<smem>>
    %695 = vector.broadcast %694 : f32 to vector<16x128xf32>
    %696 = arith.mulf %695, %693 : vector<16x128xf32>
    %697 = arith.addf %676, %696 : vector<16x128xf32>
    %c0_305 = arith.constant 0 : index
    %c28 = arith.constant 28 : index
    %698 = memref.load %arg2[%c0_305, %c28] : memref<5x32xf32, #tpu.memory_space<smem>>
    %c1_306 = arith.constant 1 : index
    %c28_307 = arith.constant 28 : index
    %699 = memref.load %arg2[%c1_306, %c28_307] : memref<5x32xf32, #tpu.memory_space<smem>>
    %700 = vector.broadcast %699 : f32 to vector<16x128xf32>
    %701 = arith.mulf %700, %51 : vector<16x128xf32>
    %702 = vector.broadcast %698 : f32 to vector<16x128xf32>
    %703 = arith.addf %702, %701 : vector<16x128xf32>
    %c2_308 = arith.constant 2 : index
    %c28_309 = arith.constant 28 : index
    %704 = memref.load %arg2[%c2_308, %c28_309] : memref<5x32xf32, #tpu.memory_space<smem>>
    %705 = vector.broadcast %704 : f32 to vector<16x128xf32>
    %706 = arith.mulf %705, %19 : vector<16x128xf32>
    %707 = arith.addf %703, %706 : vector<16x128xf32>
    %c3_310 = arith.constant 3 : index
    %c28_311 = arith.constant 28 : index
    %708 = memref.load %arg2[%c3_310, %c28_311] : memref<5x32xf32, #tpu.memory_space<smem>>
    %709 = vector.broadcast %708 : f32 to vector<16x128xf32>
    %710 = arith.mulf %709, %21 : vector<16x128xf32>
    %711 = arith.addf %707, %710 : vector<16x128xf32>
    %712 = arith.truncf %711 : vector<16x128xf32> to vector<16x128xbf16>
    %713 = math.tanh %712 : vector<16x128xbf16>
    %714 = arith.extf %713 : vector<16x128xbf16> to vector<16x128xf32>
    %c4_312 = arith.constant 4 : index
    %c28_313 = arith.constant 28 : index
    %715 = memref.load %arg2[%c4_312, %c28_313] : memref<5x32xf32, #tpu.memory_space<smem>>
    %716 = vector.broadcast %715 : f32 to vector<16x128xf32>
    %717 = arith.mulf %716, %714 : vector<16x128xf32>
    %718 = arith.addf %697, %717 : vector<16x128xf32>
    %c0_314 = arith.constant 0 : index
    %c29 = arith.constant 29 : index
    %719 = memref.load %arg2[%c0_314, %c29] : memref<5x32xf32, #tpu.memory_space<smem>>
    %c1_315 = arith.constant 1 : index
    %c29_316 = arith.constant 29 : index
    %720 = memref.load %arg2[%c1_315, %c29_316] : memref<5x32xf32, #tpu.memory_space<smem>>
    %721 = vector.broadcast %720 : f32 to vector<16x128xf32>
    %722 = arith.mulf %721, %51 : vector<16x128xf32>
    %723 = vector.broadcast %719 : f32 to vector<16x128xf32>
    %724 = arith.addf %723, %722 : vector<16x128xf32>
    %c2_317 = arith.constant 2 : index
    %c29_318 = arith.constant 29 : index
    %725 = memref.load %arg2[%c2_317, %c29_318] : memref<5x32xf32, #tpu.memory_space<smem>>
    %726 = vector.broadcast %725 : f32 to vector<16x128xf32>
    %727 = arith.mulf %726, %19 : vector<16x128xf32>
    %728 = arith.addf %724, %727 : vector<16x128xf32>
    %c3_319 = arith.constant 3 : index
    %c29_320 = arith.constant 29 : index
    %729 = memref.load %arg2[%c3_319, %c29_320] : memref<5x32xf32, #tpu.memory_space<smem>>
    %730 = vector.broadcast %729 : f32 to vector<16x128xf32>
    %731 = arith.mulf %730, %21 : vector<16x128xf32>
    %732 = arith.addf %728, %731 : vector<16x128xf32>
    %733 = arith.truncf %732 : vector<16x128xf32> to vector<16x128xbf16>
    %734 = math.tanh %733 : vector<16x128xbf16>
    %735 = arith.extf %734 : vector<16x128xbf16> to vector<16x128xf32>
    %c4_321 = arith.constant 4 : index
    %c29_322 = arith.constant 29 : index
    %736 = memref.load %arg2[%c4_321, %c29_322] : memref<5x32xf32, #tpu.memory_space<smem>>
    %737 = vector.broadcast %736 : f32 to vector<16x128xf32>
    %738 = arith.mulf %737, %735 : vector<16x128xf32>
    %739 = arith.addf %718, %738 : vector<16x128xf32>
    %c0_323 = arith.constant 0 : index
    %c30 = arith.constant 30 : index
    %740 = memref.load %arg2[%c0_323, %c30] : memref<5x32xf32, #tpu.memory_space<smem>>
    %c1_324 = arith.constant 1 : index
    %c30_325 = arith.constant 30 : index
    %741 = memref.load %arg2[%c1_324, %c30_325] : memref<5x32xf32, #tpu.memory_space<smem>>
    %742 = vector.broadcast %741 : f32 to vector<16x128xf32>
    %743 = arith.mulf %742, %51 : vector<16x128xf32>
    %744 = vector.broadcast %740 : f32 to vector<16x128xf32>
    %745 = arith.addf %744, %743 : vector<16x128xf32>
    %c2_326 = arith.constant 2 : index
    %c30_327 = arith.constant 30 : index
    %746 = memref.load %arg2[%c2_326, %c30_327] : memref<5x32xf32, #tpu.memory_space<smem>>
    %747 = vector.broadcast %746 : f32 to vector<16x128xf32>
    %748 = arith.mulf %747, %19 : vector<16x128xf32>
    %749 = arith.addf %745, %748 : vector<16x128xf32>
    %c3_328 = arith.constant 3 : index
    %c30_329 = arith.constant 30 : index
    %750 = memref.load %arg2[%c3_328, %c30_329] : memref<5x32xf32, #tpu.memory_space<smem>>
    %751 = vector.broadcast %750 : f32 to vector<16x128xf32>
    %752 = arith.mulf %751, %21 : vector<16x128xf32>
    %753 = arith.addf %749, %752 : vector<16x128xf32>
    %754 = arith.truncf %753 : vector<16x128xf32> to vector<16x128xbf16>
    %755 = math.tanh %754 : vector<16x128xbf16>
    %756 = arith.extf %755 : vector<16x128xbf16> to vector<16x128xf32>
    %c4_330 = arith.constant 4 : index
    %c30_331 = arith.constant 30 : index
    %757 = memref.load %arg2[%c4_330, %c30_331] : memref<5x32xf32, #tpu.memory_space<smem>>
    %758 = vector.broadcast %757 : f32 to vector<16x128xf32>
    %759 = arith.mulf %758, %756 : vector<16x128xf32>
    %760 = arith.addf %739, %759 : vector<16x128xf32>
    %c0_332 = arith.constant 0 : index
    %c31 = arith.constant 31 : index
    %761 = memref.load %arg2[%c0_332, %c31] : memref<5x32xf32, #tpu.memory_space<smem>>
    %c1_333 = arith.constant 1 : index
    %c31_334 = arith.constant 31 : index
    %762 = memref.load %arg2[%c1_333, %c31_334] : memref<5x32xf32, #tpu.memory_space<smem>>
    %763 = vector.broadcast %762 : f32 to vector<16x128xf32>
    %764 = arith.mulf %763, %51 : vector<16x128xf32>
    %765 = vector.broadcast %761 : f32 to vector<16x128xf32>
    %766 = arith.addf %765, %764 : vector<16x128xf32>
    %c2_335 = arith.constant 2 : index
    %c31_336 = arith.constant 31 : index
    %767 = memref.load %arg2[%c2_335, %c31_336] : memref<5x32xf32, #tpu.memory_space<smem>>
    %768 = vector.broadcast %767 : f32 to vector<16x128xf32>
    %769 = arith.mulf %768, %19 : vector<16x128xf32>
    %770 = arith.addf %766, %769 : vector<16x128xf32>
    %c3_337 = arith.constant 3 : index
    %c31_338 = arith.constant 31 : index
    %771 = memref.load %arg2[%c3_337, %c31_338] : memref<5x32xf32, #tpu.memory_space<smem>>
    %772 = vector.broadcast %771 : f32 to vector<16x128xf32>
    %773 = arith.mulf %772, %21 : vector<16x128xf32>
    %774 = arith.addf %770, %773 : vector<16x128xf32>
    %775 = arith.truncf %774 : vector<16x128xf32> to vector<16x128xbf16>
    %776 = math.tanh %775 : vector<16x128xbf16>
    %777 = arith.extf %776 : vector<16x128xbf16> to vector<16x128xf32>
    %c4_339 = arith.constant 4 : index
    %c31_340 = arith.constant 31 : index
    %778 = memref.load %arg2[%c4_339, %c31_340] : memref<5x32xf32, #tpu.memory_space<smem>>
    %779 = vector.broadcast %778 : f32 to vector<16x128xf32>
    %780 = arith.mulf %779, %777 : vector<16x128xf32>
    %781 = arith.addf %760, %780 : vector<16x128xf32>
    %782 = math.absf %781 : vector<16x128xf32>
    %cst_341 = arith.constant 0.000000e+00 : f32
    %783 = vector.broadcast %cst_341 : f32 to vector<16x128xf32>
    %784 = arith.subf %783, %782 : vector<16x128xf32>
    %785 = math.exp %784 : vector<16x128xf32>
    %786 = math.log1p %785 : vector<16x128xf32>
    %cst_342 = arith.constant 0.000000e+00 : f32
    %787 = vector.broadcast %cst_342 : f32 to vector<16x128xf32>
    %788 = arith.minimumf %781, %787 : vector<16x128xf32>
    %789 = arith.subf %788, %786 : vector<16x128xf32>
    %cst_343 = arith.constant 0.000000e+00 : f32
    %790 = vector.broadcast %cst_343 : f32 to vector<16x128xf32>
    %791 = arith.maximumf %781, %790 : vector<16x128xf32>
    %cst_344 = arith.constant 0.000000e+00 : f32
    %792 = vector.broadcast %cst_344 : f32 to vector<16x128xf32>
    %793 = arith.subf %792, %791 : vector<16x128xf32>
    %794 = arith.subf %793, %786 : vector<16x128xf32>
    %795 = arith.addf %15, %794 : vector<16x128xf32>
    %796 = arith.maximumf %73, %795 : vector<16x128xf32>
    %797 = arith.subf %73, %795 : vector<16x128xf32>
    %798 = math.absf %797 : vector<16x128xf32>
    %cst_345 = arith.constant 0.000000e+00 : f32
    %799 = vector.broadcast %cst_345 : f32 to vector<16x128xf32>
    %800 = arith.subf %799, %798 : vector<16x128xf32>
    %801 = math.exp %800 : vector<16x128xf32>
    %802 = math.log1p %801 : vector<16x128xf32>
    %803 = arith.addf %796, %802 : vector<16x128xf32>
    %804 = arith.addf %15, %789 : vector<16x128xf32>
    %805 = arith.maximumf %804, %75 : vector<16x128xf32>
    %806 = arith.subf %804, %75 : vector<16x128xf32>
    %807 = math.absf %806 : vector<16x128xf32>
    %cst_346 = arith.constant 0.000000e+00 : f32
    %808 = vector.broadcast %cst_346 : f32 to vector<16x128xf32>
    %809 = arith.subf %808, %807 : vector<16x128xf32>
    %810 = math.exp %809 : vector<16x128xf32>
    %811 = math.log1p %810 : vector<16x128xf32>
    %812 = arith.addf %805, %811 : vector<16x128xf32>
    %813 = arith.addf %60, %803 : vector<16x128xf32>
    %814 = arith.addf %71, %812 : vector<16x128xf32>
    %815 = arith.maximumf %813, %814 : vector<16x128xf32>
    %816 = arith.subf %813, %814 : vector<16x128xf32>
    %817 = math.absf %816 : vector<16x128xf32>
    %cst_347 = arith.constant 0.000000e+00 : f32
    %818 = vector.broadcast %cst_347 : f32 to vector<16x128xf32>
    %819 = arith.subf %818, %817 : vector<16x128xf32>
    %820 = math.exp %819 : vector<16x128xf32>
    %821 = math.log1p %820 : vector<16x128xf32>
    %822 = arith.addf %815, %821 : vector<16x128xf32>
    %823 = arith.subf %813, %822 : vector<16x128xf32>
    %824 = arith.subf %814, %822 : vector<16x128xf32>
    %825 = math.exp %105 : vector<16x128xf32>
    %cst_348 = arith.constant 1.000000e+00 : f32
    %826 = vector.broadcast %cst_348 : f32 to vector<16x128xf32>
    %827 = arith.subf %826, %825 : vector<16x128xf32>
    %828 = arith.subf %104, %823 : vector<16x128xf32>
    %829 = arith.mulf %827, %828 : vector<16x128xf32>
    %830 = arith.subf %105, %824 : vector<16x128xf32>
    %831 = arith.mulf %825, %830 : vector<16x128xf32>
    %832 = arith.addf %829, %831 : vector<16x128xf32>
    %833 = arith.select %3, %824, %823 : vector<16x128xi1>, vector<16x128xf32>
    %cst_349 = arith.constant 0.000000e+00 : f32
    %834 = vector.broadcast %cst_349 : f32 to vector<16x128xf32>
    %835 = arith.subf %834, %833 : vector<16x128xf32>
    %836 = arith.mulf %23, %832 : vector<16x128xf32>
    %837 = arith.mulf %25, %835 : vector<16x128xf32>
    %838 = arith.addf %836, %837 : vector<16x128xf32>
    %cst_350 = arith.constant dense<0.000000e+00> : vector<128xf32>
    %839 = vector.multi_reduction <add>, %838, %cst_350 [0] : vector<16x128xf32> to vector<128xf32>
    %840 = vector.shape_cast %839 : vector<128xf32> to vector<1x128xf32>
    %cst_351 = arith.constant dense<0.000000e+00> : vector<1xf32>
    %841 = vector.multi_reduction <add>, %840, %cst_351 [1] : vector<1x128xf32> to vector<1xf32>
    %842 = vector.shape_cast %841 : vector<1xf32> to vector<1x1xf32>
    %cst_352 = arith.constant 3.79656587E-4 : f32
    %843 = vector.broadcast %cst_352 : f32 to vector<1x1xf32>
    %844 = arith.mulf %842, %843 : vector<1x1xf32>
    %845 = vector.shape_cast %844 : vector<1x1xf32> to vector<1x1xf32>
    %846 = vector.broadcast %845 : vector<1x1xf32> to vector<8x128xf32>
    %c0_353 = arith.constant 0 : index
    %c0_354 = arith.constant 0 : index
    %c0_355 = arith.constant 0 : index
    %847 = vector.load %arg4[%c0_353, %c0_354, %c0_355] : memref<1x8x128xf32, #tpu.memory_space<vmem>>, vector<1x8x128xf32>
    %848 = vector.shape_cast %847 : vector<1x8x128xf32> to vector<8x128xf32>
    %849 = vector.shape_cast %846 : vector<8x128xf32> to vector<1x8x128xf32>
    tpu.vector_store %arg4[%c0_353, %c0_354, %c0_355], %849 {strides = array<i32>} : memref<1x8x128xf32, #tpu.memory_space<vmem>>, vector<1x8x128xf32>,
    return
  }
  func.func @transform_0(%arg0: i32) -> (i32, i32, i32) {
    %c0_i32 = arith.constant 0 : i32
    %c0_i32_0 = arith.constant 0 : i32
    %c0_i32_1 = arith.constant 0 : i32
    return %c0_i32, %arg0, %c0_i32_0 : i32, i32, i32
  }
  func.func @transform_1(%arg0: i32) -> (i32, i32) {
    %c0_i32 = arith.constant 0 : i32
    %c0_i32_0 = arith.constant 0 : i32
    %c0_i32_1 = arith.constant 0 : i32
    return %c0_i32, %c0_i32_0 : i32, i32
  }
  func.func @transform_2(%arg0: i32) -> (i32, i32) {
    %c0_i32 = arith.constant 0 : i32
    %c0_i32_0 = arith.constant 0 : i32
    %c0_i32_1 = arith.constant 0 : i32
    return %c0_i32, %c0_i32_0 : i32, i32
  }
  func.func @transform_3(%arg0: i32) -> (i32, i32, i32) {
    %c0_i32 = arith.constant 0 : i32
    %c0_i32_0 = arith.constant 0 : i32
    %c0_i32_1 = arith.constant 0 : i32
    return %arg0, %c0_i32, %c0_i32_0 : i32, i32, i32
  }
}

</mosaic_0001>

<bundles_post_ra>
// kernel: tpu_custom_call.1
= control target key start
LH: loop header
LB: loop body
LE: loop exit
PB: predicated region body
PF: predicated region fallthrough
CT: control target
= control target key end

     0   :  { %s3643_s0 = inlined_call_operand.hbm [shape: f32[12,32,128], index: 0, kind: input, shape index: {}]   ;;  %s3644_s1 = inlined_call_operand.hbm [shape: f32[5,32], index: 1, kind: input, shape index: {}]   ;;  %s3645_s2 = inlined_call_operand.<no memory space> [shape: f32[1,1], index: 2, kind: input, shape index: {}]   ;;  %s3646_s3 = inlined_call_operand.hbm [shape: f32[2,8,128], index: 3, kind: output, shape index: {}]  }
   0x1   :  { %8 = sst [smem:[#allocation2]] %s3645_s2 }
   0x2   :  { %9 = vsyncpa [#allocation4], 0 }
   0x3   :  { %11 = vsyncpa [#allocation4 + $0x1], 0 }
   0x4   :  { %12 = vsyncpa [#allocation6], 0 }
   0x5   :  { %13 = vsyncpa [#allocation5], 0 }
   0x6   :  { %15 = vsyncpa [#allocation5 + $0x1], 0  ;;  %s2313_s14 = smov 0   ;;  %s2315_s15 = smov 0  }
   0x7   :  { %s2317_s16 = smov 0   ;;  %s2319_s17 = smov 0  }
   0x8 LB: > { %s2334_s2 = sadd.s32 4294967295, %s2279_s17   ;;  %s1763_s18 = sadd.s32 4294967294, %s2279_s17   ;;  %s2279_s17 = sphi %s2319_s17, %s3683_s17   ;;  %s2275_s16 = sphi %s2317_s16, %s3682_s16   ;;  %s2271_s15 = sphi %s2315_s15, %s3681_s15   ;;  %s2267_s14 = sphi %s2313_s14, %s3680_s14  }
   0x9   : > { %s2338_s19 = sadd.s32 1, %s2279_s17   ;;  %s28_s20 = sadd.s32 1, %s2275_s16 }
   0xa   : > { %s25_s21 = ssub.s32 %s2279_s17, %s2338_s19  ;;  %p35_p0 = scmp.ne.s32.totalorder %s2275_s16, %s2271_s15 }
   0xb   : > { %p26_p1 = scmp.eq.s32.totalorder %s25_s21, 0  ;;  %p36_p2 = scmp.eq.s32.totalorder %s2279_s17, 0 }
   0xc   : > { %p41_p3 = scmp.ne.s32.totalorder %s2271_s15, %s2267_s14  ;;  %p42_p4 = scmp.eq.s32.totalorder %s2334_s2, 0 }
   0xd   : > { %s2350_s22 = scalar_select %p26_p1, %s2275_s16, %s28_s20  }
   0xe   : > { %p2352_p5 = por %p36_p2, %p35_p0  ;;  %p2358_p6 = por %p42_p4, %p41_p3 }
   0xf   : > { %p107_p7 = scmp.eq.s32.totalorder %s2334_s2, 1  ;;  %p113_p8 = scmp.eq.s32.totalorder %s1763_s18, 1 }
  0x10   : > { %p1764_p9 = scmp.ge.s32.totalorder %s2279_s17, 1  ;;  %p120_p10 = scmp.lt.s32.totalorder %s2279_s17, 3 }
  0x11   : > { %p2365_p11 = por %p107_p7, %p35_p0  ;;  %p2369_p12 = por %p113_p8, %p41_p3 }
  0x12   : > { %p2373_p13 = pnand %p1764_p9, %p120_p10  ;;  %s2196_s30 = scalar_lea.hbm %s3644_s1, 128 }
  0x13   : > { %p2197_p0 = scmp.ne.s32.totalorder %s3644_s1, %s2196_s30  ;;  %p2203_p9 = scmp.lt.u32.totalorder %s2196_s30, %s3644_s1 }
  0x14   : > { %p1979_p1 = pneg %p2373_p13 }
  0x16   : > { %p1980_p2 = pnand %p1979_p1, %p42_p4 }
  0x18   : > { %p2198_p3 = pneg %p1980_p2 }
  0x1a   : > { %p2199_p7 = pnand %p2198_p3, %p2197_p0 }
  0x1c   : > { %p2200_p8 = pneg %p2199_p7 }
  0x1e   : > { %p2205_p10 = pnand %p2203_p9, %p2200_p8 }
  0x20   : > { %2208 = shalt.err (!%p2205_p10)
}
  0x21   : > { %s2281_s8 = smov [#allocation7]   ;;  %p1766_p1 = scmp.ge.s32.totalorder %s2279_s17, 2 }
  0x22   : > { %1982 = dma.hbm_to_smem (!%p1980_p2), %s3644_s1, 128, %s2281_s8, [#allocation6]  }
  0x23   : > { %141 = sbr.rel (%p1766_p1) target bundleno = 56 (0x38), region = 24 }
  0x2a   : > { %s145_s11 = sand.u32 1, %s2275_s16   ;;  %s1961_s13 = sshll.u32 %s2279_s17, 8 }
  0x2b   : > { %s1962_s12 = smul.u32 192, %s145_s11  ;;  %s2282_s18 = smov 512  }
  0x2c   : > { %1967 = sst [smem:[#allocation10]] (%p2352_p5), %s2282_s18  ;;  %s155_s29 = scalar_lea.hbm %s3643_s0, %s1961_s13 }
  0x2d   : > { %s1966_s20 = scalar_select %p2352_p5, [#allocation0], [#allocation11] }
  0x2e   : > { %s149_s4 = scalar_lea.vmem [#allocation3], %s1962_s12  ;;  %s2283_s6 = smov 256  }
  0x2f   : > { %s160_s30 = sld [smem:[%s1966_s20]]   ;;  %s168_s5 = sshll.u32 %s149_s4, 4  ;;  %s169_s5 = int_to_ptr.vmem [resolvable:$true] %s168_s5 }
  0x30   : > { %1968 = sst [smem:[#allocation10 + $0x1]] (%p2352_p5), %s2283_s6  ;;  %s2284_s7 = smov 2  }
  0x31   : > { %1969 = sst [smem:[#allocation10 + $0x2]] (%p2352_p5), %s2284_s7  ;;  %s2285_s8 = smov 128  }
  0x32   : > { %1970 = sst [smem:[#allocation10 + $0x3]] (%p2352_p5), %s2285_s8  ;;  %s2286_s9 = smov 8  }
  0x33   : > { %1971 = sst [smem:[#allocation10 + $0x4]] (%p2352_p5), %s2285_s8  ;;  %s146_s12 = scalar_lea.sflag [#allocation4], %s145_s11 }
  0x34   : > { %1972 = sst [smem:[#allocation10 + $0x5]] (%p2352_p5), %s2286_s9  ;;  %s2287_s18 = smov [#allocation9]  }
  0x35   : > { %s1769_s10 = sshll.u32 %s160_s30, 26 }
  0x36   : > { %s1770_s13 = sadd.s32 134217728, %s1769_s10 }
  0x37   : > { %1973 = dma.general (%p2352_p5), %s155_s29, 3072, %s169_s5, %s146_s12, %s2287_s18, [#allocation10], %s1770_s13, 0  }
  0x38 PF: > { %193 = sbr.rel (%p2373_p13) target bundleno = 630 (0x276), region = 32  ;;  %s2420_s20 = sand.u32 (!%p2373_p13), 1, %s2271_s15  }
  0x39   : > { %s1963_s21 = smul.u32 (!%p2373_p13), 192, %s2420_s20  ;;  %s196_s28 = scalar_lea.sflag (!%p2373_p13), [#allocation4], %s2420_s20 }
  0x3b   : > { %s2424_s4 = scalar_lea.vmem (!%p2373_p13), [#allocation3], %s1963_s21 }
  0x3f   : > { %2254 = dma.done.wait (%p2358_p6), %s196_s28, 3072  }
  0x40   : > { %2256 = vsyncadd (%p2358_p6), %s196_s28, 4294964224 }
  0x41   : > { %2258 = dma.done.wait (%p42_p4), [#allocation6], 128  }
  0x42   : > { %2260 = vsyncadd (%p42_p4), [#allocation6], 4294967168 }
  0x43   : > { %208 = sfence }
  0x44   : > { %v2435_v0 = vld [vmem:[%s2424_s4 + $0x40] sm:$0xff]  ;;  %v1782_v1 = vld [vmem:[%s2424_s4 + $0x50] sm:$0xff]  ;;  %v1783_v2 = vld [vmem:[%s2424_s4 + $0x58] sm:$0xff]  ;;  %s2495_s23 = sld [smem:[#allocation7 + $0x80]]  ;;  %s2507_s29 = sld [smem:[#allocation7 + $0x81]] }
  0x45   : > { %v2440_v3 = vld [vmem:[%s2424_s4 + $0x48] sm:$0xff]  ;;  %v2442_v4 = vadd.f32 -27.631021, %v1782_v1  ;;  %v2444_v5 = vadd.f32 -27.631021, %v1783_v2  ;;  %v2459_v45 = vld [vmem:[%s2424_s4] sm:$0xff] }
  0x46   : > { %v2446_v6 = vadd.f32 -9.999779e-13, %v1782_v1  ;;  %v2450_v8 = vadd.f32 -9.999779e-13, %v1783_v2  ;;  %v2474_v56 = vld [vmem:[%s2424_s4 + $0x8] sm:$0xff]  ;;  %vm230_vm3 = vcmp.gt.f32.partialorder %v2459_v45, 0.5 }
  0x47   : > { %v271_v7 = vsub.f32 %v2435_v0, %v2442_v4  ;;  %v272_v9 = vsub.f32 %v2440_v3, %v2444_v5  ;;  %v269_v46 = vmax.f32 %v2435_v0, %v2442_v4  ;;  %v270_v51 = vmax.f32 %v2440_v3, %v2444_v5  ;;  %s2497_s24 = sld [smem:[#allocation7 + $0x100]]  ;;  %s2509_s30 = sld [smem:[#allocation7 + $0x101]] }
  0x48   : > { %v305_v11 = vsub.f32 %v2435_v0, %v2446_v6  ;;  %v306_v13 = vsub.f32 %v2440_v3, %v2450_v8  ;;  %v303_v58 = vmax.f32 %v2435_v0, %v2446_v6  ;;  %v304_v2 = vmax.f32 %v2440_v3, %v2450_v8  ;;  %s2502_s27 = sld [smem:[#allocation7]]  ;;  %s2512_s5 = sld [smem:[#allocation7 + $0x1]] }
  0x49   : > { %v273_v10 = vand.u32 2147483647, %v271_v7  ;;  %v274_v12 = vand.u32 2147483647, %v272_v9  ;;  %vm231_vm5 = vcmp.gt.f32.partialorder %v2474_v56, 0.5  ;;  %s2504_s11 = sld [smem:[#allocation7 + $0x180]] }
  0x4a   : > { %v307_v15 = vand.u32 2147483647, %v305_v11  ;;  %v308_v17 = vand.u32 2147483647, %v306_v13  ;;  %s2522_s6 = sld [smem:[#allocation7 + $0x181]]  ;;  %s2533_s7 = sld [smem:[#allocation7 + $0x82]] }
  0x4b   : > { %v275_v14 = vsub.f32 0.0, %v273_v10  ;;  %v276_v16 = vsub.f32 0.0, %v274_v12  ;;  %s2549_s8 = sld [smem:[#allocation7 + $0x2]]  ;;  %s1812_s13 = sld [smem:[#allocation7 + $0x3]] }
  0x4c   : > { %v309_v19 = vsub.f32 0.0, %v307_v15  ;;  %v310_v21 = vsub.f32 0.0, %v308_v17  ;;  %s2556_s9 = sld [smem:[#allocation7 + $0x102]]  ;;  %s1813_s12 = sld [smem:[#allocation7 + $0x83]] }
  0x4d   : > { %v277_v18 = vmul.f32 1.442695, %v275_v14  ;;  %v279_v20 = vmul.f32 1.442695, %v276_v16  ;;  %v1775_v16 = vld [vmem:[%s2424_s4 + $0x18] sm:$0xff]  ;;  %s1810_s10 = sld [smem:[#allocation7 + $0x182]] }
  0x4e   : > { %v311_v22 = vmul.f32 1.442695, %v309_v19  ;;  %v313_v23 = vmul.f32 1.442695, %v310_v21  ;;  %v2288_v19 = vmov 0.0   ;;  %v528_v21 = vstv %s2495_s23  ;;  %s1814_s18 = sld [smem:[#allocation7 + $0x103]] }
  0x4f   : > { %2030 = vpow2.f32 %v277_v18  ;;  %v2525_v18 = vld [vmem:[%s2424_s4 + $0x80] sm:$0xff]  ;;  %s2577_s21 = sld [smem:[#allocation7 + $0x183]]  ;;  %s2584_s28 = sld [smem:[#allocation7 + $0x84]] }
  0x50   : > { %2032 = vpow2.f32 %v279_v20  ;;  %s2588_s23 = sld [smem:[#allocation7 + $0x200]] }
  0x51   : > { %2034 = vpow2.f32 %v311_v22  ;;  %v535_v22 = vstv %s2497_s24  ;;  %s2590_s24 = sld [smem:[#allocation2]] }
  0x52   : > { %2036 = vpow2.f32 %v313_v23  ;;  %v2536_v23 = vld [vmem:[%s2424_s4 + $0x88] sm:$0xff] }
  0x59   : > { %v2031_v24 = vpop.eup %2030 }
  0x5a   : > { %v2033_v25 = vpop.eup %2032  ;;  %v281_v26 = vadd.f32 1.0, %v2031_v24  ;;  %v284_v31 = vmul.f32 -0.5, %v2031_v24  ;;  %v287_v37 = vand.u32 2147483647, %v2031_v24 }
  0x5b   : > { %v2035_v27 = vpop.eup %2034  ;;  %v290_v28 = vadd.f32 1.0, %v2033_v25  ;;  %v293_v32 = vmul.f32 -0.5, %v2033_v25  ;;  %v296_v39 = vand.u32 2147483647, %v2033_v25 }
  0x5c   : > { %v2037_v29 = vpop.eup %2036  ;;  %2038 = vlog2.f32 %v281_v26  ;;  %v315_v30 = vadd.f32 1.0, %v2035_v27  ;;  %v318_v34 = vmul.f32 -0.5, %v2035_v27  ;;  %v285_v35 = vadd.f32 1.0, %v284_v31 }
  0x5d   : > { %2040 = vlog2.f32 %v290_v28  ;;  %v324_v33 = vadd.f32 1.0, %v2037_v29  ;;  %v327_v36 = vmul.f32 -0.5, %v2037_v29  ;;  %v294_v38 = vadd.f32 1.0, %v293_v32 }
  0x5e   : > { %2042 = vlog2.f32 %v315_v30  ;;  %v319_v40 = vadd.f32 1.0, %v318_v34  ;;  %v321_v41 = vand.u32 2147483647, %v2035_v27  ;;  %v286_v42 = vmul.f32 %v2031_v24, %v285_v35  ;;  %v2539_v24 = vld [vmem:[%s2424_s4 + $0x90] sm:$0xff]  ;;  %v2552_v30 = vld [vmem:[%s2424_s4 + $0x98] sm:$0xff] }
  0x5f   : > { %2044 = vlog2.f32 %v324_v33  ;;  %v328_v43 = vadd.f32 1.0, %v327_v36  ;;  %vm2463_vm0 = vcmp.lt.f32.partialorder %v287_v37, 0.0004427343  ;;  %v295_v48 = vmul.f32 %v2033_v25, %v294_v38 }
  0x60   : > { %v330_v49 = vand.u32 2147483647, %v2037_v29  ;;  %vm2469_vm1 = vcmp.lt.f32.partialorder %v296_v39, 0.0004427343  ;;  %v320_v54 = vmul.f32 %v2035_v27, %v319_v40  ;;  %vm322_vm2 = vcmp.lt.f32.partialorder %v321_v41, 0.0004427343 }
  0x61   : > { %v329_v61 = vmul.f32 %v2037_v29, %v328_v43  ;;  %v541_v26 = vstv %s2504_s11  ;;  %v531_v27 = vstv %s2502_s27  ;;  %v558_v28 = vstv %s2507_s29  ;;  %s2593_s27 = sld [smem:[#allocation7 + $0x4]]  ;;  %s2597_s11 = sld [smem:[#allocation7 + $0x201]] }
  0x62   : > { %vm331_vm4 = vcmp.lt.f32.partialorder %v330_v49, 0.0004427343  ;;  %v565_v29 = vstv %s2509_s30  ;;  %v536_v32 = vmul.f32 %v2525_v18, %v535_v22  ;;  %v537_v34 = vmul.f32 %v2536_v23, %v535_v22  ;;  %s2601_s29 = sld [smem:[#allocation7 + $0x104]] }
  0x63   : > { %v542_v35 = vmul.f32 %v2539_v24, %v541_v26  ;;  %v561_v36 = vstv %s2512_s5  ;;  %v566_v40 = vmul.f32 %v2525_v18, %v565_v29  ;;  %v567_v43 = vmul.f32 %v2536_v23, %v565_v29  ;;  %s2603_s30 = sld [smem:[#allocation7 + $0x184]]  ;;  %s2610_s5 = sld [smem:[#allocation7 + $0x5]] }
  0x64   : > { %v631_v29 = vstv %s2577_s21  ;;  %s2662_s21 = sld [smem:[#allocation7 + $0x186]] }
  0x66   : > { %v2039_v44 = vpop.eup %2038 }
  0x67   : > { %v2041_v50 = vpop.eup %2040  ;;  %v283_v52 = vmul.f32 0.6931472, %v2039_v44  ;;  %v571_v44 = vstv %s2522_s6  ;;  %s2615_s6 = sld [smem:[#allocation7 + $0x85]] }
  0x68   : > { %v2043_v55 = vpop.eup %2042  ;;  %v292_v57 = vmul.f32 0.6931472, %v2041_v50  ;;  %v572_v49 = vmul.f32 %v2539_v24, %v571_v44 }
  0x69   : > { %v289_v59 = vsel %vm2463_vm0, %v286_v42, %v283_v52  ;;  %v317_v60 = vmul.f32 0.6931472, %v2043_v55  ;;  %v2045_v62 = vpop.eup %2044  ;;  %v543_v42 = vmul.f32 %v2552_v30, %v541_v26  ;;  %v588_v52 = vstv %s2533_s7  ;;  %s2617_s7 = sld [smem:[#allocation7 + $0x105]] }
  0x6a   : > { %v298_v63 = vsel %vm2469_vm1, %v295_v48, %v292_v57  ;;  %v299_v1 = vadd.f32 %v289_v59, %v269_v46  ;;  %v326_v9 = vmul.f32 0.6931472, %v2045_v62 }
  0x6b   : > { %v300_v0 = vadd.f32 %v298_v63, %v270_v51  ;;  %v323_v7 = vsel %vm322_vm2, %v320_v54, %v317_v60  ;;  %v573_v51 = vmul.f32 %v2552_v30, %v571_v44  ;;  %v591_v60 = vstv %s2549_s8  ;;  %s2630_s8 = sld [smem:[#allocation7 + $0x185]] }
  0x6c   : > { %v333_v10 = vadd.f32 %v323_v7, %v303_v58  ;;  %v301_v11 = vsel %vm230_vm3, %v299_v1, %v2442_v4  ;;  %v332_v12 = vsel %vm331_vm4, %v329_v61, %v326_v9  ;;  %v595_v63 = vstv %s2556_s9  ;;  %s2635_s9 = sld [smem:[#allocation7 + $0x202]] }
  0x6d   : > { %v302_v13 = vsel %vm231_vm5, %v300_v0, %v2444_v5  ;;  %v334_v14 = vadd.f32 %v332_v12, %v304_v2  ;;  %v1774_v5 = vld [vmem:[%s2424_s4 + $0x10] sm:$0xff]  ;;  %v596_v7 = vmul.f32 %v2525_v18, %v595_v63  ;;  %v597_v9 = vmul.f32 %v2536_v23, %v595_v63 }
  0x6e   : > { %v335_v3 = vsel %vm230_vm3, %v2446_v6, %v333_v10  ;;  %v655_v63 = vstv %s2601_s29  ;;  %s2696_s29 = sld [smem:[#allocation7 + $0x205]] }
  0x6f   : > { %v336_v15 = vsel %vm231_vm5, %v2450_v8, %v334_v14  ;;  %v337_v4 = vsub.f32 %v301_v11, %v335_v3  ;;  %v1778_v14 = vld [vmem:[%s2424_s4 + $0x30] sm:$0xff] }
  0x70   : > { %v338_v6 = vsub.f32 %v302_v13, %v336_v15  ;;  %v601_v13 = vstv %s1810_s10  ;;  %s2650_s10 = sld [smem:[#allocation7 + $0x6]] }
  0x71   : > { %vm2514_vm6 = vcmp.gt.f32.partialorder %v337_v4, %v1774_v5  ;;  %v602_v3 = vmul.f32 %v2539_v24, %v601_v13  ;;  %v603_v15 = vmul.f32 %v2552_v30, %v601_v13  ;;  %v618_v4 = vstv %s1813_s12  ;;  %s2655_s12 = sld [smem:[#allocation7 + $0x106]] }
  0x72   : > { %vm2518_vm7 = vcmp.gt.f32.partialorder %v338_v6, %v1775_v16  ;;  %v2529_v20 = vsel %vm2514_vm6, 1.0, %v2288_v19  ;;  %v621_v5 = vstv %s1812_s13  ;;  %s2653_s13 = sld [smem:[#allocation7 + $0x86]] }
  0x73   : > { %v2543_v25 = vsel %vm2518_vm7, 1.0, %v2288_v19  ;;  %v529_v31 = vmul.f32 %v2529_v20, %v528_v21  ;;  %v559_v38 = vmul.f32 %v2529_v20, %v558_v28  ;;  %v589_v58 = vmul.f32 %v2529_v20, %v588_v52 }
  0x74   : > { %v530_v33 = vmul.f32 %v2543_v25, %v528_v21  ;;  %v560_v39 = vmul.f32 %v2543_v25, %v558_v28  ;;  %v590_v59 = vmul.f32 %v2543_v25, %v588_v52  ;;  %v619_v16 = vmul.f32 %v2529_v20, %v618_v4 }
  0x75   : > { %v532_v37 = vadd.f32 %v531_v27, %v529_v31  ;;  %v562_v47 = vadd.f32 %v561_v36, %v559_v38  ;;  %v592_v2 = vadd.f32 %v591_v60, %v589_v58  ;;  %v620_v19 = vmul.f32 %v2543_v25, %v618_v4  ;;  %v1776_v31 = vld [vmem:[%s2424_s4 + $0x20] sm:$0xff] }
  0x76   : > { %v533_v41 = vadd.f32 %v531_v27, %v530_v33  ;;  %v563_v48 = vadd.f32 %v561_v36, %v560_v39  ;;  %v593_v0 = vadd.f32 %v591_v60, %v590_v59  ;;  %v2586_v21 = vadd.f32 -27.631021, %v1778_v14 }
  0x77   : > { %v538_v46 = vadd.f32 %v536_v32, %v532_v37  ;;  %v568_v54 = vadd.f32 %v566_v40, %v562_v47  ;;  %v598_v11 = vadd.f32 %v596_v7, %v592_v2  ;;  %v622_v26 = vadd.f32 %v621_v5, %v619_v16  ;;  %v1779_v32 = vld [vmem:[%s2424_s4 + $0x38] sm:$0xff] }
  0x78   : > { %v539_v50 = vadd.f32 %v537_v34, %v533_v41  ;;  %v569_v55 = vadd.f32 %v567_v43, %v563_v48  ;;  %v599_v12 = vadd.f32 %v597_v9, %v593_v0  ;;  %v623_v27 = vadd.f32 %v621_v5, %v620_v19  ;;  %v2613_v43 = vld [vmem:[%s2424_s4 + $0x28] sm:$0xff] }
  0x79   : > { %v544_v53 = vadd.f32 %v542_v35, %v538_v46  ;;  %v574_v61 = vadd.f32 %v572_v49, %v568_v54  ;;  %v604_v6 = vadd.f32 %v602_v3, %v598_v11  ;;  %v625_v28 = vstv %s1814_s18  ;;  %s2657_s18 = sld [smem:[#allocation7 + $0x203]] }
  0x7a   : > { %v545_v57 = vadd.f32 %v543_v42, %v539_v50  ;;  %v575_v62 = vadd.f32 %v573_v51, %v569_v55  ;;  %v605_v22 = vadd.f32 %v603_v15, %v599_v12  ;;  %v626_v34 = vmul.f32 %v2525_v18, %v625_v28 }
  0x7b   : > { %v627_v35 = vmul.f32 %v2536_v23, %v625_v28  ;;  %v632_v37 = vmul.f32 %v2539_v24, %v631_v29  ;;  %v633_v38 = vmul.f32 %v2552_v30, %v631_v29  ;;  %v2607_v39 = vadd.f32 -27.631021, %v1779_v32 }
  0x7c   : > { %v546_v1 = vpack.c.bf16 %v545_v57, %v544_v53  ;;  %v576_v10 = vpack.c.bf16 %v575_v62, %v574_v61  ;;  %v606_v33 = vpack.c.bf16 %v605_v22, %v604_v6  ;;  %v377_v40 = vsub.f32 %v1776_v31, %v2586_v21 }
  0x7d   : > { %v628_v41 = vadd.f32 %v626_v34, %v622_v26  ;;  %v629_v42 = vadd.f32 %v627_v35, %v623_v27  ;;  %v648_v46 = vstv %s2584_s28  ;;  %v2621_v47 = vmul.f32 1.442695, %v2586_v21  ;;  %s2666_s28 = sld [smem:[#allocation7 + $0x7]] }
  0x7e   : > { %2046 = vtanh.bf16 %v546_v1  ;;  %v551_v48 = vstv %s2588_s23  ;;  %v378_v52 = vsub.f32 %v2613_v43, %v2607_v39  ;;  %v2626_v53 = vand.u32 2147483647, %v377_v40  ;;  %s2668_s23 = sld [smem:[#allocation7 + $0x87]] }
  0x7f   : > { %2048 = vtanh.bf16 %v576_v10  ;;  %v634_v49 = vadd.f32 %v632_v37, %v628_v41  ;;  %v635_v50 = vadd.f32 %v633_v38, %v629_v42  ;;  %v524_v54 = vstv %s2590_s24  ;;  %s2670_s24 = sld [smem:[#allocation7 + $0x107]] }
  0x80   : > { %2050 = vtanh.bf16 %v606_v33  ;;  %v651_v55 = vstv %s2593_s27  ;;  %v581_v57 = vstv %s2597_s11  ;;  %v649_v59 = vmul.f32 %v2529_v20, %v648_v46  ;;  %s2677_s27 = sld [smem:[#allocation7 + $0x187]]  ;;  %s2684_s11 = sld [smem:[#allocation7 + $0x204]] }
  0x81   : > { %v636_v58 = vpack.c.bf16 %v635_v50, %v634_v49  ;;  %v650_v60 = vmul.f32 %v2543_v25, %v648_v46  ;;  %v661_v1 = vstv %s2603_s30  ;;  %v656_v9 = vmul.f32 %v2525_v18, %v655_v63  ;;  %s2698_s30 = sld [smem:[#allocation7 + $0x206]] }
  0x82   : > { %v652_v0 = vadd.f32 %v651_v55, %v649_v59  ;;  %v657_v10 = vmul.f32 %v2536_v23, %v655_v63  ;;  %v662_v11 = vmul.f32 %v2539_v24, %v661_v1  ;;  %v663_v12 = vmul.f32 %v2552_v30, %v661_v1 }
  0x83   : > { %v653_v7 = vadd.f32 %v651_v55, %v650_v60  ;;  %2052 = vtanh.bf16 %v636_v58  ;;  %v678_v14 = vstv %s2615_s6  ;;  %v681_v3 = vstv %s2610_s5  ;;  %s2706_s5 = sld [smem:[#allocation7 + $0x8]] }
  0x84   : > { %v658_v13 = vadd.f32 %v656_v9, %v652_v0  ;;  %v685_v15 = vstv %s2617_s7  ;;  %v679_v16 = vmul.f32 %v2529_v20, %v678_v14  ;;  %v680_v19 = vmul.f32 %v2543_v25, %v678_v14  ;;  %s2708_s6 = sld [smem:[#allocation7 + $0x88]] }
  0x85   : > { %v659_v6 = vadd.f32 %v657_v10, %v653_v7  ;;  %v686_v27 = vmul.f32 %v2525_v18, %v685_v15  ;;  %v687_v28 = vmul.f32 %v2536_v23, %v685_v15  ;;  %v691_v33 = vstv %s2630_s8  ;;  %s2714_s7 = sld [smem:[#allocation7 + $0x108]] }
  0x86   : > { %v664_v26 = vadd.f32 %v662_v11, %v658_v13  ;;  %v682_v31 = vadd.f32 %v681_v3, %v679_v16  ;;  %v683_v32 = vadd.f32 %v681_v3, %v680_v19  ;;  %v692_v37 = vmul.f32 %v2539_v24, %v691_v33  ;;  %s2716_s8 = sld [smem:[#allocation7 + $0x188]] }
  0x87   : > { %v665_v29 = vadd.f32 %v663_v12, %v659_v6  ;;  %v611_v40 = vstv %s2635_s9  ;;  %v693_v42 = vmul.f32 %v2552_v30, %v691_v33  ;;  %v2664_v49 = vand.u32 2147483647, %v378_v52  ;;  %s2724_s9 = sld [smem:[#allocation7 + $0x207]] }
  0x88   : > { %v688_v46 = vadd.f32 %v686_v27, %v682_v31  ;;  %v2673_v55 = vmul.f32 1.442695, %v2607_v39  ;;  %v381_v58 = vsub.f32 0.0, %v2626_v53  ;;  %v711_v63 = vstv %s2650_s10  ;;  %v1786_v31 = vld [vmem:[%s2424_s4 + $0x70] sm:$0xff]  ;;  %s2730_s10 = sld [smem:[#allocation7 + $0x9]] }
  0x89   : > { %v2047_v36 = vpop.eup %2046  ;;  %v666_v41 = vpack.c.bf16 %v665_v29, %v664_v26  ;;  %v715_v1 = vstv %s2655_s12  ;;  %v641_v7 = vstv %s2657_s18  ;;  %v721_v14 = vstv %s2662_s21  ;;  %s2734_s12 = sld [smem:[#allocation7 + $0x109]]  ;;  %s2752_s21 = sld [smem:[#allocation7 + $0x8a]] }
  0x8a   : > { %v548_v44 = vunpack.c.l.bf16 %v2047_v36  ;;  %v2049_v51 = vpop.eup %2048  ;;  %v549_v61 = vunpack.c.h.bf16 %v2047_v36  ;;  %v716_v9 = vmul.f32 %v2525_v18, %v715_v1  ;;  %v717_v10 = vmul.f32 %v2536_v23, %v715_v1  ;;  %s2736_s18 = sld [smem:[#allocation7 + $0x189]] }
  0x8b   : > { %v578_v2 = vunpack.c.l.bf16 %v2049_v51  ;;  %v2051_v4 = vpop.eup %2050  ;;  %v579_v22 = vunpack.c.h.bf16 %v2049_v51  ;;  %2054 = vtanh.bf16 %v666_v41  ;;  %v738_v16 = vstv %s2668_s23  ;;  %s2767_s23 = sld [smem:[#allocation7 + $0x10a]] }
  0x8c   : > { %v552_v62 = vmul.f32 %v551_v48, %v548_v44  ;;  %v553_v5 = vmul.f32 %v551_v48, %v549_v61  ;;  %v608_v36 = vunpack.c.l.bf16 %v2051_v4  ;;  %v609_v44 = vunpack.c.h.bf16 %v2051_v4 }
  0x8d   : > { %v582_v35 = vmul.f32 %v581_v57, %v578_v2  ;;  %v583_v43 = vmul.f32 %v581_v57, %v579_v22  ;;  %v689_v48 = vadd.f32 %v687_v28, %v683_v32  ;;  %2056 = vpow2.f32 %v2621_v47 }
  0x8e   : > { %v554_v34 = vadd.f32 %v552_v62, %v524_v54  ;;  %v555_v38 = vadd.f32 %v553_v5, %v524_v54  ;;  %v612_v51 = vmul.f32 %v611_v40, %v608_v36  ;;  %v694_v54 = vadd.f32 %v692_v37, %v688_v46  ;;  %v2053_v52 = vpop.eup %2052 }
  0x8f   : > { %v695_v57 = vadd.f32 %v693_v42, %v689_v48  ;;  %v613_v60 = vmul.f32 %v611_v40, %v609_v44  ;;  %v708_v62 = vstv %s2653_s13  ;;  %v382_v2 = vsub.f32 0.0, %v2664_v49  ;;  %s2732_s13 = sld [smem:[#allocation7 + $0x89]] }
  0x90   : > { %v584_v50 = vadd.f32 %v582_v35, %v554_v34  ;;  %v585_v59 = vadd.f32 %v583_v43, %v555_v38  ;;  %v709_v47 = vmul.f32 %v2529_v20, %v708_v62  ;;  %v710_v53 = vmul.f32 %v2543_v25, %v708_v62 }
  0x91   : > { %v696_v61 = vpack.c.bf16 %v695_v57, %v694_v54  ;;  %v638_v12 = vunpack.c.l.bf16 %v2053_v52  ;;  %v639_v3 = vunpack.c.h.bf16 %v2053_v52  ;;  %v722_v4 = vmul.f32 %v2539_v24, %v721_v14 }
  0x92   : > { %v614_v0 = vadd.f32 %v612_v51, %v584_v50  ;;  %v615_v11 = vadd.f32 %v613_v60, %v585_v59  ;;  %v712_v13 = vadd.f32 %v711_v63, %v709_v47  ;;  %v713_v15 = vadd.f32 %v711_v63, %v710_v53  ;;  %v2719_v50 = vld [vmem:[%s2424_s4 + $0x60] sm:$0xff]  ;;  %v1787_v51 = vld [vmem:[%s2424_s4 + $0x78] sm:$0xff] }
  0x93   : > { %2058 = vtanh.bf16 %v696_v61  ;;  %v723_v5 = vmul.f32 %v2552_v30, %v721_v14  ;;  %v741_v19 = vstv %s2666_s28  ;;  %v745_v22 = vstv %s2670_s24  ;;  %s2757_s28 = sld [smem:[#allocation7 + $0xa]]  ;;  %s2771_s24 = sld [smem:[#allocation7 + $0x208]] }
  0x94   : > { %v718_v6 = vadd.f32 %v716_v9, %v712_v13  ;;  %v719_v26 = vadd.f32 %v717_v10, %v713_v15  ;;  %v739_v27 = vmul.f32 %v2529_v20, %v738_v16  ;;  %v740_v28 = vmul.f32 %v2543_v25, %v738_v16 }
  0x95   : > { %v746_v29 = vmul.f32 %v2525_v18, %v745_v22  ;;  %v642_v32 = vmul.f32 %v641_v7, %v638_v12  ;;  %v747_v34 = vmul.f32 %v2536_v23, %v745_v22  ;;  %v751_v35 = vstv %s2677_s27  ;;  %s2779_s27 = sld [smem:[#allocation7 + $0x18a]] }
  0x96   : > { %v724_v33 = vadd.f32 %v722_v4, %v718_v6  ;;  %v2055_v36 = vpop.eup %2054  ;;  %v643_v37 = vmul.f32 %v641_v7, %v639_v3  ;;  %v725_v38 = vadd.f32 %v723_v5, %v719_v26  ;;  %v742_v40 = vadd.f32 %v741_v19, %v739_v27 }
  0x97   : > { %v743_v41 = vadd.f32 %v741_v19, %v740_v28  ;;  %v2710_v42 = vpop.eup %2056  ;;  %v668_v43 = vunpack.c.l.bf16 %v2055_v36  ;;  %v669_v44 = vunpack.c.h.bf16 %v2055_v36  ;;  %v671_v46 = vstv %s2684_s11  ;;  %s2781_s11 = sld [smem:[#allocation7 + $0x8b]] }
  0x98   : > { %v752_v48 = vmul.f32 %v2539_v24, %v751_v35  ;;  %v2722_v54 = vadd.f32 -9.999779e-13, %v1786_v31  ;;  %v726_v57 = vpack.c.bf16 %v725_v38, %v724_v33  ;;  %v748_v52 = vadd.f32 %v746_v29, %v742_v40 }
  0x99   : > { %v749_v59 = vadd.f32 %v747_v34, %v743_v41  ;;  %2060 = vpow2.f32 %v2673_v55  ;;  %v2727_v60 = vmul.f32 1.442695, %v381_v58  ;;  %v644_v61 = vadd.f32 %v642_v32, %v614_v0 }
  0x9a   : > { %v753_v62 = vmul.f32 %v2552_v30, %v751_v35  ;;  %v645_v63 = vadd.f32 %v643_v37, %v615_v11  ;;  %v672_v1 = vmul.f32 %v671_v46, %v668_v43  ;;  %v673_v7 = vmul.f32 %v671_v46, %v669_v44 }
  0x9b   : > { %2062 = vtanh.bf16 %v726_v57  ;;  %v2738_v58 = vadd.f32 -9.999779e-13, %v1787_v51  ;;  %v2740_v0 = vadd.f32 -27.631021, %v1786_v31  ;;  %v754_v47 = vadd.f32 %v752_v48, %v748_v52 }
  0x9c   : > { %v755_v53 = vadd.f32 %v753_v62, %v749_v59  ;;  %v2742_v9 = vadd.f32 -27.631021, %v1787_v51  ;;  %v417_v10 = vsub.f32 %v2722_v54, %v2719_v50  ;;  %v701_v12 = vstv %s2696_s29  ;;  %s2785_s29 = sld [smem:[#allocation7 + $0xb]] }
  0x9d   : > { %v731_v13 = vstv %s2698_s30  ;;  %v768_v3 = vstv %s2708_s6  ;;  %v771_v15 = vstv %s2706_s5  ;;  %v674_v4 = vadd.f32 %v672_v1, %v644_v61  ;;  %s2791_s5 = sld [smem:[#allocation7 + $0x10b]]  ;;  %s2807_s30 = sld [smem:[#allocation7 + $0x10c]] }
  0x9e   : > { %v2059_v55 = vpop.eup %2058  ;;  %v756_v14 = vpack.c.bf16 %v755_v53, %v754_v47  ;;  %v675_v5 = vadd.f32 %v673_v7, %v645_v63  ;;  %v769_v6 = vmul.f32 %v2529_v20, %v768_v3  ;;  %v770_v16 = vmul.f32 %v2543_v25, %v768_v3  ;;  %s2793_s6 = sld [smem:[#allocation7 + $0x18b]] }
  0x9f   : > { %v698_v11 = vunpack.c.l.bf16 %v2059_v55  ;;  %v699_v19 = vunpack.c.h.bf16 %v2059_v55  ;;  %v775_v22 = vstv %s2714_s7  ;;  %v781_v26 = vstv %s2716_s8  ;;  %s2799_s7 = sld [smem:[#allocation7 + $0xc]] }
  0xa0   : > { %2064 = vtanh.bf16 %v756_v14  ;;  %v761_v28 = vstv %s2724_s9  ;;  %v772_v29 = vadd.f32 %v771_v15, %v769_v6  ;;  %v773_v31 = vadd.f32 %v771_v15, %v770_v16  ;;  %s2801_s8 = sld [smem:[#allocation7 + $0x8c]]  ;;  %s2830_s9 = sld [smem:[#allocation7 + $0xd]] }
  0xa1   : > { %v702_v27 = vmul.f32 %v701_v12, %v698_v11  ;;  %v776_v32 = vmul.f32 %v2525_v18, %v775_v22  ;;  %v777_v33 = vmul.f32 %v2536_v23, %v775_v22  ;;  %v782_v34 = vmul.f32 %v2539_v24, %v781_v26 }
  0xa2   : > { %v783_v35 = vmul.f32 %v2552_v30, %v781_v26  ;;  %v798_v36 = vstv %s2732_s13  ;;  %v801_v37 = vstv %s2730_s10  ;;  %v805_v38 = vstv %s2734_s12  ;;  %s2816_s10 = sld [smem:[#allocation7 + $0x209]]  ;;  %s2820_s13 = sld [smem:[#allocation7 + $0x18c]] }
  0xa3   : > { %v811_v40 = vstv %s2736_s18  ;;  %v2769_v41 = vpop.eup %2060  ;;  %v778_v43 = vadd.f32 %v776_v32, %v772_v29  ;;  %v779_v44 = vadd.f32 %v777_v33, %v773_v31  ;;  %v799_v46 = vmul.f32 %v2529_v20, %v798_v36  ;;  %s2832_s12 = sld [smem:[#allocation7 + $0x8d]] }
  0xa4   : > { %v800_v48 = vmul.f32 %v2543_v25, %v798_v36  ;;  %v806_v51 = vmul.f32 %v2525_v18, %v805_v38  ;;  %v807_v57 = vmul.f32 %v2536_v23, %v805_v38  ;;  %v812_v52 = vmul.f32 %v2539_v24, %v811_v40  ;;  %s2837_s18 = sld [smem:[#allocation7 + $0x10d]] }
  0xa5   : > { %v813_v59 = vmul.f32 %v2552_v30, %v811_v40  ;;  %v784_v62 = vadd.f32 %v782_v34, %v778_v43  ;;  %v785_v63 = vadd.f32 %v783_v35, %v779_v44  ;;  %v802_v1 = vadd.f32 %v801_v37, %v799_v46 }
  0xa6   : > { %v2063_v61 = vpop.eup %2062  ;;  %v803_v7 = vadd.f32 %v801_v37, %v800_v48  ;;  %v703_v55 = vmul.f32 %v701_v12, %v699_v19  ;;  %v828_v11 = vstv %s2752_s21  ;;  %v704_v16 = vadd.f32 %v702_v27, %v674_v4  ;;  %s2839_s21 = sld [smem:[#allocation7 + $0x20a]] }
  0xa7   : > { %v728_v47 = vunpack.c.l.bf16 %v2063_v61  ;;  %v729_v53 = vunpack.c.h.bf16 %v2063_v61  ;;  %v786_v14 = vpack.c.bf16 %v785_v63, %v784_v62  ;;  %v808_v3 = vadd.f32 %v806_v51, %v802_v1 }
  0xa8   : > { %v809_v15 = vadd.f32 %v807_v57, %v803_v7  ;;  %v829_v6 = vmul.f32 %v2529_v20, %v828_v11  ;;  %v830_v26 = vmul.f32 %v2543_v25, %v828_v11  ;;  %v831_v29 = vstv %s2757_s28  ;;  %s2846_s28 = sld [smem:[#allocation7 + $0x18d]] }
  0xa9   : > { %v732_v22 = vmul.f32 %v731_v13, %v728_v47  ;;  %2066 = vtanh.bf16 %v786_v14  ;;  %v814_v12 = vadd.f32 %v812_v52, %v808_v3  ;;  %v705_v33 = vadd.f32 %v703_v55, %v675_v5 }
  0xaa   : > { %v815_v19 = vadd.f32 %v813_v59, %v809_v15  ;;  %v832_v31 = vadd.f32 %v831_v29, %v829_v6  ;;  %v733_v4 = vmul.f32 %v731_v13, %v729_v53  ;;  %v833_v27 = vadd.f32 %v831_v29, %v830_v26 }
  0xab   : > { %v2065_v32 = vpop.eup %2064  ;;  %v835_v34 = vstv %s2767_s23  ;;  %v791_v40 = vstv %s2771_s24  ;;  %v841_v5 = vstv %s2779_s27  ;;  %v858_v44 = vstv %s2781_s11  ;;  %s2852_s23 = sld [smem:[#allocation7 + $0x8e]] }
  0xac   : > { %v758_v35 = vunpack.c.l.bf16 %v2065_v32  ;;  %v759_v36 = vunpack.c.h.bf16 %v2065_v32  ;;  %v816_v37 = vpack.c.bf16 %v815_v19, %v814_v12  ;;  %v836_v38 = vmul.f32 %v2525_v18, %v835_v34  ;;  %s2860_s27 = sld [smem:[#allocation7 + $0xe]] }
  0xad   : > { %v837_v43 = vmul.f32 %v2536_v23, %v835_v34  ;;  %v734_v13 = vadd.f32 %v732_v22, %v704_v16  ;;  %v842_v57 = vmul.f32 %v2539_v24, %v841_v5  ;;  %v843_v52 = vmul.f32 %v2552_v30, %v841_v5  ;;  %s2862_s11 = sld [smem:[#allocation7 + $0x10e]] }
  0xae   : > { %v762_v46 = vmul.f32 %v761_v28, %v758_v35  ;;  %2068 = vtanh.bf16 %v816_v37  ;;  %v838_v48 = vadd.f32 %v836_v38, %v832_v31  ;;  %v859_v59 = vmul.f32 %v2529_v20, %v858_v44  ;;  %v2842_v37 = vld [vmem:[%s2424_s4 + $0x68] sm:$0xff]  ;;  %s2871_s24 = sld [smem:[#allocation7 + $0x18e]] }
  0xaf   : > { %v839_v51 = vadd.f32 %v837_v43, %v833_v27  ;;  %v735_v61 = vadd.f32 %v733_v4, %v705_v33  ;;  %v763_v62 = vmul.f32 %v761_v28, %v759_v36  ;;  %v860_v63 = vmul.f32 %v2543_v25, %v858_v44 }
  0xb0   : > { %v861_v1 = vstv %s2785_s29  ;;  %v844_v7 = vadd.f32 %v842_v57, %v838_v48  ;;  %v865_v53 = vstv %s2791_s5  ;;  %v871_v28 = vstv %s2793_s6  ;;  %s2866_s29 = sld [smem:[#allocation7 + $0x20b]]  ;;  %s2880_s5 = sld [smem:[#allocation7 + $0x8f]] }
  0xb1   : > { %v845_v55 = vadd.f32 %v843_v52, %v839_v51  ;;  %v862_v47 = vadd.f32 %v861_v1, %v859_v59  ;;  %v863_v11 = vadd.f32 %v861_v1, %v860_v63  ;;  %v866_v14 = vmul.f32 %v2525_v18, %v865_v53  ;;  %s2882_s6 = sld [smem:[#allocation7 + $0x20c]] }
  0xb2   : > { %v867_v3 = vmul.f32 %v2536_v23, %v865_v53  ;;  %v764_v15 = vadd.f32 %v762_v46, %v734_v13  ;;  %v872_v16 = vmul.f32 %v2539_v24, %v871_v28  ;;  %v873_v22 = vmul.f32 %v2552_v30, %v871_v28 }
  0xb3   : > { %v846_v6 = vpack.c.bf16 %v845_v55, %v844_v7  ;;  %v868_v26 = vadd.f32 %v866_v14, %v862_v47  ;;  %v888_v12 = vstv %s2801_s8  ;;  %v891_v19 = vstv %s2799_s7  ;;  %s2884_s7 = sld [smem:[#allocation7 + $0xf]] }
  0xb4   : > { %v869_v29 = vadd.f32 %v867_v3, %v863_v11  ;;  %v2067_v31 = vpop.eup %2066  ;;  %v889_v32 = vmul.f32 %v2529_v20, %v888_v12  ;;  %v890_v33 = vmul.f32 %v2543_v25, %v888_v12  ;;  %v895_v4 = vstv %s2807_s30  ;;  %s2890_s8 = sld [smem:[#allocation7 + $0x10f]] }
  0xb5   : > { %2070 = vtanh.bf16 %v846_v6  ;;  %v788_v27 = vunpack.c.l.bf16 %v2067_v31  ;;  %v789_v34 = vunpack.c.h.bf16 %v2067_v31  ;;  %v874_v35 = vadd.f32 %v872_v16, %v868_v26  ;;  %s2892_s30 = sld [smem:[#allocation7 + $0x18f]] }
  0xb6   : > { %v875_v36 = vadd.f32 %v873_v22, %v869_v29  ;;  %v892_v38 = vadd.f32 %v891_v19, %v889_v32  ;;  %v893_v43 = vadd.f32 %v891_v19, %v890_v33  ;;  %v896_v5 = vmul.f32 %v2525_v18, %v895_v4 }
  0xb7   : > { %v897_v44 = vmul.f32 %v2536_v23, %v895_v4  ;;  %v792_v13 = vmul.f32 %v791_v40, %v788_v27  ;;  %v821_v46 = vstv %s2816_s10  ;;  %v901_v51 = vstv %s2820_s13  ;;  %s2894_s10 = sld [smem:[#allocation7 + $0x20d]]  ;;  %s2902_s13 = sld [smem:[#allocation7 + $0x10]] }
  0xb8   : > { %v876_v48 = vpack.c.bf16 %v875_v36, %v874_v35  ;;  %v898_v52 = vadd.f32 %v896_v5, %v892_v38  ;;  %v902_v63 = vmul.f32 %v2539_v24, %v901_v51  ;;  %v903_v1 = vmul.f32 %v2552_v30, %v901_v51 }
  0xb9   : > { %v2069_v57 = vpop.eup %2068  ;;  %v899_v59 = vadd.f32 %v897_v44, %v893_v43  ;;  %v418_v7 = vsub.f32 %v2738_v58, %v2842_v37  ;;  %v765_v55 = vadd.f32 %v763_v62, %v735_v61  ;;  %v793_v47 = vmul.f32 %v791_v40, %v789_v34 }
  0xba   : > { %v818_v53 = vunpack.c.l.bf16 %v2069_v57  ;;  %v794_v11 = vadd.f32 %v792_v13, %v764_v15  ;;  %2072 = vtanh.bf16 %v876_v48  ;;  %v904_v14 = vadd.f32 %v902_v63, %v898_v52 }
  0xbb   : > { %v905_v3 = vadd.f32 %v903_v1, %v899_v59  ;;  %v819_v28 = vunpack.c.h.bf16 %v2069_v57  ;;  %v918_v16 = vstv %s2832_s12  ;;  %v921_v22 = vstv %s2830_s9  ;;  %s2904_s9 = sld [smem:[#allocation7 + $0x90]] }
  0xbc   : > { %v822_v6 = vmul.f32 %v821_v46, %v818_v53  ;;  %v919_v40 = vmul.f32 %v2529_v20, %v918_v16  ;;  %v920_v62 = vmul.f32 %v2543_v25, %v918_v16  ;;  %v925_v26 = vstv %s2837_s18  ;;  %s2907_s12 = sld [smem:[#allocation7 + $0x110]] }
  0xbd   : > { %v906_v61 = vpack.c.bf16 %v905_v3, %v904_v14  ;;  %v795_v15 = vadd.f32 %v793_v47, %v765_v55  ;;  %v851_v29 = vstv %s2839_s21  ;;  %v926_v12 = vmul.f32 %v2525_v18, %v925_v26  ;;  %s2909_s18 = sld [smem:[#allocation7 + $0x190]]  ;;  %s2919_s21 = sld [smem:[#allocation7 + $0x91]] }
  0xbe   : > { %v927_v19 = vmul.f32 %v2536_v23, %v925_v26  ;;  %v922_v31 = vadd.f32 %v921_v22, %v919_v40  ;;  %v923_v32 = vadd.f32 %v921_v22, %v920_v62  ;;  %v931_v33 = vstv %s2846_s28  ;;  %s2921_s28 = sld [smem:[#allocation7 + $0x111]] }
  0xbf   : > { %2074 = vtanh.bf16 %v906_v61  ;;  %v823_v27 = vmul.f32 %v821_v46, %v819_v28  ;;  %v932_v34 = vmul.f32 %v2539_v24, %v931_v33  ;;  %v933_v35 = vmul.f32 %v2552_v30, %v931_v33 }
  0xc0   : > { %v2071_v4 = vpop.eup %2070  ;;  %v948_v36 = vstv %s2852_s23  ;;  %v824_v38 = vadd.f32 %v822_v6, %v794_v11  ;;  %v928_v5 = vadd.f32 %v926_v12, %v922_v31  ;;  %v929_v44 = vadd.f32 %v927_v19, %v923_v32  ;;  %s2925_s23 = sld [smem:[#allocation7 + $0x11]] }
  0xc1   : > { %v848_v43 = vunpack.c.l.bf16 %v2071_v4  ;;  %v949_v13 = vmul.f32 %v2529_v20, %v948_v36  ;;  %v950_v46 = vmul.f32 %v2543_v25, %v948_v36  ;;  %v951_v48 = vstv %s2860_s27  ;;  %s2930_s27 = sld [smem:[#allocation7 + $0x20e]] }
  0xc2   : > { %v955_v51 = vstv %s2862_s11  ;;  %v849_v57 = vunpack.c.h.bf16 %v2071_v4  ;;  %v934_v59 = vadd.f32 %v932_v34, %v928_v5  ;;  %v935_v63 = vadd.f32 %v933_v35, %v929_v44  ;;  %s2933_s11 = sld [smem:[#allocation7 + $0x191]] }
  0xc3   : > { %v852_v52 = vmul.f32 %v851_v29, %v848_v43  ;;  %v952_v1 = vadd.f32 %v951_v48, %v949_v13  ;;  %v953_v55 = vadd.f32 %v951_v48, %v950_v46  ;;  %v956_v47 = vmul.f32 %v2525_v18, %v955_v51 }
  0xc4   : > { %v957_v53 = vmul.f32 %v2536_v23, %v955_v51  ;;  %v825_v11 = vadd.f32 %v823_v27, %v795_v15  ;;  %v881_v14 = vstv %s2866_s29  ;;  %v936_v3 = vpack.c.bf16 %v935_v63, %v934_v59  ;;  %s2938_s29 = sld [smem:[#allocation7 + $0x20f]] }
  0xc5   : > { %v961_v28 = vstv %s2871_s24  ;;  %v2073_v6 = vpop.eup %2072  ;;  %v958_v16 = vadd.f32 %v956_v47, %v952_v1  ;;  %v853_v62 = vmul.f32 %v851_v29, %v849_v57  ;;  %v854_v12 = vadd.f32 %v852_v52, %v824_v38  ;;  %s2947_s24 = sld [smem:[#allocation7 + $0x12]] }
  0xc6   : > { %v959_v22 = vadd.f32 %v957_v53, %v953_v55  ;;  %v962_v61 = vmul.f32 %v2539_v24, %v961_v28  ;;  %v963_v40 = vmul.f32 %v2552_v30, %v961_v28  ;;  %v878_v26 = vunpack.c.l.bf16 %v2073_v6 }
  0xc7   : > { %v879_v15 = vunpack.c.h.bf16 %v2073_v6  ;;  %2076 = vtanh.bf16 %v936_v3  ;;  %v978_v32 = vstv %s2880_s5  ;;  %v981_v29 = vstv %s2884_s7  ;;  %s2949_s5 = sld [smem:[#allocation7 + $0x92]] }
  0xc8   : > { %v964_v19 = vadd.f32 %v962_v61, %v958_v16  ;;  %v965_v31 = vadd.f32 %v963_v40, %v959_v22  ;;  %v882_v33 = vmul.f32 %v881_v14, %v878_v26  ;;  %v979_v4 = vmul.f32 %v2529_v20, %v978_v32  ;;  %v2941_v26 = vld [vmem:[%s2424_s4 + $0x80] sm:$0xff]  ;;  %s2961_s7 = sld [smem:[#allocation7 + $0x192]] }
  0xc9   : > { %v980_v27 = vmul.f32 %v2543_v25, %v978_v32  ;;  %v911_v35 = vstv %s2882_s6  ;;  %v985_v43 = vstv %s2890_s8  ;;  %v991_v5 = vstv %s2892_s30  ;;  %s2951_s6 = sld [smem:[#allocation7 + $0x112]]  ;;  %s2963_s8 = sld [smem:[#allocation7 + $0x93]] }
  0xca   : > { %v2075_v34 = vpop.eup %2074  ;;  %v966_v36 = vpack.c.bf16 %v965_v31, %v964_v19  ;;  %v855_v38 = vadd.f32 %v853_v62, %v825_v11  ;;  %v883_v44 = vmul.f32 %v881_v14, %v879_v15  ;;  %v941_v46 = vstv %s2894_s10  ;;  %s2973_s30 = sld [smem:[#allocation7 + $0x13]] }
  0xcb   : > { %v908_v13 = vunpack.c.l.bf16 %v2075_v34  ;;  %v982_v48 = vadd.f32 %v981_v29, %v979_v4  ;;  %v983_v51 = vadd.f32 %v981_v29, %v980_v27  ;;  %v986_v57 = vmul.f32 %v2525_v18, %v985_v43  ;;  %s2984_s10 = sld [smem:[#allocation7 + $0x113]] }
  0xcc   : > { %2078 = vtanh.bf16 %v966_v36  ;;  %v884_v52 = vadd.f32 %v882_v33, %v854_v12  ;;  %v909_v59 = vunpack.c.h.bf16 %v2075_v34  ;;  %v987_v63 = vmul.f32 %v2536_v23, %v985_v43 }
  0xcd   : > { %v992_v1 = vmul.f32 %v2539_v24, %v991_v5  ;;  %v988_v55 = vadd.f32 %v986_v57, %v982_v48  ;;  %v993_v47 = vmul.f32 %v2552_v30, %v991_v5  ;;  %v1008_v53 = vstv %s2904_s9  ;;  %s2988_s9 = sld [smem:[#allocation7 + $0x211]] }
  0xce   : > { %v1011_v18 = vstv %s2902_s13  ;;  %v885_v11 = vadd.f32 %v883_v44, %v855_v38  ;;  %v912_v14 = vmul.f32 %v911_v35, %v908_v13  ;;  %v989_v3 = vadd.f32 %v987_v63, %v983_v51  ;;  %v2967_v63 = vld [vmem:[%s2424_s4 + $0x88] sm:$0xff]  ;;  %s2986_s13 = sld [smem:[#allocation7 + $0x210]] }
  0xcf   : > { %v1009_v28 = vmul.f32 %v2529_v20, %v1008_v53  ;;  %v994_v6 = vadd.f32 %v992_v1, %v988_v55  ;;  %v1010_v16 = vmul.f32 %v2543_v25, %v1008_v53  ;;  %v1015_v22 = vstv %s2907_s12  ;;  %s2994_s12 = sld [smem:[#allocation7 + $0x193]] }
  0xd0   : > { %v1021_v61 = vstv %s2909_s18  ;;  %v995_v40 = vadd.f32 %v993_v47, %v989_v3  ;;  %v1016_v15 = vmul.f32 %v2941_v26, %v1015_v22  ;;  %v1017_v12 = vmul.f32 %v2536_v23, %v1015_v22  ;;  %s2996_s18 = sld [smem:[#allocation7 + $0x94]] }
  0xd1   : > { %v1012_v62 = vadd.f32 %v1011_v18, %v1009_v28  ;;  %v913_v31 = vmul.f32 %v911_v35, %v909_v59  ;;  %v1013_v32 = vadd.f32 %v1011_v18, %v1010_v16  ;;  %v1022_v33 = vmul.f32 %v2539_v24, %v1021_v61  ;;  %v2981_v16 = vld [vmem:[%s2424_s4 + $0x98] sm:$0xff] }
  0xd2   : > { %v2077_v19 = vpop.eup %2076  ;;  %v1023_v4 = vmul.f32 %v2552_v30, %v1021_v61  ;;  %v914_v27 = vadd.f32 %v912_v14, %v884_v52  ;;  %v996_v34 = vpack.c.bf16 %v995_v40, %v994_v6  ;;  %v1038_v35 = vstv %s2919_s21  ;;  %v2977_v6 = vld [vmem:[%s2424_s4 + $0x90] sm:$0xff]  ;;  %s3005_s21 = sld [smem:[#allocation7 + $0x212]] }
  0xd3   : > { %v938_v29 = vunpack.c.l.bf16 %v2077_v19  ;;  %v1018_v36 = vadd.f32 %v1016_v15, %v1012_v62  ;;  %v939_v23 = vunpack.c.h.bf16 %v2077_v19  ;;  %v1019_v43 = vadd.f32 %v1017_v12, %v1013_v32 }
  0xd4   : > { %v1045_v5 = vstv %s2921_s28  ;;  %2080 = vtanh.bf16 %v996_v34  ;;  %v1041_v38 = vstv %s2925_s23  ;;  %v1039_v13 = vmul.f32 %v2529_v20, %v1038_v35  ;;  %s3010_s28 = sld [smem:[#allocation7 + $0x14]] }
  0xd5   : > { %v942_v24 = vmul.f32 %v941_v46, %v938_v29  ;;  %v1024_v30 = vadd.f32 %v1022_v33, %v1018_v36  ;;  %v1025_v44 = vadd.f32 %v1023_v4, %v1019_v43  ;;  %v1040_v48 = vmul.f32 %v2543_v25, %v1038_v35  ;;  %s3012_s23 = sld [smem:[#allocation7 + $0x114]] }
  0xd6   : > { %v1046_v51 = vmul.f32 %v2941_v26, %v1045_v5  ;;  %v915_v52 = vadd.f32 %v913_v31, %v885_v11  ;;  %v971_v59 = vstv %s2930_s27  ;;  %v1047_v1 = vmul.f32 %v2967_v63, %v1045_v5  ;;  %s3018_s27 = sld [smem:[#allocation7 + $0x194]] }
  0xd7   : > { %v2079_v57 = vpop.eup %2078  ;;  %v1051_v55 = vstv %s2933_s11  ;;  %v943_v47 = vmul.f32 %v941_v46, %v939_v23  ;;  %v1026_v18 = vpack.c.bf16 %v1025_v44, %v1024_v30  ;;  %v1042_v14 = vadd.f32 %v1041_v38, %v1039_v13  ;;  %s3020_s11 = sld [smem:[#allocation7 + $0x95]] }
  0xd8   : > { %v968_v53 = vunpack.c.l.bf16 %v2079_v57  ;;  %v1001_v3 = vstv %s2938_s29  ;;  %v1043_v28 = vadd.f32 %v1041_v38, %v1040_v48  ;;  %v1052_v11 = vmul.f32 %v2977_v6, %v1051_v55  ;;  %s3042_s29 = sld [smem:[#allocation7 + $0x195]] }
  0xd9   : > { %v1053_v22 = vmul.f32 %v2981_v16, %v1051_v55  ;;  %v944_v61 = vadd.f32 %v942_v24, %v914_v27  ;;  %v969_v46 = vunpack.c.h.bf16 %v2079_v57  ;;  %2082 = vtanh.bf16 %v1026_v18 }
  0xda   : > { %v1048_v40 = vadd.f32 %v1046_v51, %v1042_v14  ;;  %v1049_v62 = vadd.f32 %v1047_v1, %v1043_v28  ;;  %v1068_v15 = vstv %s2949_s5  ;;  %v1071_v12 = vstv %s2947_s24  ;;  %s3030_s24 = sld [smem:[#allocation7 + $0x15]]  ;;  %s3033_s5 = sld [smem:[#allocation7 + $0x213]] }
  0xdb   : > { %v1075_v19 = vstv %s2951_s6  ;;  %v945_v31 = vadd.f32 %v943_v47, %v915_v52  ;;  %v972_v32 = vmul.f32 %v971_v59, %v968_v53  ;;  %v1069_v4 = vmul.f32 %v2529_v20, %v1068_v15  ;;  %s3037_s6 = sld [smem:[#allocation7 + $0x115]] }
  0xdc   : > { %v1054_v33 = vadd.f32 %v1052_v11, %v1048_v40  ;;  %v1055_v27 = vadd.f32 %v1053_v22, %v1049_v62  ;;  %v1070_v29 = vmul.f32 %v2543_v25, %v1068_v15  ;;  %v1076_v34 = vmul.f32 %v2941_v26, %v1075_v19 }
  0xdd   : > { %v1077_v36 = vmul.f32 %v2967_v63, %v1075_v19  ;;  %v973_v23 = vmul.f32 %v971_v59, %v969_v46  ;;  %v1072_v43 = vadd.f32 %v1071_v12, %v1069_v4  ;;  %v1081_v35 = vstv %s2961_s7  ;;  %s3048_s7 = sld [smem:[#allocation7 + $0x96]] }
  0xde   : > { %v1098_v5 = vstv %s2963_s8  ;;  %v1056_v24 = vpack.c.bf16 %v1055_v27, %v1054_v33  ;;  %v1073_v30 = vadd.f32 %v1071_v12, %v1070_v29  ;;  %v1082_v38 = vmul.f32 %v2977_v6, %v1081_v35  ;;  %s3052_s8 = sld [smem:[#allocation7 + $0x16]] }
  0xdf   : > { %v1083_v44 = vmul.f32 %v2981_v16, %v1081_v35  ;;  %v2081_v13 = vpop.eup %2080  ;;  %v1078_v48 = vadd.f32 %v1076_v34, %v1072_v43  ;;  %v1099_v51 = vmul.f32 %v2529_v20, %v1098_v5  ;;  %v1100_v57 = vmul.f32 %v2543_v25, %v1098_v5 }
  0xe0   : > { %v1101_v52 = vstv %s2973_s30  ;;  %v998_v59 = vunpack.c.l.bf16 %v2081_v13  ;;  %v999_v1 = vunpack.c.h.bf16 %v2081_v13  ;;  %2084 = vtanh.bf16 %v1056_v24  ;;  %s3055_s30 = sld [smem:[#allocation7 + $0x116]] }
  0xe1   : > { %v1079_v55 = vadd.f32 %v1077_v36, %v1073_v30  ;;  %v1084_v47 = vadd.f32 %v1082_v38, %v1078_v48  ;;  %v1102_v53 = vadd.f32 %v1101_v52, %v1099_v51  ;;  %v1103_v18 = vadd.f32 %v1101_v52, %v1100_v57 }
  0xe2   : > { %v1105_v14 = vstv %s2984_s10  ;;  %v1031_v28 = vstv %s2986_s13  ;;  %v1061_v11 = vstv %s2988_s9  ;;  %v974_v40 = vadd.f32 %v972_v32, %v944_v61  ;;  %s3061_s10 = sld [smem:[#allocation7 + $0x196]]  ;;  %s3069_s13 = sld [smem:[#allocation7 + $0x17]] }
  0xe3   : > { %v1085_v22 = vadd.f32 %v1083_v44, %v1079_v55  ;;  %v1106_v46 = vmul.f32 %v2941_v26, %v1105_v14  ;;  %v1107_v62 = vmul.f32 %v2967_v63, %v1105_v14  ;;  %v1111_v15 = vstv %s2994_s12  ;;  %s3071_s12 = sld [smem:[#allocation7 + $0x97]]  ;;  %s3086_s9 = sld [smem:[#allocation7 + $0x215]] }
  0xe4   : > { %v1128_v12 = vstv %s2996_s18  ;;  %v2083_v19 = vpop.eup %2082  ;;  %v975_v33 = vadd.f32 %v973_v23, %v945_v31  ;;  %v1002_v4 = vmul.f32 %v1001_v3, %v998_v59  ;;  %v1003_v34 = vmul.f32 %v1001_v3, %v999_v1  ;;  %s3075_s18 = sld [smem:[#allocation7 + $0x214]] }
  0xe5   : > { %v1086_v27 = vpack.c.bf16 %v1085_v22, %v1084_v47  ;;  %v1108_v29 = vadd.f32 %v1106_v46, %v1102_v53  ;;  %v1028_v36 = vunpack.c.l.bf16 %v2083_v19  ;;  %v1109_v43 = vadd.f32 %v1107_v62, %v1103_v18 }
  0xe6   : > { %v1112_v35 = vmul.f32 %v2977_v6, %v1111_v15  ;;  %v1113_v61 = vmul.f32 %v2981_v16, %v1111_v15  ;;  %v1129_v31 = vmul.f32 %v2529_v20, %v1128_v12  ;;  %v1130_v32 = vmul.f32 %v2543_v25, %v1128_v12 }
  0xe7   : > { %2086 = vtanh.bf16 %v1086_v27  ;;  %v1029_v3 = vunpack.c.h.bf16 %v2083_v19  ;;  %v1091_v23 = vstv %s3005_s21  ;;  %v1131_v24 = vstv %s3010_s28  ;;  %s3082_s28 = sld [smem:[#allocation7 + $0x117]]  ;;  %s3109_s21 = sld [smem:[#allocation7 + $0x198]] }
  0xe8   : > { %v1114_v5 = vadd.f32 %v1112_v35, %v1108_v29  ;;  %v1115_v30 = vadd.f32 %v1113_v61, %v1109_v43  ;;  %v1132_v38 = vadd.f32 %v1131_v24, %v1129_v31  ;;  %v1133_v44 = vadd.f32 %v1131_v24, %v1130_v32 }
  0xe9   : > { %v1135_v13 = vstv %s3012_s23  ;;  %v1004_v48 = vadd.f32 %v1002_v4, %v974_v40  ;;  %v1005_v51 = vadd.f32 %v1003_v34, %v975_v33  ;;  %v1032_v59 = vmul.f32 %v1031_v28, %v1028_v36  ;;  %s3084_s23 = sld [smem:[#allocation7 + $0x197]] }
  0xea   : > { %v1136_v57 = vmul.f32 %v2941_v26, %v1135_v13  ;;  %v1137_v52 = vmul.f32 %v2967_v63, %v1135_v13  ;;  %v1116_v1 = vpack.c.bf16 %v1115_v30, %v1114_v5  ;;  %v1141_v55 = vstv %s3018_s27  ;;  %s3094_s27 = sld [smem:[#allocation7 + $0x98]] }
  0xeb   : > { %v1158_v47 = vstv %s3020_s11  ;;  %v2085_v53 = vpop.eup %2084  ;;  %v1142_v22 = vmul.f32 %v2977_v6, %v1141_v55  ;;  %v1143_v46 = vmul.f32 %v2981_v16, %v1141_v55  ;;  %v1033_v40 = vmul.f32 %v1031_v28, %v1029_v3  ;;  %s3100_s11 = sld [smem:[#allocation7 + $0x18]] }
  0xec   : > { %v1138_v18 = vadd.f32 %v1136_v57, %v1132_v38  ;;  %v1139_v14 = vadd.f32 %v1137_v52, %v1133_v44  ;;  %v1058_v62 = vunpack.c.l.bf16 %v2085_v53  ;;  %2088 = vtanh.bf16 %v1116_v1 }
  0xed   : > { %v1159_v15 = vmul.f32 %v2529_v20, %v1158_v47  ;;  %v1160_v33 = vmul.f32 %v2543_v25, %v1158_v47  ;;  %v1161_v4 = vstv %s3030_s24  ;;  %v1059_v27 = vunpack.c.h.bf16 %v2085_v53  ;;  %s3102_s24 = sld [smem:[#allocation7 + $0x118]] }
  0xee   : > { %v1144_v12 = vadd.f32 %v1142_v22, %v1138_v18  ;;  %v1145_v19 = vadd.f32 %v1143_v46, %v1139_v14  ;;  %v1121_v29 = vstv %s3033_s5  ;;  %v1165_v36 = vstv %s3037_s6  ;;  %s3115_s6 = sld [smem:[#allocation7 + $0x19]] }
  0xef   : > { %v1162_v34 = vadd.f32 %v1161_v4, %v1159_v15  ;;  %v1163_v43 = vadd.f32 %v1161_v4, %v1160_v33  ;;  %v1166_v35 = vmul.f32 %v2941_v26, %v1165_v36  ;;  %v1167_v61 = vmul.f32 %v2967_v63, %v1165_v36  ;;  %s3128_s5 = sld [smem:[#allocation7 + $0x119]] }
  0xf0   : > { %v1146_v28 = vpack.c.bf16 %v1145_v19, %v1144_v12  ;;  %v1034_v31 = vadd.f32 %v1032_v59, %v1004_v48  ;;  %v1035_v32 = vadd.f32 %v1033_v40, %v1005_v51  ;;  %v1062_v3 = vmul.f32 %v1061_v11, %v1058_v62 }
  0xf1   : > { %v1171_v5 = vstv %s3042_s29  ;;  %v1168_v30 = vadd.f32 %v1166_v35, %v1162_v34  ;;  %v1169_v38 = vadd.f32 %v1167_v61, %v1163_v43  ;;  %v1063_v13 = vmul.f32 %v1061_v11, %v1059_v27  ;;  %s3117_s29 = sld [smem:[#allocation7 + $0x99]] }
  0xf2   : > { %v2087_v24 = vpop.eup %2086  ;;  %2090 = vtanh.bf16 %v1146_v28  ;;  %v1172_v44 = vmul.f32 %v2977_v6, %v1171_v5  ;;  %v1173_v48 = vmul.f32 %v2981_v16, %v1171_v5  ;;  %v1188_v51 = vstv %s3048_s7  ;;  %s3133_s7 = sld [smem:[#allocation7 + $0x216]] }
  0xf3   : > { %v1088_v57 = vunpack.c.l.bf16 %v2087_v24  ;;  %v1189_v59 = vmul.f32 %v2529_v20, %v1188_v51  ;;  %v1190_v1 = vmul.f32 %v2543_v25, %v1188_v51  ;;  %v1191_v55 = vstv %s3052_s8  ;;  %s3137_s8 = sld [smem:[#allocation7 + $0x199]] }
  0xf4   : > { %v1174_v52 = vadd.f32 %v1172_v44, %v1168_v30  ;;  %v1064_v47 = vadd.f32 %v1062_v3, %v1034_v31  ;;  %v1089_v11 = vunpack.c.h.bf16 %v2087_v24  ;;  %v1175_v53 = vadd.f32 %v1173_v48, %v1169_v38 }
  0xf5   : > { %v1195_v18 = vstv %s3055_s30  ;;  %v1192_v14 = vadd.f32 %v1191_v55, %v1189_v59  ;;  %v1193_v22 = vadd.f32 %v1191_v55, %v1190_v1  ;;  %v1065_v62 = vadd.f32 %v1063_v13, %v1035_v32  ;;  %s3139_s30 = sld [smem:[#allocation7 + $0x9a]] }
  0xf6   : > { %v1196_v46 = vmul.f32 %v2941_v26, %v1195_v18  ;;  %v1197_v40 = vmul.f32 %v2967_v63, %v1195_v18  ;;  %v1092_v15 = vmul.f32 %v1091_v23, %v1088_v57  ;;  %v1176_v12 = vpack.c.bf16 %v1175_v53, %v1174_v52 }
  0xf7   : > { %v1201_v19 = vstv %s3061_s10  ;;  %v2089_v33 = vpop.eup %2088  ;;  %v1093_v28 = vmul.f32 %v1091_v23, %v1089_v11  ;;  %v1218_v32 = vstv %s3071_s12  ;;  %v1221_v3 = vstv %s3069_s13  ;;  %s3147_s10 = sld [smem:[#allocation7 + $0x1a]] }
  0xf8   : > { %v1198_v4 = vadd.f32 %v1196_v46, %v1192_v14  ;;  %v1199_v27 = vadd.f32 %v1197_v40, %v1193_v22  ;;  %v1202_v34 = vmul.f32 %v2977_v6, %v1201_v19  ;;  %v1203_v36 = vmul.f32 %v2981_v16, %v1201_v19  ;;  %s3149_s13 = sld [smem:[#allocation7 + $0x11a]] }
  0xf9   : > { %v1118_v43 = vunpack.c.l.bf16 %v2089_v33  ;;  %v1119_v35 = vunpack.c.h.bf16 %v2089_v33  ;;  %2092 = vtanh.bf16 %v1176_v12  ;;  %v1094_v5 = vadd.f32 %v1092_v15, %v1064_v47  ;;  %s3155_s12 = sld [smem:[#allocation7 + $0x19a]] }
  0xfa   : > { %v1204_v61 = vadd.f32 %v1202_v34, %v1198_v4  ;;  %v1205_v31 = vadd.f32 %v1203_v36, %v1199_v27  ;;  %v1151_v24 = vstv %s3075_s18  ;;  %v1219_v30 = vmul.f32 %v2529_v20, %v1218_v32  ;;  %s3168_s18 = sld [smem:[#allocation7 + $0x9b]] }
  0xfb   : > { %v1220_v23 = vmul.f32 %v2543_v25, %v1218_v32  ;;  %v1122_v38 = vmul.f32 %v1121_v29, %v1118_v43  ;;  %v1225_v13 = vstv %s3082_s28  ;;  %v1231_v57 = vstv %s3084_s23  ;;  %s3176_s28 = sld [smem:[#allocation7 + $0x1b]]  ;;  %s3178_s23 = sld [smem:[#allocation7 + $0x217]] }
  0xfc   : > { %v1206_v44 = vpack.c.bf16 %v1205_v31, %v1204_v61  ;;  %v1095_v51 = vadd.f32 %v1093_v28, %v1065_v62  ;;  %v1181_v52 = vstv %s3086_s9  ;;  %v1222_v59 = vadd.f32 %v1221_v3, %v1219_v30  ;;  %s3184_s9 = sld [smem:[#allocation7 + $0x11b]] }
  0xfd   : > { %v2091_v48 = vpop.eup %2090  ;;  %v1223_v1 = vadd.f32 %v1221_v3, %v1220_v23  ;;  %v1123_v55 = vmul.f32 %v1121_v29, %v1119_v35  ;;  %v1226_v11 = vmul.f32 %v2941_v26, %v1225_v13  ;;  %v1227_v53 = vmul.f32 %v2967_v63, %v1225_v13 }
  0xfe   : > { %v1148_v47 = vunpack.c.l.bf16 %v2091_v48  ;;  %2094 = vtanh.bf16 %v1206_v44  ;;  %v1232_v18 = vmul.f32 %v2977_v6, %v1231_v57  ;;  %v1233_v14 = vmul.f32 %v2981_v16, %v1231_v57 }
  0xff   : > { %v1248_v22 = vstv %s3094_s27  ;;  %v1124_v46 = vadd.f32 %v1122_v38, %v1094_v5  ;;  %v1149_v40 = vunpack.c.h.bf16 %v2091_v48  ;;  %v1228_v62 = vadd.f32 %v1226_v11, %v1222_v59  ;;  %s3186_s27 = sld [smem:[#allocation7 + $0x19b]] }
 0x100   : > { %v1249_v15 = vmul.f32 %v2529_v20, %v1248_v22  ;;  %v1229_v29 = vadd.f32 %v1227_v53, %v1223_v1  ;;  %v1250_v12 = vmul.f32 %v2543_v25, %v1248_v22  ;;  %v1251_v19 = vstv %s3100_s11  ;;  %s3190_s11 = sld [smem:[#allocation7 + $0x218]] }
 0x101   : > { %v1255_v33 = vstv %s3102_s24  ;;  %v1125_v4 = vadd.f32 %v1123_v55, %v1095_v51  ;;  %v1152_v27 = vmul.f32 %v1151_v24, %v1148_v47  ;;  %v1234_v34 = vadd.f32 %v1232_v18, %v1228_v62  ;;  %s3195_s24 = sld [smem:[#allocation7 + $0x1c]] }
 0x102   : > { %v1252_v36 = vadd.f32 %v1251_v19, %v1249_v15  ;;  %v1235_v28 = vadd.f32 %v1233_v14, %v1229_v29  ;;  %v1253_v43 = vadd.f32 %v1251_v19, %v1250_v12  ;;  %v1256_v35 = vmul.f32 %v2941_v26, %v1255_v33 }
 0x103   : > { %v1257_v61 = vmul.f32 %v2967_v63, %v1255_v33  ;;  %v1153_v32 = vmul.f32 %v1151_v24, %v1149_v40  ;;  %v1261_v3 = vstv %s3109_s21  ;;  %v1278_v5 = vstv %s3117_s29  ;;  %s3200_s21 = sld [smem:[#allocation7 + $0x9c]] }
 0x104   : > { %v2093_v31 = vpop.eup %2092  ;;  %v1281_v30 = vstv %s3115_s6  ;;  %v1236_v44 = vpack.c.bf16 %v1235_v28, %v1234_v34  ;;  %v1258_v13 = vadd.f32 %v1256_v35, %v1252_v36  ;;  %v1262_v48 = vmul.f32 %v2977_v6, %v1261_v3  ;;  %s3202_s6 = sld [smem:[#allocation7 + $0x11c]] }
 0x105   : > { %v1178_v23 = vunpack.c.l.bf16 %v2093_v31  ;;  %v1179_v38 = vunpack.c.h.bf16 %v2093_v31  ;;  %v1259_v57 = vadd.f32 %v1257_v61, %v1253_v43  ;;  %v1263_v51 = vmul.f32 %v2981_v16, %v1261_v3  ;;  %s3207_s29 = sld [smem:[#allocation7 + $0x19c]] }
 0x106   : > { %v1279_v59 = vmul.f32 %v2529_v20, %v1278_v5  ;;  %v1154_v24 = vadd.f32 %v1152_v27, %v1124_v46  ;;  %2096 = vtanh.bf16 %v1236_v44  ;;  %v1280_v55 = vmul.f32 %v2543_v25, %v1278_v5  ;;  %v3163_v46 = vld [vmem:[%s2424_s4 + $0x60] sm:$0xff] }
 0x107   : > { %v1182_v1 = vmul.f32 %v1181_v52, %v1178_v23  ;;  %v1264_v47 = vadd.f32 %v1262_v48, %v1258_v13  ;;  %v1265_v11 = vadd.f32 %v1263_v51, %v1259_v57  ;;  %v1285_v18 = vstv %s3128_s5  ;;  %s3215_s5 = sld [smem:[#allocation7 + $0x9d]] }
 0x108   : > { %v1282_v53 = vadd.f32 %v1281_v30, %v1279_v59  ;;  %v3160_v22 = vand.u32 2147483647, %v417_v10  ;;  %v451_v40 = vsub.f32 %v3163_v46, %v2740_v0  ;;  %v1283_v62 = vadd.f32 %v1281_v30, %v1280_v55 }
 0x109   : > { %v2095_v14 = vpop.eup %2094  ;;  %v1286_v15 = vmul.f32 %v2941_v26, %v1285_v18  ;;  %v1155_v29 = vadd.f32 %v1153_v32, %v1125_v4  ;;  %v1183_v12 = vmul.f32 %v1181_v52, %v1179_v38  ;;  %v1266_v19 = vpack.c.bf16 %v1265_v11, %v1264_v47 }
 0x10a   : > { %v1287_v33 = vmul.f32 %v2967_v63, %v1285_v18  ;;  %v1211_v27 = vstv %s3133_s7  ;;  %v1291_v10 = vstv %s3137_s8  ;;  %v1308_v34 = vstv %s3139_s30  ;;  %s3219_s7 = sld [smem:[#allocation7 + $0x1d]] }
 0x10b   : > { %v1288_v50 = vadd.f32 %v1286_v15, %v1282_v53  ;;  %v1184_v36 = vadd.f32 %v1182_v1, %v1154_v24  ;;  %v1208_v28 = vunpack.c.l.bf16 %v2095_v14  ;;  %2098 = vtanh.bf16 %v1266_v19  ;;  %s3221_s8 = sld [smem:[#allocation7 + $0x11d]] }
 0x10c   : > { %v1289_v43 = vadd.f32 %v1287_v33, %v1283_v62  ;;  %v1292_v4 = vmul.f32 %v2977_v6, %v1291_v10  ;;  %v1293_v52 = vmul.f32 %v2981_v16, %v1291_v10  ;;  %v1309_v35 = vmul.f32 %v2529_v20, %v1308_v34  ;;  %s3227_s30 = sld [smem:[#allocation7 + $0x19d]] }
 0x10d   : > { %v1310_v61 = vmul.f32 %v2543_v25, %v1308_v34  ;;  %v1185_v31 = vadd.f32 %v1183_v12, %v1155_v29  ;;  %v1209_v32 = vunpack.c.h.bf16 %v2095_v14  ;;  %v1311_v3 = vstv %s3147_s10  ;;  %s3229_s10 = sld [smem:[#allocation7 + $0x219]] }
 0x10e   : > { %v1315_v5 = vstv %s3149_s13  ;;  %v1294_v30 = vadd.f32 %v1292_v4, %v1288_v50  ;;  %v1295_v23 = vadd.f32 %v1293_v52, %v1289_v43  ;;  %v1312_v38 = vadd.f32 %v1311_v3, %v1309_v35  ;;  %s3239_s13 = sld [smem:[#allocation7 + $0x9e]] }
 0x10f   : > { %v1313_v44 = vadd.f32 %v1311_v3, %v1310_v61  ;;  %v1212_v13 = vmul.f32 %v1211_v27, %v1208_v28  ;;  %v1316_v57 = vmul.f32 %v2941_v26, %v1315_v5  ;;  %v1317_v48 = vmul.f32 %v2967_v63, %v1315_v5 }
 0x110   : > { %v1321_v51 = vstv %s3155_s12  ;;  %v1296_v59 = vpack.c.bf16 %v1295_v23, %v1294_v30  ;;  %v1338_v55 = vstv %s3168_s18  ;;  %v1213_v62 = vmul.f32 %v1211_v27, %v1209_v32  ;;  %s3243_s12 = sld [smem:[#allocation7 + $0x1e]] }
 0x111   : > { %v1322_v24 = vmul.f32 %v2977_v6, %v1321_v51  ;;  %v1323_v1 = vmul.f32 %v2981_v16, %v1321_v51  ;;  %v2097_v47 = vpop.eup %2096  ;;  %v1318_v11 = vadd.f32 %v1316_v57, %v1312_v38  ;;  %v1319_v53 = vadd.f32 %v1317_v48, %v1313_v44  ;;  %s3245_s18 = sld [smem:[#allocation7 + $0x11e]] }
 0x112   : > { %v1339_v18 = vmul.f32 %v2529_v20, %v1338_v55  ;;  %v1340_v14 = vmul.f32 %v2543_v25, %v1338_v55  ;;  %v1238_v15 = vunpack.c.l.bf16 %v2097_v47  ;;  %2100 = vtanh.bf16 %v1296_v59 }
 0x113   : > { %v1341_v29 = vstv %s3176_s28  ;;  %v1239_v12 = vunpack.c.h.bf16 %v2097_v47  ;;  %v1324_v19 = vadd.f32 %v1322_v24, %v1318_v11  ;;  %v1325_v33 = vadd.f32 %v1323_v1, %v1319_v53  ;;  %s3251_s28 = sld [smem:[#allocation7 + $0x19e]] }
 0x114   : > { %v1342_v50 = vadd.f32 %v1341_v29, %v1339_v18  ;;  %v1241_v10 = vstv %s3178_s23  ;;  %v1343_v34 = vadd.f32 %v1341_v29, %v1340_v14  ;;  %v1345_v28 = vstv %s3184_s9  ;;  %s3253_s23 = sld [smem:[#allocation7 + $0x21a]]  ;;  %s3264_s9 = sld [smem:[#allocation7 + $0x9f]] }
 0x115   : > { %v1351_v43 = vstv %s3186_s27  ;;  %v1326_v4 = vpack.c.bf16 %v1325_v33, %v1324_v19  ;;  %v1346_v52 = vmul.f32 %v2941_v26, %v1345_v28  ;;  %v1347_v27 = vmul.f32 %v2967_v63, %v1345_v28  ;;  %s3267_s27 = sld [smem:[#allocation7 + $0x1f]] }
 0x116   : > { %v1352_v35 = vmul.f32 %v2977_v6, %v1351_v43  ;;  %v2099_v61 = vpop.eup %2098  ;;  %v1214_v32 = vadd.f32 %v1212_v13, %v1184_v36  ;;  %v1215_v3 = vadd.f32 %v1213_v62, %v1185_v31  ;;  %v1271_v5 = vstv %s3190_s11  ;;  %s3269_s11 = sld [smem:[#allocation7 + $0x11f]] }
 0x117   : > { %v1353_v30 = vmul.f32 %v2981_v16, %v1351_v43  ;;  %v1242_v23 = vmul.f32 %v1241_v10, %v1238_v15  ;;  %v1243_v38 = vmul.f32 %v1241_v10, %v1239_v12  ;;  %v1268_v44 = vunpack.c.l.bf16 %v2099_v61 }
 0x118   : > { %v1348_v57 = vadd.f32 %v1346_v52, %v1342_v50  ;;  %v1349_v48 = vadd.f32 %v1347_v27, %v1343_v34  ;;  %v1368_v51 = vstv %s3200_s21  ;;  %v1371_v59 = vstv %s3195_s24  ;;  %s3274_s24 = sld [smem:[#allocation7 + $0x19f]]  ;;  %s3279_s21 = sld [smem:[#allocation7 + $0x21b]] }
 0x119   : > { %v1375_v24 = vstv %s3202_s6  ;;  %v1269_v1 = vunpack.c.h.bf16 %v2099_v61  ;;  %2102 = vtanh.bf16 %v1326_v4  ;;  %v1369_v31 = vmul.f32 %v2529_v20, %v1368_v51  ;;  %s3287_s6 = sld [smem:[#allocation7 + $0x21c]] }
 0x11a   : > { %v1354_v36 = vadd.f32 %v1352_v35, %v1348_v57  ;;  %v1355_v13 = vadd.f32 %v1353_v30, %v1349_v48  ;;  %v1370_v55 = vmul.f32 %v2543_v25, %v1368_v51  ;;  %v1376_v47 = vmul.f32 %v2941_v26, %v1375_v24 }
 0x11b   : > { %v1377_v11 = vmul.f32 %v2967_v63, %v1375_v24  ;;  %v452_v53 = vsub.f32 %v2842_v37, %v2742_v9  ;;  %v1244_v18 = vadd.f32 %v1242_v23, %v1214_v32  ;;  %v1372_v14 = vadd.f32 %v1371_v59, %v1369_v31 }
 0x11c   : > { %v1381_v62 = vstv %s3207_s29  ;;  %v1356_v15 = vpack.c.bf16 %v1355_v13, %v1354_v36  ;;  %v1373_v29 = vadd.f32 %v1371_v59, %v1370_v55  ;;  %v1245_v50 = vadd.f32 %v1243_v38, %v1215_v3  ;;  %s3304_s29 = sld [smem:[#allocation7 + $0x21d]] }
 0x11d   : > { %v1382_v12 = vmul.f32 %v2977_v6, %v1381_v62  ;;  %v1383_v19 = vmul.f32 %v2981_v16, %v1381_v62  ;;  %v2101_v33 = vpop.eup %2100  ;;  %v1272_v10 = vmul.f32 %v1271_v5, %v1268_v44  ;;  %v1378_v34 = vadd.f32 %v1376_v47, %v1372_v14 }
 0x11e   : > { %v1398_v28 = vstv %s3215_s5  ;;  %v1273_v43 = vmul.f32 %v1271_v5, %v1269_v1  ;;  %v1298_v4 = vunpack.c.l.bf16 %v2101_v33  ;;  %v1379_v52 = vadd.f32 %v1377_v11, %v1373_v29  ;;  %s3312_s5 = sld [smem:[#allocation7 + $0x21e]] }
 0x11f   : > { %v1401_v27 = vstv %s3219_s7  ;;  %v1384_v35 = vadd.f32 %v1382_v12, %v1378_v34  ;;  %v1399_v61 = vmul.f32 %v2529_v20, %v1398_v28  ;;  %v1400_v32 = vmul.f32 %v2543_v25, %v1398_v28  ;;  %s3320_s7 = sld [smem:[#allocation7 + $0x21f]] }
 0x120   : > { %v1405_v30 = vstv %s3221_s8  ;;  %v1299_v3 = vunpack.c.h.bf16 %v2101_v33  ;;  %2104 = vtanh.bf16 %v1356_v15  ;;  %v1385_v23 = vadd.f32 %v1383_v19, %v1379_v52  ;;  %s1958_s8 = sshll.u32 %s2334_s2, 7  ;;  %s2289_s2 = smov [#allocation8]  }
 0x121   : > { %v1406_v5 = vmul.f32 %v2941_v26, %v1405_v30  ;;  %v1402_v38 = vadd.f32 %v1401_v27, %v1399_v61  ;;  %v1403_v44 = vadd.f32 %v1401_v27, %v1400_v32  ;;  %v1407_v57 = vmul.f32 %v2967_v63, %v1405_v30 }
 0x122   : > { %v1411_v48 = vstv %s3227_s30  ;;  %v3260_v51 = vand.u32 2147483647, %v418_v7  ;;  %v1301_v59 = vstv %s3229_s10  ;;  %v1386_v24 = vpack.c.bf16 %v1385_v23, %v1384_v35 }
 0x123   : > { %v1412_v1 = vmul.f32 %v2977_v6, %v1411_v48  ;;  %v421_v36 = vsub.f32 0.0, %v3160_v22  ;;  %v1274_v31 = vadd.f32 %v1272_v10, %v1244_v18  ;;  %v1408_v13 = vadd.f32 %v1406_v5, %v1402_v38 }
 0x124   : > { %v1409_v55 = vadd.f32 %v1407_v57, %v1403_v44  ;;  %v2103_v47 = vpop.eup %2102  ;;  %v1275_v7 = vadd.f32 %v1273_v43, %v1245_v50  ;;  %2106 = vtanh.bf16 %v1386_v24  ;;  %v1413_v11 = vmul.f32 %v2981_v16, %v1411_v48 }
 0x125   : > { %v1428_v14 = vstv %s3239_s13  ;;  %v1302_v62 = vmul.f32 %v1301_v59, %v1298_v4  ;;  %v1303_v15 = vmul.f32 %v1301_v59, %v1299_v3  ;;  %v1414_v29 = vadd.f32 %v1412_v1, %v1408_v13 }
 0x126   : > { %v1429_v18 = vmul.f32 %v2529_v20, %v1428_v14  ;;  %v1415_v12 = vadd.f32 %v1413_v11, %v1409_v55  ;;  %v1430_v19 = vmul.f32 %v2543_v25, %v1428_v14  ;;  %v1431_v33 = vstv %s3243_s12 }
 0x127   : > { %v1435_v10 = vstv %s3245_s18  ;;  %v1328_v34 = vunpack.c.l.bf16 %v2103_v47  ;;  %v1329_v50 = vunpack.c.h.bf16 %v2103_v47  ;;  %v1441_v35 = vstv %s3251_s28  ;;  %s3599_s18 = scalar_lea.hbm %s3646_s3, %s1958_s8  ;;  %s1668_s28 = scalar_lea.sflag [#allocation5], %s2420_s20 }
 0x128   : > { %v1432_v28 = vadd.f32 %v1431_v33, %v1429_v18  ;;  %v1436_v43 = vmul.f32 %v2941_v26, %v1435_v10  ;;  %v1416_v4 = vpack.c.bf16 %v1415_v12, %v1414_v29  ;;  %v1433_v52 = vadd.f32 %v1431_v33, %v1430_v19 }
 0x129   : > { %v1437_v27 = vmul.f32 %v2967_v63, %v1435_v10  ;;  %v1331_v61 = vstv %s3253_s23  ;;  %v1442_v30 = vmul.f32 %v2977_v6, %v1441_v35  ;;  %v1443_v3 = vmul.f32 %v2981_v16, %v1441_v35 }
 0x12a   : > { %v1438_v32 = vadd.f32 %v1436_v43, %v1432_v28  ;;  %v1304_v23 = vadd.f32 %v1302_v62, %v1274_v31  ;;  %v1305_v5 = vadd.f32 %v1303_v15, %v1275_v7  ;;  %2108 = vtanh.bf16 %v1416_v4 }
 0x12b   : > { %v1439_v38 = vadd.f32 %v1437_v27, %v1433_v52  ;;  %v2105_v44 = vpop.eup %2104  ;;  %v1458_v48 = vstv %s3264_s9  ;;  %v1461_v59 = vstv %s3267_s27  ;;  %v1465_v24 = vstv %s3269_s11  ;;  %s2213_s9 = sshll.u32 %s2289_s2, 4  ;;  %s2214_s9 = int_to_ptr.vmem [resolvable:$false] %s2213_s9 }
 0x12c   : > { %v1444_v57 = vadd.f32 %v1442_v30, %v1438_v32  ;;  %v1332_v1 = vmul.f32 %v1331_v61, %v1328_v34  ;;  %v1333_v13 = vmul.f32 %v1331_v61, %v1329_v50  ;;  %v1459_v47 = vmul.f32 %v2529_v20, %v1458_v48  ;;  %s2215_s27 = scalar_lea.vmem %s2214_s9, 256 }
 0x12d   : > { %v1445_v55 = vadd.f32 %v1443_v3, %v1439_v38  ;;  %v1460_v11 = vmul.f32 %v2543_v25, %v1458_v48  ;;  %v1466_v31 = vmul.f32 %v2941_v26, %v1465_v24  ;;  %v1467_v7 = vmul.f32 %v2967_v63, %v1465_v24 }
 0x12e   : > { %v1471_v14 = vstv %s3274_s24  ;;  %v1358_v62 = vunpack.c.l.bf16 %v2105_v44  ;;  %v1359_v15 = vunpack.c.h.bf16 %v2105_v44  ;;  %v1462_v18 = vadd.f32 %v1461_v59, %v1459_v47 }
 0x12f   : > { %v1446_v29 = vpack.c.bf16 %v1445_v55, %v1444_v57  ;;  %v2107_v12 = vpop.eup %2106  ;;  %v1361_v19 = vstv %s3279_s21  ;;  %v1463_v33 = vadd.f32 %v1461_v59, %v1460_v11  ;;  %v1472_v10 = vmul.f32 %v2977_v6, %v1471_v14 }
 0x130   : > { %v1473_v34 = vmul.f32 %v2981_v16, %v1471_v14  ;;  %v422_v20 = vsub.f32 0.0, %v3260_v51  ;;  %v453_v25 = vand.u32 2147483647, %v451_v40  ;;  %v1468_v26 = vadd.f32 %v1466_v31, %v1462_v18 }
 0x131   : > { %2110 = vtanh.bf16 %v1446_v29  ;;  %v454_v63 = vand.u32 2147483647, %v452_v53  ;;  %v1334_v50 = vadd.f32 %v1332_v1, %v1304_v23  ;;  %v1335_v28 = vadd.f32 %v1333_v13, %v1305_v5 }
 0x132   : > { %v1469_v6 = vadd.f32 %v1467_v7, %v1463_v33  ;;  %v1362_v43 = vmul.f32 %v1361_v19, %v1358_v62  ;;  %v1363_v4 = vmul.f32 %v1361_v19, %v1359_v15  ;;  %v1388_v16 = vunpack.c.l.bf16 %v2107_v12 }
 0x133   : > { %v1474_v52 = vadd.f32 %v1472_v10, %v1468_v26  ;;  %v1389_v51 = vunpack.c.h.bf16 %v2107_v12  ;;  %v1391_v27 = vstv %s3287_s6  ;;  %v385_v40 = vmul.f32 1.442695, %v382_v2 }
 0x134   : > { %v1475_v35 = vadd.f32 %v1473_v34, %v1469_v6  ;;  %v455_v61 = vsub.f32 0.0, %v453_v25  ;;  %2112 = vpow2.f32 %v2727_v60  ;;  %v423_v37 = vmul.f32 1.442695, %v421_v36 }
 0x135   : > { %v2109_v32 = vpop.eup %2108  ;;  %v456_v53 = vsub.f32 0.0, %v454_v63  ;;  %v425_v3 = vmul.f32 1.442695, %v422_v20  ;;  %v1364_v23 = vadd.f32 %v1362_v43, %v1334_v50  ;;  %v1365_v5 = vadd.f32 %v1363_v4, %v1335_v28 }
 0x136   : > { %v1476_v30 = vpack.c.bf16 %v1475_v35, %v1474_v52  ;;  %v1392_v38 = vmul.f32 %v1391_v27, %v1388_v16  ;;  %v1393_v44 = vmul.f32 %v1391_v27, %v1389_v51  ;;  %v1418_v57 = vunpack.c.l.bf16 %v2109_v32 }
 0x137   : > { %v1419_v49 = vunpack.c.h.bf16 %v2109_v32  ;;  %v457_v2 = vmul.f32 1.442695, %v455_v61  ;;  %v1421_v48 = vstv %s3304_s29  ;;  %v459_v59 = vmul.f32 1.442695, %v456_v53 }
 0x138   : > { %2114 = vtanh.bf16 %v1476_v30  ;;  %v351_v60 = vmin.f32 %v2710_v42, 0.9999999  ;;  %v352_v22 = vmin.f32 %v2769_v41, 0.9999999  ;;  %v1394_v24 = vadd.f32 %v1392_v38, %v1364_v23 }
 0x139   : > { %2116 = vpow2.f32 %v385_v40  ;;  %v1395_v1 = vadd.f32 %v1393_v44, %v1365_v5  ;;  %v1422_v13 = vmul.f32 %v1421_v48, %v1418_v57  ;;  %v1423_v55 = vmul.f32 %v1421_v48, %v1419_v49 }
 0x13a   : > { %2118 = vpow2.f32 %v423_v37  ;;  %v1451_v31 = vstv %s3312_s5  ;;  %v3323_v7 = vsub.f32 0.0, %v351_v60  ;;  %v3327_v29 = vsub.f32 0.0, %v352_v22  ;;  %v3361_v22 = vld [vmem:[%s2424_s4 + $0x20] sm:$0xff] }
 0x13b   : > { %2120 = vpow2.f32 %v425_v3  ;;  %v1424_v42 = vadd.f32 %v1422_v13, %v1394_v24  ;;  %v1425_v41 = vadd.f32 %v1423_v55, %v1395_v1  ;;  %v1481_v33 = vstv %s3320_s7 }
 0x13c   : > { %v2111_v36 = vpop.eup %2110  ;;  %2122 = vpow2.f32 %v457_v2  ;;  %v355_v19 = vadd.f32 1.0, %v3323_v7  ;;  %v364_v50 = vadd.f32 1.0, %v3327_v29  ;;  %v358_v23 = vmul.f32 -0.5, %v3323_v7 }
 0x13d   : > { %v1448_v47 = vunpack.c.l.bf16 %v2111_v36  ;;  %v1449_v11 = vunpack.c.h.bf16 %v2111_v36  ;;  %2124 = vpow2.f32 %v459_v59  ;;  %v367_v44 = vmul.f32 -0.5, %v3327_v29 }
 0x13e   : > { %v3325_v14 = vpop.eup %2112  ;;  %2126 = vlog2.f32 %v355_v19  ;;  %v361_v49 = vand.u32 2147483647, %v3323_v7  ;;  %v359_v59 = vadd.f32 1.0, %v358_v23  ;;  %v370_v60 = vand.u32 2147483647, %v3327_v29 }
 0x13f   : > { %v1452_v62 = vmul.f32 %v1451_v31, %v1448_v47  ;;  %v1453_v15 = vmul.f32 %v1451_v31, %v1449_v11  ;;  %v387_v28 = vadd.f32 1.0, %v3325_v14  ;;  %2128 = vlog2.f32 %v364_v50 }
 0x140   : > { %v390_v57 = vmul.f32 -0.5, %v3325_v14  ;;  %v375_v36 = vmax.f32 %v3361_v22, %v2586_v21  ;;  %v368_v13 = vadd.f32 1.0, %v367_v44  ;;  %v393_v55 = vand.u32 2147483647, %v3325_v14 }
 0x141   : > { %v1454_v34 = vadd.f32 %v1452_v62, %v1424_v42  ;;  %v1455_v20 = vadd.f32 %v1453_v15, %v1425_v41  ;;  %2130 = vlog2.f32 %v387_v28  ;;  %v3370_v42 = vld [vmem:[%s2424_s4 + $0x28] sm:$0xff]  ;;  %v415_v15 = vmax.f32 %v2722_v54, %v3163_v46 }
 0x142   : > { %v376_v41 = vmax.f32 %v3370_v42, %v2607_v39  ;;  %v391_v62 = vadd.f32 1.0, %v390_v57  ;;  %vm3378_vm8 = vcmp.lt.f32.partialorder %v361_v49, 0.0004427343  ;;  %v3385_v50 = vmul.f32 %v359_v59, %v3323_v7 }
 0x143   : > { %v2115_v18 = vpop.eup %2114  ;;  %vm3387_vm9 = vcmp.lt.f32.partialorder %v370_v60, 0.0004427343  ;;  %vm3395_vm10 = vcmp.lt.f32.partialorder %v393_v55, 0.0004427343 }
 0x144   : > { %v3329_v12 = vpop.eup %2116  ;;  %v1478_v25 = vunpack.c.l.bf16 %v2115_v18  ;;  %v1479_v26 = vunpack.c.h.bf16 %v2115_v18  ;;  %v449_v18 = vmax.f32 %v3163_v46, %v2740_v0 }
 0x145   : > { %v3333_v10 = vpop.eup %2118  ;;  %v396_v16 = vadd.f32 1.0, %v3329_v12  ;;  %v399_v24 = vmul.f32 -0.5, %v3329_v12  ;;  %v402_v47 = vand.u32 2147483647, %v3329_v12 }
 0x146   : > { %v3335_v63 = vpop.eup %2120  ;;  %v1482_v6 = vmul.f32 %v1481_v33, %v1478_v25  ;;  %v1483_v43 = vmul.f32 %v1481_v33, %v1479_v26  ;;  %v427_v51 = vadd.f32 1.0, %v3333_v10  ;;  %v430_v2 = vmul.f32 -0.5, %v3333_v10 }
 0x147   : > { %v3339_v4 = vpop.eup %2122  ;;  %v436_v40 = vadd.f32 1.0, %v3335_v63  ;;  %2132 = vlog2.f32 %v396_v16  ;;  %vm3399_vm11 = vcmp.lt.f32.partialorder %v402_v47, 0.0004427343 }
 0x148   : > { %v3342_v52 = vpop.eup %2124  ;;  %v3345_v27 = vadd.f32 %v1482_v6, %v1454_v34  ;;  %v3347_v35 = vadd.f32 %v1483_v43, %v1455_v20  ;;  %v461_v61 = vadd.f32 1.0, %v3339_v4  ;;  %2134 = vlog2.f32 %v427_v51 }
 0x149   : > { %v470_v53 = vadd.f32 1.0, %v3342_v52  ;;  %2136 = vlog2.f32 %v436_v40  ;;  %v2127_v48 = vpop.eup %2126  ;;  %v464_v11 = vmul.f32 -0.5, %v3339_v4  ;;  %v431_v34 = vadd.f32 1.0, %v430_v2 }
 0x14a   : > { %v1486_v32 = vand.u32 2147483647, %v3345_v27  ;;  %v1487_v37 = vand.u32 2147483647, %v3347_v35  ;;  %2138 = vlog2.f32 %v461_v61  ;;  %v2129_v1 = vpop.eup %2128  ;;  %v439_v20 = vmul.f32 -0.5, %v3335_v63 }
 0x14b   : > { %2140 = vlog2.f32 %v470_v53  ;;  %v2131_v31 = vpop.eup %2130  ;;  %v473_v25 = vmul.f32 -0.5, %v3342_v52  ;;  %v400_v6 = vadd.f32 1.0, %v399_v24  ;;  %v433_v43 = vand.u32 2147483647, %v3333_v10 }
 0x14c   : > { %v1488_v30 = vsub.f32 0.0, %v1486_v32  ;;  %v1489_v3 = vsub.f32 0.0, %v1487_v37  ;;  %v3393_v51 = vmul.f32 %v368_v13, %v3327_v29  ;;  %v465_v7 = vadd.f32 1.0, %v464_v11 }
 0x14d   : > { %v357_v37 = vmul.f32 0.6931472, %v2127_v48  ;;  %v389_v53 = vmul.f32 0.6931472, %v2131_v31  ;;  %v432_v29 = vmul.f32 %v3333_v10, %v431_v34  ;;  %v474_v44 = vadd.f32 1.0, %v473_v25 }
 0x14e   : > { %v1490_v5 = vmul.f32 1.442695, %v1488_v30  ;;  %v1492_v38 = vmul.f32 1.442695, %v1489_v3  ;;  %v392_v30 = vmul.f32 %v3325_v14, %v391_v62  ;;  %v467_v3 = vand.u32 2147483647, %v3339_v4 }
 0x14f   : > { %v366_v49 = vmul.f32 0.6931472, %v2129_v1  ;;  %v401_v2 = vmul.f32 %v3329_v12, %v400_v6  ;;  %vm3407_vm12 = vcmp.lt.f32.partialorder %v433_v43, 0.0004427343  ;;  %v442_v48 = vand.u32 2147483647, %v3335_v63 }
 0x150   : > { %2142 = vpow2.f32 %v1490_v5  ;;  %v466_v24 = vmul.f32 %v3339_v4, %v465_v7  ;;  %v476_v13 = vand.u32 2147483647, %v3342_v52  ;;  %v395_v10 = vsel %vm3395_vm10, %v392_v30, %v389_v53 }
 0x151   : > { %2144 = vpow2.f32 %v1492_v38  ;;  %v2133_v19 = vpop.eup %2132  ;;  %v440_v38 = vadd.f32 1.0, %v439_v20  ;;  %vm3416_vm13 = vcmp.lt.f32.partialorder %v467_v3, 0.0004427343  ;;  %v475_v4 = vmul.f32 %v3342_v52, %v474_v44  ;;  %v2193_v52 = vld [vmem:[%s2424_s4 + $0x30] sm:$0xff] }
 0x152   : > { %v2135_v26 = vpop.eup %2134  ;;  %v398_v47 = vmul.f32 0.6931472, %v2133_v19  ;;  %vm3424_vm14 = vcmp.lt.f32.partialorder %v442_v48, 0.0004427343  ;;  %vm3430_vm15 = vcmp.lt.f32.partialorder %v476_v13, 0.0004427343  ;;  %v405_v33 = vadd.f32 %v395_v10, %v375_v36 }
 0x153   : > { %v2137_v16 = vpop.eup %2136  ;;  %v429_v5 = vmul.f32 0.6931472, %v2135_v26  ;;  %v441_v31 = vmul.f32 %v3335_v63, %v440_v38  ;;  %v363_v63 = vsel %vm3378_vm8, %v3385_v50, %v357_v37  ;;  %v407_v43 = vadd.f32 -9.999779e-13, %v2193_v52  ;;  %v2195_v36 = vld [vmem:[%s2424_s4 + $0x38] sm:$0xff] }
 0x154   : > { %v2139_v32 = vpop.eup %2138  ;;  %v438_v62 = vmul.f32 0.6931472, %v2137_v16  ;;  %v2194_v16 = vld [vmem:[%s2424_s4 + $0x68] sm:$0xff]  ;;  %v404_v53 = vsel %vm3399_vm11, %v401_v2, %v398_v47  ;;  %v1516_v61 = vmax.f32 %v3345_v27, 0.0  ;;  %v3460_v22 = vsel %vm2514_vm6, %v2586_v21, %v363_v63 }
 0x155   : > { %v2141_v23 = vpop.eup %2140  ;;  %v463_v14 = vmul.f32 0.6931472, %v2139_v32  ;;  %v435_v11 = vsel %vm3407_vm12, %v432_v29, %v429_v5  ;;  %v416_v40 = vmax.f32 %v2738_v58, %v2194_v16  ;;  %v450_v7 = vmax.f32 %v2194_v16, %v2742_v9 }
 0x156   : > { %v472_v34 = vmul.f32 0.6931472, %v2141_v23  ;;  %v372_v32 = vsel %vm3387_vm9, %v3393_v51, %v366_v49  ;;  %v445_v50 = vadd.f32 %v435_v11, %v415_v15  ;;  %v444_v37 = vsel %vm3424_vm14, %v441_v31, %v438_v62 }
 0x157   : > { %v469_v25 = vsel %vm3416_vm13, %v466_v24, %v463_v14  ;;  %v408_v15 = vadd.f32 -9.999779e-13, %v2195_v36  ;;  %v1517_v29 = vmax.f32 %v3347_v35, 0.0  ;;  %v3467_v38 = vsel %vm2518_vm7, %v2607_v39, %v372_v32 }
 0x158   : > { %v478_v30 = vsel %vm3430_vm15, %v475_v4, %v472_v34  ;;  %v479_v3 = vadd.f32 %v469_v25, %v449_v18  ;;  %v406_v18 = vadd.f32 %v404_v53, %v376_v41  ;;  %v446_v44 = vadd.f32 %v444_v37, %v416_v40 }
 0x159   : > { %v480_v49 = vadd.f32 %v478_v30, %v450_v7  ;;  %v3474_v21 = vsel %vm2514_vm6, %v405_v33, %v407_v43  ;;  %v447_v2 = vsel %vm230_vm3, %v2722_v54, %v445_v50  ;;  %v1512_v39 = vmin.f32 %v3345_v27, 0.0 }
 0x15a   : > { %v2143_v57 = vpop.eup %2142  ;;  %v481_v59 = vsel %vm230_vm3, %v479_v3, %v2740_v0  ;;  %v1518_v42 = vsub.f32 0.0, %v1516_v61  ;;  %v1513_v8 = vmin.f32 %v3347_v35, 0.0  ;;  %v3486_v10 = vsel %vm2518_vm7, %v406_v18, %v408_v15 }
 0x15b   : > { %v2145_v60 = vpop.eup %2144  ;;  %v1494_v55 = vadd.f32 1.0, %v2143_v57  ;;  %v1497_v20 = vmul.f32 -0.5, %v2143_v57  ;;  %v1500_v51 = vand.u32 2147483647, %v2143_v57  ;;  %v3495_v47 = vadd.f32 %v447_v2, %v3460_v22 }
 0x15c   : > { %v1503_v1 = vadd.f32 1.0, %v2145_v60  ;;  %v1506_v6 = vmul.f32 -0.5, %v2145_v60  ;;  %v1509_v5 = vand.u32 2147483647, %v2145_v60  ;;  %v3498_v35 = vadd.f32 %v481_v59, %v3474_v21 }
 0x15d   : > { %2146 = vlog2.f32 %v1494_v55  ;;  %v1498_v28 = vadd.f32 1.0, %v1497_v20  ;;  %vm1501_vm0 = vcmp.lt.f32.partialorder %v1500_v51, 0.0004427343  ;;  %v1519_v55 = vsub.f32 0.0, %v1517_v29 }
 0x15e   : > { %2148 = vlog2.f32 %v1503_v1  ;;  %v1507_v23 = vadd.f32 1.0, %v1506_v6  ;;  %vm1510_vm1 = vcmp.lt.f32.partialorder %v1509_v5, 0.0004427343  ;;  %v489_v6 = vsub.f32 %v3495_v47, %v3498_v35 }
 0x15f   : > { %v1499_v48 = vmul.f32 %v2143_v57, %v1498_v28  ;;  %v448_v57 = vsel %vm231_vm5, %v2738_v58, %v446_v44 }
 0x160   : > { %v1508_v24 = vmul.f32 %v2145_v60, %v1507_v23  ;;  %v482_v60 = vsel %vm231_vm5, %v480_v49, %v2742_v9  ;;  %v3501_v31 = vadd.f32 %v448_v57, %v3467_v38  ;;  %v491_v33 = vand.u32 2147483647, %v489_v6 }
 0x161   : > { %v3504_v4 = vadd.f32 %v482_v60, %v3486_v10 }
 0x162   : > { %v493_v15 = vsub.f32 0.0, %v491_v33 }
 0x163   : > { %v490_v43 = vsub.f32 %v3501_v31, %v3504_v4 }
 0x164   : > { %v495_v29 = vmul.f32 1.442695, %v493_v15 }
 0x165   : > { %v492_v30 = vand.u32 2147483647, %v490_v43 }
 0x167   : > { %v2147_v14 = vpop.eup %2146  ;;  %v494_v5 = vsub.f32 0.0, %v492_v30 }
 0x168   : > { %v2149_v41 = vpop.eup %2148  ;;  %v1496_v13 = vmul.f32 0.6931472, %v2147_v14 }
 0x169   : > { %v1505_v27 = vmul.f32 0.6931472, %v2149_v41  ;;  %v497_v18 = vmul.f32 1.442695, %v494_v5 }
 0x16a   : > { %v1502_v12 = vsel %vm1501_vm0, %v1499_v48, %v1496_v13 }
 0x16b   : > { %v1511_v1 = vsel %vm1510_vm1, %v1508_v24, %v1505_v27  ;;  %v1514_v17 = vsub.f32 %v1512_v39, %v1502_v12  ;;  %v1520_v11 = vsub.f32 %v1518_v42, %v1502_v12 }
 0x16c   : > { %v1515_v62 = vsub.f32 %v1513_v8, %v1511_v1  ;;  %v1521_v34 = vsub.f32 %v1519_v55, %v1511_v1 }
 0x16d   : > { %v3507_v20 = vadd.f32 %v3163_v46, %v1520_v11  ;;  %v3510_v19 = vadd.f32 %v3163_v46, %v1514_v17 }
 0x16e   : > { %v3512_v25 = vadd.f32 %v2194_v16, %v1521_v34  ;;  %v3514_v26 = vadd.f32 %v2194_v16, %v1515_v62 }
 0x16f   : > { %v1526_v63 = vsub.f32 %v2722_v54, %v3507_v20  ;;  %v1560_v52 = vsub.f32 %v3510_v19, %v2740_v0  ;;  %v1524_v43 = vmax.f32 %v2722_v54, %v3507_v20  ;;  %v1558_v54 = vmax.f32 %v3510_v19, %v2740_v0 }
 0x170   : > { %v1527_v46 = vsub.f32 %v2738_v58, %v3512_v25  ;;  %v1561_v40 = vsub.f32 %v3514_v26, %v2742_v9 }
 0x171   : > { %v1528_v16 = vand.u32 2147483647, %v1526_v63  ;;  %v1562_v7 = vand.u32 2147483647, %v1560_v52 }
 0x172   : > { %v1529_v32 = vand.u32 2147483647, %v1527_v46  ;;  %v1563_v53 = vand.u32 2147483647, %v1561_v40 }
 0x173   : > { %v1530_v50 = vsub.f32 0.0, %v1528_v16  ;;  %v1564_v37 = vsub.f32 0.0, %v1562_v7 }
 0x174   : > { %v1531_v3 = vsub.f32 0.0, %v1529_v32  ;;  %v1565_v28 = vsub.f32 0.0, %v1563_v53  ;;  %v1525_v32 = vmax.f32 %v2738_v58, %v3512_v25 }
 0x175   : > { %v1532_v51 = vmul.f32 1.442695, %v1530_v50  ;;  %v1566_v23 = vmul.f32 1.442695, %v1564_v37 }
 0x176   : > { %v1534_v61 = vmul.f32 1.442695, %v1531_v3  ;;  %v1568_v36 = vmul.f32 1.442695, %v1565_v28 }
 0x177   : > { %2150 = vpow2.f32 %v1532_v51 }
 0x178   : > { %2152 = vpow2.f32 %v1534_v61 }
 0x179   : > { %2154 = vpow2.f32 %v1566_v23  ;;  %v1559_v23 = vmax.f32 %v3514_v26, %v2742_v9 }
 0x17a   : > { %2156 = vpow2.f32 %v1568_v36 }
 0x17b   : > { %2158 = vpow2.f32 %v495_v29 }
 0x17c   : > { %2160 = vpow2.f32 %v497_v18 }
 0x181   : > { %v2151_v44 = vpop.eup %2150 }
 0x182   : > { %v2153_v49 = vpop.eup %2152  ;;  %v1536_v2 = vadd.f32 1.0, %v2151_v44  ;;  %v1539_v39 = vmul.f32 -0.5, %v2151_v44  ;;  %v1542_v27 = vand.u32 2147483647, %v2151_v44 }
 0x183   : > { %v2155_v59 = vpop.eup %2154  ;;  %v1545_v48 = vadd.f32 1.0, %v2153_v49  ;;  %v1548_v42 = vmul.f32 -0.5, %v2153_v49  ;;  %v1551_v1 = vand.u32 2147483647, %v2153_v49 }
 0x184   : > { %v2157_v14 = vpop.eup %2156  ;;  %2162 = vlog2.f32 %v1536_v2  ;;  %v1570_v24 = vadd.f32 1.0, %v2155_v59  ;;  %v1573_v13 = vmul.f32 -0.5, %v2155_v59  ;;  %v1540_v55 = vadd.f32 1.0, %v1539_v39 }
 0x185   : > { %2164 = vlog2.f32 %v1545_v48  ;;  %v1579_v41 = vadd.f32 1.0, %v2157_v14  ;;  %v2159_v8 = vpop.eup %2158  ;;  %v1582_v57 = vmul.f32 -0.5, %v2157_v14  ;;  %v1549_v12 = vadd.f32 1.0, %v1548_v42 }
 0x186   : > { %2166 = vlog2.f32 %v1570_v24  ;;  %v3528_v60 = vpop.eup %2160  ;;  %v1574_v17 = vadd.f32 1.0, %v1573_v13  ;;  %v499_v11 = vadd.f32 1.0, %v2159_v8  ;;  %v1576_v62 = vand.u32 2147483647, %v2155_v59 }
 0x187   : > { %2168 = vlog2.f32 %v1579_v41  ;;  %v508_v34 = vadd.f32 1.0, %v3528_v60  ;;  %v1541_v6 = vmul.f32 %v2151_v44, %v1540_v55  ;;  %v1583_v63 = vadd.f32 1.0, %v1582_v57 }
 0x188   : > { %vm3533_vm2 = vcmp.lt.f32.partialorder %v1542_v27, 0.0004427343  ;;  %v1550_v40 = vmul.f32 %v2153_v49, %v1549_v12  ;;  %v1585_v16 = vand.u32 2147483647, %v2157_v14  ;;  %vm3539_vm4 = vcmp.lt.f32.partialorder %v1551_v1, 0.0004427343 }
 0x189   : > { %v1575_v50 = vmul.f32 %v2155_v59, %v1574_v17  ;;  %2170 = vlog2.f32 %v499_v11  ;;  %vm1577_vm6 = vcmp.lt.f32.partialorder %v1576_v62, 0.0004427343  ;;  %v1584_v28 = vmul.f32 %v2157_v14, %v1583_v63 }
 0x18a   : > { %2172 = vlog2.f32 %v508_v34  ;;  %vm1586_vm7 = vcmp.lt.f32.partialorder %v1585_v16, 0.0004427343  ;;  %v502_v5 = vmul.f32 -0.5, %v2159_v8  ;;  %v511_v18 = vmul.f32 -0.5, %v3528_v60 }
 0x18b   : > { %v487_v1 = vmax.f32 %v3495_v47, %v3498_v35  ;;  %v488_v11 = vmax.f32 %v3501_v31, %v3504_v4 }
 0x18c   : > { %v503_v59 = vadd.f32 1.0, %v502_v5  ;;  %v512_v14 = vadd.f32 1.0, %v511_v18 }
 0x18e   : > { %v2163_v52 = vpop.eup %2162  ;;  %v504_v55 = vmul.f32 %v2159_v8, %v503_v59  ;;  %v513_v57 = vmul.f32 %v3528_v60, %v512_v14 }
 0x18f   : > { %v2165_v7 = vpop.eup %2164  ;;  %v1538_v53 = vmul.f32 0.6931472, %v2163_v52 }
 0x190   : > { %v2167_v37 = vpop.eup %2166  ;;  %v1547_v30 = vmul.f32 0.6931472, %v2165_v7 }
 0x191   : > { %v1544_v20 = vsel %vm3533_vm2, %v1541_v6, %v1538_v53  ;;  %v1572_v3 = vmul.f32 0.6931472, %v2167_v37  ;;  %v2169_v58 = vpop.eup %2168 }
 0x192   : > { %v1553_v25 = vsel %vm3539_vm4, %v1550_v40, %v1547_v30  ;;  %v1554_v51 = vadd.f32 %v1544_v20, %v1524_v43  ;;  %v1581_v15 = vmul.f32 0.6931472, %v2169_v58 }
 0x193   : > { %v1555_v61 = vadd.f32 %v1553_v25, %v1525_v32  ;;  %v1578_v36 = vsel %vm1577_vm6, %v1575_v50, %v1572_v3  ;;  %v2171_v48 = vpop.eup %2170 }
 0x194   : > { %v1588_v0 = vadd.f32 %v1578_v36, %v1558_v54  ;;  %v3552_v19 = vadd.f32 %v1554_v51, %v3460_v22  ;;  %v1587_v29 = vsel %vm1586_vm7, %v1584_v28, %v1581_v15  ;;  %v505_v22 = vand.u32 2147483647, %v2159_v8  ;;  %v2173_v42 = vpop.eup %2172 }
 0x195   : > { %v1589_v44 = vadd.f32 %v1587_v29, %v1559_v23  ;;  %v3556_v49 = vadd.f32 %v1555_v61, %v3467_v38  ;;  %v514_v38 = vand.u32 2147483647, %v3528_v60  ;;  %v501_v13 = vmul.f32 0.6931472, %v2171_v48 }
 0x196   : > { %v3559_v2 = vadd.f32 %v1588_v0, %v3474_v21  ;;  %vm506_vm8 = vcmp.lt.f32.partialorder %v505_v22, 0.0004427343 }
 0x197   : > { %v3562_v9 = vadd.f32 %v1589_v44, %v3486_v10  ;;  %v510_v10 = vmul.f32 0.6931472, %v2173_v42  ;;  %vm515_vm9 = vcmp.lt.f32.partialorder %v514_v38, 0.0004427343  ;;  %v507_v62 = vsel %vm506_vm8, %v504_v55, %v501_v13 }
 0x198   : > { %v1596_v26 = vsub.f32 %v3552_v19, %v3559_v2  ;;  %v517_v6 = vadd.f32 %v507_v62, %v487_v1 }
 0x199   : > { %v1597_v24 = vsub.f32 %v3556_v49, %v3562_v9  ;;  %v516_v34 = vsel %vm515_vm9, %v513_v57, %v510_v10  ;;  %v1595_v58 = vmax.f32 %v3556_v49, %v3562_v9  ;;  %v1793_v57 = vld [vmem:[%s2424_s4 + $0xa8] sm:$0xff] }
 0x19a   : > { %v1598_v39 = vand.u32 2147483647, %v1596_v26  ;;  %v518_v8 = vadd.f32 %v516_v34, %v488_v11  ;;  %v521_v63 = vsub.f32 %v3498_v35, %v517_v6  ;;  %v519_v36 = vsub.f32 %v3495_v47, %v517_v6 }
 0x19b   : > { %v1599_v41 = vand.u32 2147483647, %v1597_v24  ;;  %v1794_v24 = vld [vmem:[%s2424_s4 + $0xb0] sm:$0xff] }
 0x19c   : > { %v1600_v21 = vsub.f32 0.0, %v1598_v39  ;;  %v522_v60 = vsub.f32 %v3504_v4, %v518_v8  ;;  %v1630_v40 = vmul.f32 1.442695, %v521_v63  ;;  %v1594_v4 = vmax.f32 %v3552_v19, %v3559_v2 }
 0x19d   : > { %v1601_v27 = vsub.f32 0.0, %v1599_v41  ;;  %v520_v0 = vsub.f32 %v3501_v31, %v518_v8 }
 0x19e   : > { %v1602_v12 = vmul.f32 1.442695, %v1600_v21  ;;  %v1632_v7 = vmul.f32 1.442695, %v522_v60  ;;  %v1795_v21 = vld [vmem:[%s2424_s4 + $0xb8] sm:$0xff] }
 0x19f   : > { %v1604_v17 = vmul.f32 1.442695, %v1601_v27 }
 0x1a0   : > { %2174 = vpow2.f32 %v1602_v12 }
 0x1a1   : > { %2176 = vpow2.f32 %v1604_v17 }
 0x1aa   : > { %v2175_v52 = vpop.eup %2174 }
 0x1ab   : > { %v1606_v43 = vadd.f32 1.0, %v2175_v52  ;;  %v2177_v46 = vpop.eup %2176  ;;  %v1609_v32 = vmul.f32 -0.5, %v2175_v52  ;;  %v1612_v50 = vand.u32 2147483647, %v2175_v52 }
 0x1ac   : > { %v1615_v16 = vadd.f32 1.0, %v2177_v46  ;;  %v1618_v53 = vmul.f32 -0.5, %v2177_v46  ;;  %v1621_v30 = vand.u32 2147483647, %v2177_v46 }
 0x1ad   : > { %2178 = vlog2.f32 %v1606_v43  ;;  %v1610_v33 = vadd.f32 1.0, %v1609_v32  ;;  %vm1613_vm10 = vcmp.lt.f32.partialorder %v1612_v50, 0.0004427343 }
 0x1ae   : > { %2180 = vlog2.f32 %v1615_v16  ;;  %v1619_v37 = vadd.f32 1.0, %v1618_v53  ;;  %vm1622_vm11 = vcmp.lt.f32.partialorder %v1621_v30, 0.0004427343 }
 0x1af   : > { %2182 = vpow2.f32 %v1630_v40  ;;  %v1611_v54 = vmul.f32 %v2175_v52, %v1610_v33 }
 0x1b0   : > { %2184 = vpow2.f32 %v1632_v7  ;;  %v1620_v3 = vmul.f32 %v2177_v46, %v1619_v37 }
 0x1b7   : > { %v2179_v35 = vpop.eup %2178 }
 0x1b8   : > { %v1608_v20 = vmul.f32 0.6931472, %v2179_v35  ;;  %v2181_v28 = vpop.eup %2180 }
 0x1b9   : > { %v2183_v25 = vpop.eup %2182  ;;  %v1617_v23 = vmul.f32 0.6931472, %v2181_v28 }
 0x1ba   : > { %v1614_v51 = vsel %vm1613_vm10, %v1611_v54, %v1608_v20  ;;  %v2185_v61 = vpop.eup %2184  ;;  %v1634_v26 = vsub.f32 1.0, %v2183_v25 }
 0x1bb   : > { %v1624_v15 = vadd.f32 %v1614_v51, %v1594_v4  ;;  %v1623_v5 = vsel %vm1622_vm11, %v1620_v3, %v1617_v23  ;;  %v1635_v59 = vsub.f32 1.0, %v2185_v61 }
 0x1bc   : > { %v1625_v29 = vadd.f32 %v1623_v5, %v1595_v58 }
 0x1bd   : > { %v1626_v18 = vsub.f32 %v3552_v19, %v1624_v15  ;;  %v1628_v44 = vsub.f32 %v3559_v2, %v1624_v15  ;;  %v1792_v19 = vld [vmem:[%s2424_s4 + $0xa0] sm:$0xff]  ;;  %s1773_s4 = sshll.u32 %s2420_s20, 3 }
 0x1be   : > { %v1627_v22 = vsub.f32 %v3556_v49, %v1625_v29  ;;  %v1629_v48 = vsub.f32 %v3562_v9, %v1625_v29  ;;  %s226_s30 = scalar_lea.vmem [#allocation8], %s1773_s4 }
 0x1bf   : > { %v1636_v14 = vsub.f32 %v519_v36, %v1626_v18  ;;  %v1640_v47 = vsub.f32 %v521_v63, %v1628_v44  ;;  %v1646_v31 = vsel %vm230_vm3, %v1628_v44, %v1626_v18  ;;  %s1681_s10 = sshll.u32 %s226_s30, 4  ;;  %s3601_s10 = int_to_ptr.vmem [resolvable:$true] %s1681_s10 }
 0x1c0   : > { %v1637_v39 = vsub.f32 %v520_v0, %v1627_v22  ;;  %v1641_v38 = vsub.f32 %v522_v60, %v1629_v48  ;;  %v1647_v2 = vsel %vm231_vm5, %v1629_v48, %v1627_v22  ;;  %v1648_v13 = vsub.f32 0.0, %v1646_v31  ;;  %s2209_s23 = scalar_lea.vmem %s3601_s10, 128  ;;  %p2216_p13 = scmp.lt.s32.totalorder %s3601_s10, %s2214_s9 }
 0x1c1   : > { %v1638_v42 = vmul.f32 %v1636_v14, %v1634_v26  ;;  %v1642_v41 = vmul.f32 %v2183_v25, %v1640_v47  ;;  %v1649_v10 = vsub.f32 0.0, %v1647_v2  ;;  %p2210_p4 = scmp.ne.s32.totalorder %s3601_s10, %s2209_s23  ;;  %p2217_p2 = scmp.lt.s32.totalorder %s2215_s27, %s2209_s23 }
 0x1c2   : > { %v1639_v49 = vmul.f32 %v1637_v39, %v1635_v59  ;;  %v1643_v55 = vmul.f32 %v2185_v61, %v1641_v38  ;;  %v1652_v27 = vmul.f32 %v1794_v24, %v1648_v13 }
 0x1c3   : > { %v1644_v9 = vadd.f32 %v1642_v41, %v1638_v42  ;;  %v1653_v1 = vmul.f32 %v1795_v21, %v1649_v10  ;;  %p2211_p5 = pnand %p2210_p4, %p2365_p11  ;;  %p2218_p0 = por %p2217_p2, %p2216_p13 }
 0x1c4   : > { %v1645_v45 = vadd.f32 %v1643_v55, %v1639_v49 }
 0x1c5   : > { %v1650_v12 = vmul.f32 %v1792_v19, %v1644_v9  ;;  %p2212_p6 = pneg %p2211_p5 }
 0x1c6   : > { %v1651_v17 = vmul.f32 %v1793_v57, %v1645_v45 }
 0x1c7   : > { %v1654_v11 = vadd.f32 %v1652_v27, %v1650_v12  ;;  %p2219_p3 = pnand %p2218_p0, %p2212_p6 }
 0x1c8   : > { %v1655_v62 = vadd.f32 %v1653_v1, %v1651_v17 }
 0x1ca   : > { %v1656_v34 = vadd.f32 %v1655_v62, %v1654_v11 }
 0x1cc   : > { %v1657_v6 = vrot.slane %v1656_v34, 4 }
 0x1ce   : > { %v1658_v56 = vadd.f32 %v1657_v6, %v1656_v34 }
 0x1d0   : > { %v1659_v8 = vrot.slane %v1658_v56, 2 }
 0x1d2   : > { %v1660_v63 = vadd.f32 %v1659_v8, %v1658_v56 }
 0x1d4   : > { %v1661_v60 = vrot.slane %v1660_v63, 1 }
 0x1d6   : > { %v1662_v52 = vadd.f32 %v1661_v60, %v1660_v63 }
 0x1d8   : > { %1663 = vadd.xlane.f32.xlu0 %v1662_v52 }
 0x265   : > { %v1664_v43 = vpop.xlane.xlu0 %1663 }
 0x266   : > { %v1665_v46 = vmul.f32 0.0003796566, %v1664_v43 }
 0x268   : > { %1666 = vst [vmem:[%s226_s30] sm:$0xff] %v1665_v46 }
 0x269   : > { %2222 = shalt.err (!%p2219_p3)
}
 0x26a   : > { %s2223_s20 = scalar_lea.hbm %s3599_s18, 128  ;;  %s2227_s21 = scalar_lea.hbm %s3646_s3, 256 }
 0x26b   : > { %p2224_p7 = scmp.ne.s32.totalorder %s3599_s18, %s2223_s20  ;;  %p2228_p10 = scmp.lt.u32.totalorder %s3599_s18, %s3646_s3 }
 0x26c   : > { %p2229_p4 = scmp.lt.u32.totalorder %s2227_s21, %s2223_s20  ;;  %p2231_p6 = scmp.lt.u32.totalorder %s2223_s20, %s3599_s18 }
 0x26d   : > { %p2225_p8 = pnand %p2224_p7, %p2365_p11 }
 0x26e   : > { %p2230_p5 = por %p2229_p4, %p2228_p10 }
 0x26f   : > { %p2226_p9 = pneg %p2225_p8 }
 0x270   : > { %p2232_p13 = por %p2231_p6, %p2230_p5 }
 0x272   : > { %p2233_p2 = pnand %p2232_p13, %p2226_p9 }
 0x274   : > { %2236 = shalt.err (!%p2233_p2)
}
 0x275   : > { %1977 = dma.vmem_to_hbm [thread:$0]  (%p2365_p11), %s3601_s10, 128, %s3599_s18, %s1668_s28  }
 0x276 PF: > { %s1693_s5 = sand.u32 1, %s2267_s14   ;;  %p1984_p0 = pnand %p1766_p1, %p2369_p12 }
 0x277   : > { %s1694_s7 = scalar_lea.sflag [#allocation5], %s1693_s5 }
 0x278   : > { %2262 = dma.done.wait (!%p1984_p0), %s1694_s7, 128  }
 0x279   : > { %2264 = vsyncadd (!%p1984_p0), %s1694_s7, 4294967168  ;;  %p18_p3 = scmp.ge.s32.totalorder %s2338_s19, 4   ;;  %s3680_s14 = smov %s2271_s15 }
 0x27a   : > { %s3681_s15 = smov %s2275_s16  ;;  %s3682_s16 = smov %s2350_s22 }
 0x27b   : > { %s3683_s17 = smov %s2338_s19  ;;  %20 = sbr.rel (!%p18_p3) target bundleno = 8 (0x8), region = 98 }
 0x282   :  { %1699 = vsyncpa [#allocation4], 1 }
 0x283   :  { %1701 = vsyncpa [#allocation4 + $0x1], 1 }
 0x284   :  { %1702 = vsyncpa [#allocation5], 1 }
 0x285   :  { %1704 = vsyncpa [#allocation5 + $0x1], 1 }
 0x286   :  { %1705 = vsyncpa [#allocation6], 1 }
 0x287   :  { %1707 = vsyncpa [#allocation6 + $0x1], 1 }

</bundles_post_ra>
